<compile_context>
chip_gen: v7x
topology: tpu7x:2x2x1
jax: 0.10.0
libtpu: 0.0.40
codegen_flags: <defaults>
</compile_context>

<pallas_src>
import math

import numpy as np
import jax
import jax.numpy as jnp
from jax import lax
from jax.experimental import pallas as pl
from jax.experimental.pallas import tpu as pltpu

# one-hot widths for the 13 categorical columns (client == 1)
C1 = [6, 3, 2, 2, 8, 3, 5, 3, 3, 5, 3, 3, 2]   # sums to 48
NUM_CONT = 6
NUM_CAT = len(C1)
RAW_DIM = NUM_CONT + NUM_CAT                   # 19 raw input columns
IN_DIM = NUM_CONT + sum(C1)                    # 54 encoded features
IN_PAD = 64                                    # pad contraction dim 54 -> 64
N_HIDDEN_1 = 1024
N_HIDDEN_2 = 64
N_HIDDEN_3 = 64

# ---------------------------------------------------------------------------
# Static encode tables (compile-time constants).
#   padded feature lane j:
#     j <  6        : continuous column j (pass-through)
#     6 <= j < 54   : one-hot bit -> (source categorical column, local class)
#     54 <= j < 64  : zero padding
# ---------------------------------------------------------------------------
_CAT_OF_LANE = np.concatenate([np.full(c, i, np.int32) for i, c in enumerate(C1)])
_LOCAL_OF_LANE = np.concatenate([np.arange(c, dtype=np.int32) for c in C1])

_SRC_COL = np.zeros(IN_PAD, np.int32)
_SRC_COL[:NUM_CONT] = np.arange(NUM_CONT)
_SRC_COL[NUM_CONT:IN_DIM] = NUM_CONT + _CAT_OF_LANE

# 0/1 column-gather matrix: gathered[:, j] = x_raw[:, _SRC_COL[j]] (pad lanes -> 0)
_SEL = np.zeros((RAW_DIM, IN_PAD), np.float32)
_SEL[_SRC_COL[:IN_DIM], np.arange(IN_DIM)] = 1.0

# per-lane compare target (local class id); -1 on continuous / pad lanes
_TGT = np.full((1, IN_PAD), -1.0, np.float32)
_TGT[0, NUM_CONT:IN_DIM] = _LOCAL_OF_LANE.astype(np.float32)


def _round_up(n, m):
    return ((n + m - 1) // m) * m


def _bf16_tanh_ok():
    """bf16 EUP exists on v6e / v7x; keep f32 tanh elsewhere (e.g. v5e)."""
    try:
        kind = jax.devices()[0].device_kind.lower()
    except Exception:  # pragma: no cover - defensive
        return False
    return ("v6" in kind) or ("v7" in kind)


def _pick_batch_tile(B):
    """Batch tile: multiple of 256 rows, <=1024, and >=2 grid steps when B allows.

    Per-step live set at tb=1024 is ~7 MiB, which fits every generation's
    scoped-VMEM default (16/32 MiB), so no vmem_limit_bytes override is needed.
    Keeping >=2 grid steps lets ("parallel",) shard the batch across v7x's 2 TCs.
    """
    tb_max = 1024
    half = _round_up(max((B + 1) // 2, 1), 256)
    return min(tb_max, half)


def _make_kernel(bf16_tanh):
    def kernel(x_ref, sel_ref, tgt_ref, w1_ref, b1_ref, w2_ref, b2_ref,
               w3_ref, b3_ref, o_ref):
        """Fused encode + 3-layer MLP on one batch tile.

        x_ref: (tb, 19) f32 raw rows; sel: (19,64) bf16; tgt: (1,64) f32;
        W*: bf16; b*: f32; o_ref: (tb, 64) f32.
        """
        # ---- in-kernel feature build -------------------------------------
        # Column gather via a tiny 0/1 matmul (MXU, K=19 -> negligible), then
        # categorical lanes become one-hot bits with a VPU compare.  Values
        # are exact: indices <= 7 are representable in bf16/f32.
        x = x_ref[...].astype(jnp.bfloat16)                                 # (tb, 19)
        g = jnp.dot(x, sel_ref[...], preferred_element_type=jnp.float32)   # (tb, 64)
        lane = lax.broadcasted_iota(jnp.int32, g.shape, 1)
        is_onehot = (lane >= NUM_CONT) & (lane < IN_DIM)
        onehot = (g == tgt_ref[...]).astype(jnp.float32)
        feat = jnp.where(is_onehot, onehot, g).astype(jnp.bfloat16)         # (tb, 64)

        # ---- layer 1 ------------------------------------------------------
        z1 = jnp.dot(feat, w1_ref[...], preferred_element_type=jnp.float32) + b1_ref[...]
        if bf16_tanh:
            h1 = jnp.tanh(z1.astype(jnp.bfloat16))          # bf16 EUP, halves pushes
        else:
            h1 = jnp.tanh(z1).astype(jnp.bfloat16)

        # ---- layer 2 ------------------------------------------------------
        z2 = jnp.dot(h1, w2_ref[...], preferred_element_type=jnp.float32) + b2_ref[...]
        if bf16_tanh:
            h2 = jnp.tanh(z2.astype(jnp.bfloat16))
        else:
            h2 = jnp.tanh(z2).astype(jnp.bfloat16)

        # ---- layer 3 (f32 output contract) --------------------------------
        z3 = jnp.dot(h2, w3_ref[...], preferred_element_type=jnp.float32) + b3_ref[...]
        o_ref[...] = jnp.tanh(z3)

    return kernel


def mlp_pallas(x_raw, sel, tgt, w1, b1, w2, b2, w3, b3, *, tb, bf16_tanh):
    """x_raw: (Bp, 19) f32, Bp % tb == 0.  Returns (Bp, 64) f32."""
    Bp = x_raw.shape[0]
    grid = (Bp // tb,)

    cost = pl.CostEstimate(
        flops=2 * Bp * (RAW_DIM * IN_PAD
                        + IN_PAD * N_HIDDEN_1
                        + N_HIDDEN_1 * N_HIDDEN_2
                        + N_HIDDEN_2 * N_HIDDEN_3),
        transcendentals=Bp * (N_HIDDEN_1 + N_HIDDEN_2 + N_HIDDEN_3),
        bytes_accessed=(x_raw.size * 4
                        + (sel.size + w1.size + w2.size + w3.size) * 2
                        + (tgt.size + b1.size + b2.size + b3.size) * 4
                        + Bp * N_HIDDEN_3 * 4),
    )

    return pl.pallas_call(
        _make_kernel(bf16_tanh),
        out_shape=jax.ShapeDtypeStruct((Bp, N_HIDDEN_3), jnp.float32),
        grid_spec=pltpu.PrefetchScalarGridSpec(
            num_scalar_prefetch=0,
            grid=grid,
            in_specs=[
                pl.BlockSpec((tb, RAW_DIM), lambda i: (i, 0)),              # raw x tile
                pl.BlockSpec((RAW_DIM, IN_PAD), lambda i: (0, 0)),          # sel (resident)
                pl.BlockSpec((1, IN_PAD), lambda i: (0, 0)),                # tgt (resident)
                pl.BlockSpec((IN_PAD, N_HIDDEN_1), lambda i: (0, 0)),       # W1
                pl.BlockSpec((1, N_HIDDEN_1), lambda i: (0, 0)),            # b1
                pl.BlockSpec((N_HIDDEN_1, N_HIDDEN_2), lambda i: (0, 0)),   # W2
                pl.BlockSpec((1, N_HIDDEN_2), lambda i: (0, 0)),            # b2
                pl.BlockSpec((N_HIDDEN_2, N_HIDDEN_3), lambda i: (0, 0)),   # W3
                pl.BlockSpec((1, N_HIDDEN_3), lambda i: (0, 0)),            # b3
            ],
            out_specs=pl.BlockSpec((tb, N_HIDDEN_3), lambda i: (i, 0)),     # (tb, 64), full last dim
        ),
        compiler_params=pltpu.CompilerParams(
            dimension_semantics=("parallel",),
        ),
        cost_estimate=cost,
    )(x_raw, sel, tgt, w1, b1, w2, b2, w3, b3)


def encode_client1(x):
    """Pure-JAX one-hot expansion (reference only): (B, 19) -> (B, 54)."""
    z = x[:, NUM_CONT:].astype(jnp.int32)                             # (B, 13)
    zg = jnp.take(z, jnp.asarray(_CAT_OF_LANE), axis=1)               # (B, 48)
    onehot = (zg == jnp.asarray(_LOCAL_OF_LANE)[None, :]).astype(x.dtype)
    return jnp.concatenate([x[:, :NUM_CONT], onehot], axis=1)         # (B, 54)


def init_linear(key, fan_in, fan_out):
    """PyTorch nn.Linear default init: U(-1/sqrt(fan_in), 1/sqrt(fan_in))."""
    kw, kb = jax.random.split(key)
    bound = 1.0 / math.sqrt(fan_in)
    w = jax.random.uniform(kw, (fan_in, fan_out), jnp.float32, -bound, bound)
    b = jax.random.uniform(kb, (1, fan_out), jnp.float32, -bound, bound)
    return w, b


@jax.jit
def forward_client1(x, params):
    B = x.shape[0]
    w1, b1, w2, b2, w3, b3 = params

    # Pad the contraction dim of W1 (54 -> 64); the extra feature lanes built
    # in-kernel are zero so the padded rows contribute nothing.
    w1p = jnp.pad(w1, ((0, IN_PAD - IN_DIM), (0, 0)))

    tb = _pick_batch_tile(B)
    Bp = _round_up(B, tb)
    x_pad = jnp.pad(x, ((0, Bp - B), (0, 0)))     # raw 19-wide rows only

    out = mlp_pallas(
        x_pad,
        jnp.asarray(_SEL, jnp.bfloat16), jnp.asarray(_TGT, jnp.float32),
        w1p.astype(jnp.bfloat16), b1,
        w2.astype(jnp.bfloat16), b2,
        w3.astype(jnp.bfloat16), b3,
        tb=tb, bf16_tanh=_bf16_tanh_ok(),
    )
    return out[:B]


def forward_reference(x, params, emulate_bf16):
    """Pure-JAX reference. emulate_bf16 mimics the kernel's bf16 MXU inputs."""
    x54 = encode_client1(x)
    w1, b1, w2, b2, w3, b3 = params

    def q(a):
        if emulate_bf16:
            return a.astype(jnp.bfloat16).astype(jnp.float32)
        return a

    h1 = jnp.tanh(q(x54) @ q(w1) + b1)
    h2 = jnp.tanh(q(h1) @ q(w2) + b2)
    return jnp.tanh(q(h2) @ q(w3) + b3)


if __name__ == "__main__":
    key = jax.random.PRNGKey(0)
    k_cont, k_cat, k1, k2, k3 = jax.random.split(key, 5)

    # Deterministic parameters (shapes from the module's __init__, client=1).
    w1, b1 = init_linear(k1, IN_DIM, N_HIDDEN_1)
    w2, b2 = init_linear(k2, N_HIDDEN_1, N_HIDDEN_2)
    w3, b3 = init_linear(k3, N_HIDDEN_2, N_HIDDEN_3)
    params = (w1, b1, w2, b2, w3, b3)

    # Small example input: 6 continuous columns + 13 categorical index columns.
    B = 8
    cont = jax.random.uniform(k_cont, (B, NUM_CONT), jnp.float32)
    cat_keys = jax.random.split(k_cat, NUM_CAT)
    cats = [
        jax.random.randint(cat_keys[i], (B, 1), 0, C1[i]).astype(jnp.float32)
        for i in range(NUM_CAT)
    ]
    x = jnp.concatenate([cont] + cats, axis=1)  # (B, 19)

    out = forward_client1(x, params)
    jax.block_until_ready(out)

    ref_bf16 = forward_reference(x, params, emulate_bf16=True)
    ref_f32 = forward_reference(x, params, emulate_bf16=False)

    assert out.shape == (B, N_HIDDEN_3)
    assert jnp.allclose(out, ref_bf16, atol=2e-2, rtol=2e-2), "mismatch vs bf16 ref"
    assert jnp.allclose(out, ref_f32, atol=5e-2, rtol=5e-2), "mismatch vs f32 ref"

    print("KERNEL_OK")
</pallas_src>

<mosaic_0001>
module attributes {stable_mosaic.version = 11 : i64} {
  func.func @kernel(%arg0: i32, %arg1: memref<256x19xf32, #tpu.memory_space<vmem>>, %arg2: memref<19x64xbf16, #tpu.memory_space<vmem>>, %arg3: memref<1x64xf32, #tpu.memory_space<vmem>>, %arg4: memref<64x1024xbf16, #tpu.memory_space<vmem>>, %arg5: memref<1x1024xf32, #tpu.memory_space<vmem>>, %arg6: memref<1024x64xbf16, #tpu.memory_space<vmem>>, %arg7: memref<1x64xf32, #tpu.memory_space<vmem>>, %arg8: memref<64x64xbf16, #tpu.memory_space<vmem>>, %arg9: memref<1x64xf32, #tpu.memory_space<vmem>>, %arg10: memref<256x64xf32, #tpu.memory_space<vmem>>) attributes {dimension_semantics = [#tpu.dimension_semantics<parallel>], iteration_bounds = array<i64: 1>, scalar_prefetch = 0 : i64, scratch_operands = 0 : i64, tpu.core_type = #tpu.core_type<tc>, window_params = [{transform_indices = @transform_0, window_bounds = array<i64: 256, 19>}, {pipeline_mode = #tpu.pipeline_mode<synchronous>, transform_indices = @transform_1, window_bounds = array<i64: 19, 64>}, {pipeline_mode = #tpu.pipeline_mode<synchronous>, transform_indices = @transform_2, window_bounds = array<i64: 1, 64>}, {pipeline_mode = #tpu.pipeline_mode<synchronous>, transform_indices = @transform_3, window_bounds = array<i64: 64, 1024>}, {pipeline_mode = #tpu.pipeline_mode<synchronous>, transform_indices = @transform_4, window_bounds = array<i64: 1, 1024>}, {pipeline_mode = #tpu.pipeline_mode<synchronous>, transform_indices = @transform_5, window_bounds = array<i64: 1024, 64>}, {pipeline_mode = #tpu.pipeline_mode<synchronous>, transform_indices = @transform_6, window_bounds = array<i64: 1, 64>}, {pipeline_mode = #tpu.pipeline_mode<synchronous>, transform_indices = @transform_7, window_bounds = array<i64: 64, 64>}, {pipeline_mode = #tpu.pipeline_mode<synchronous>, transform_indices = @transform_8, window_bounds = array<i64: 1, 64>}, {transform_indices = @transform_9, window_bounds = array<i64: 256, 64>}]} {
    %c0 = arith.constant 0 : index
    %c0_0 = arith.constant 0 : index
    %0 = vector.load %arg1[%c0, %c0_0] : memref<256x19xf32, #tpu.memory_space<vmem>>, vector<256x19xf32>
    %1 = arith.truncf %0 : vector<256x19xf32> to vector<256x19xbf16>
    %c0_1 = arith.constant 0 : index
    %c0_2 = arith.constant 0 : index
    %2 = vector.load %arg2[%c0_1, %c0_2] : memref<19x64xbf16, #tpu.memory_space<vmem>>, vector<19x64xbf16>
    %cst = arith.constant dense<0.000000e+00> : vector<256x64xf32>
    %3 = tpu.matmul %1, %2, %cst {dimension_numbers = #tpu.dot_dimension_numbers<[1], [0], [0], [1], [0, 0, 1, 1], [], []>} : vector<256x19xbf16>, vector<19x64xbf16>, vector<256x64xf32> -> vector<256x64xf32>
    %4 = tpu.iota {dimensions = array<i32: 1>} : vector<256x64xi32>
    %c6_i32 = arith.constant 6 : i32
    %5 = vector.broadcast %c6_i32 : i32 to vector<256x64xi32>
    %6 = arith.cmpi sge, %4, %5 : vector<256x64xi32>
    %c54_i32 = arith.constant 54 : i32
    %7 = vector.broadcast %c54_i32 : i32 to vector<256x64xi32>
    %8 = arith.cmpi slt, %4, %7 : vector<256x64xi32>
    %9 = arith.andi %6, %8 : vector<256x64xi1>
    %c0_3 = arith.constant 0 : index
    %c0_4 = arith.constant 0 : index
    %10 = vector.load %arg3[%c0_3, %c0_4] : memref<1x64xf32, #tpu.memory_space<vmem>>, vector<1x64xf32>
    %11 = vector.broadcast %10 : vector<1x64xf32> to vector<256x64xf32>
    %12 = arith.cmpf oeq, %3, %11 : vector<256x64xf32>
    %13 = arith.extui %12 : vector<256x64xi1> to vector<256x64xi32>
    %14 = arith.sitofp %13 : vector<256x64xi32> to vector<256x64xf32>
    %15 = arith.select %9, %14, %3 : vector<256x64xi1>, vector<256x64xf32>
    %16 = arith.truncf %15 : vector<256x64xf32> to vector<256x64xbf16>
    %c0_5 = arith.constant 0 : index
    %c0_6 = arith.constant 0 : index
    %17 = vector.load %arg4[%c0_5, %c0_6] : memref<64x1024xbf16, #tpu.memory_space<vmem>>, vector<64x1024xbf16>
    %cst_7 = arith.constant dense<0.000000e+00> : vector<256x1024xf32>
    %18 = tpu.matmul %16, %17, %cst_7 {dimension_numbers = #tpu.dot_dimension_numbers<[1], [0], [0], [1], [0, 0, 1, 1], [], []>} : vector<256x64xbf16>, vector<64x1024xbf16>, vector<256x1024xf32> -> vector<256x1024xf32>
    %c0_8 = arith.constant 0 : index
    %c0_9 = arith.constant 0 : index
    %19 = vector.load %arg5[%c0_8, %c0_9] : memref<1x1024xf32, #tpu.memory_space<vmem>>, vector<1x1024xf32>
    %20 = vector.broadcast %19 : vector<1x1024xf32> to vector<256x1024xf32>
    %21 = arith.addf %18, %20 : vector<256x1024xf32>
    %22 = math.tanh %21 : vector<256x1024xf32>
    %23 = arith.truncf %22 : vector<256x1024xf32> to vector<256x1024xbf16>
    %c0_10 = arith.constant 0 : index
    %c0_11 = arith.constant 0 : index
    %24 = vector.load %arg6[%c0_10, %c0_11] : memref<1024x64xbf16, #tpu.memory_space<vmem>>, vector<1024x64xbf16>
    %cst_12 = arith.constant dense<0.000000e+00> : vector<256x64xf32>
    %25 = tpu.matmul %23, %24, %cst_12 {dimension_numbers = #tpu.dot_dimension_numbers<[1], [0], [0], [1], [0, 0, 1, 1], [], []>} : vector<256x1024xbf16>, vector<1024x64xbf16>, vector<256x64xf32> -> vector<256x64xf32>
    %c0_13 = arith.constant 0 : index
    %c0_14 = arith.constant 0 : index
    %26 = vector.load %arg7[%c0_13, %c0_14] : memref<1x64xf32, #tpu.memory_space<vmem>>, vector<1x64xf32>
    %27 = vector.broadcast %26 : vector<1x64xf32> to vector<256x64xf32>
    %28 = arith.addf %25, %27 : vector<256x64xf32>
    %29 = math.tanh %28 : vector<256x64xf32>
    %30 = arith.truncf %29 : vector<256x64xf32> to vector<256x64xbf16>
    %c0_15 = arith.constant 0 : index
    %c0_16 = arith.constant 0 : index
    %31 = vector.load %arg8[%c0_15, %c0_16] : memref<64x64xbf16, #tpu.memory_space<vmem>>, vector<64x64xbf16>
    %cst_17 = arith.constant dense<0.000000e+00> : vector<256x64xf32>
    %32 = tpu.matmul %30, %31, %cst_17 {dimension_numbers = #tpu.dot_dimension_numbers<[1], [0], [0], [1], [0, 0, 1, 1], [], []>} : vector<256x64xbf16>, vector<64x64xbf16>, vector<256x64xf32> -> vector<256x64xf32>
    %c0_18 = arith.constant 0 : index
    %c0_19 = arith.constant 0 : index
    %33 = vector.load %arg9[%c0_18, %c0_19] : memref<1x64xf32, #tpu.memory_space<vmem>>, vector<1x64xf32>
    %34 = vector.broadcast %33 : vector<1x64xf32> to vector<256x64xf32>
    %35 = arith.addf %32, %34 : vector<256x64xf32>
    %36 = math.tanh %35 : vector<256x64xf32>
    %c0_20 = arith.constant 0 : index
    %c0_21 = arith.constant 0 : index
    %37 = vector.load %arg10[%c0_20, %c0_21] : memref<256x64xf32, #tpu.memory_space<vmem>>, vector<256x64xf32>
    tpu.vector_store %arg10[%c0_20, %c0_21], %36 {strides = array<i32>} : memref<256x64xf32, #tpu.memory_space<vmem>>, vector<256x64xf32>,
    return
  }
  func.func @transform_0(%arg0: i32) -> (i32, i32) {
    %c0_i32 = arith.constant 0 : i32
    %c0_i32_0 = arith.constant 0 : i32
    return %arg0, %c0_i32 : i32, i32
  }
  func.func @transform_1(%arg0: i32) -> (i32, i32) {
    %c0_i32 = arith.constant 0 : i32
    %c0_i32_0 = arith.constant 0 : i32
    %c0_i32_1 = arith.constant 0 : i32
    return %c0_i32, %c0_i32_0 : i32, i32
  }
  func.func @transform_2(%arg0: i32) -> (i32, i32) {
    %c0_i32 = arith.constant 0 : i32
    %c0_i32_0 = arith.constant 0 : i32
    %c0_i32_1 = arith.constant 0 : i32
    return %c0_i32, %c0_i32_0 : i32, i32
  }
  func.func @transform_3(%arg0: i32) -> (i32, i32) {
    %c0_i32 = arith.constant 0 : i32
    %c0_i32_0 = arith.constant 0 : i32
    %c0_i32_1 = arith.constant 0 : i32
    return %c0_i32, %c0_i32_0 : i32, i32
  }
  func.func @transform_4(%arg0: i32) -> (i32, i32) {
    %c0_i32 = arith.constant 0 : i32
    %c0_i32_0 = arith.constant 0 : i32
    %c0_i32_1 = arith.constant 0 : i32
    return %c0_i32, %c0_i32_0 : i32, i32
  }
  func.func @transform_5(%arg0: i32) -> (i32, i32) {
    %c0_i32 = arith.constant 0 : i32
    %c0_i32_0 = arith.constant 0 : i32
    %c0_i32_1 = arith.constant 0 : i32
    return %c0_i32, %c0_i32_0 : i32, i32
  }
  func.func @transform_6(%arg0: i32) -> (i32, i32) {
    %c0_i32 = arith.constant 0 : i32
    %c0_i32_0 = arith.constant 0 : i32
    %c0_i32_1 = arith.constant 0 : i32
    return %c0_i32, %c0_i32_0 : i32, i32
  }
  func.func @transform_7(%arg0: i32) -> (i32, i32) {
    %c0_i32 = arith.constant 0 : i32
    %c0_i32_0 = arith.constant 0 : i32
    %c0_i32_1 = arith.constant 0 : i32
    return %c0_i32, %c0_i32_0 : i32, i32
  }
  func.func @transform_8(%arg0: i32) -> (i32, i32) {
    %c0_i32 = arith.constant 0 : i32
    %c0_i32_0 = arith.constant 0 : i32
    %c0_i32_1 = arith.constant 0 : i32
    return %c0_i32, %c0_i32_0 : i32, i32
  }
  func.func @transform_9(%arg0: i32) -> (i32, i32) {
    %c0_i32 = arith.constant 0 : i32
    %c0_i32_0 = arith.constant 0 : i32
    return %arg0, %c0_i32 : i32, i32
  }
}

</mosaic_0001>

<bundles_post_ra>
// kernel: forward_client1.1
= control target key start
LH: loop header
LB: loop body
LE: loop exit
PB: predicated region body
PF: predicated region fallthrough
CT: control target
= control target key end

     0   :  { %vm142_vm0 = vcmask 1040384   ;;  %vm143_vm1 = vcmask 1041408   ;;  %v4940_v1 = vmov 65535   ;;  %vm93_vm2 = vcmask 154624   ;;  %s7535_s1 = inlined_call_operand.vmem [shape: bf16[19,64], index: 1, kind: input, shape index: {}]   ;;  %s7536_s0 = inlined_call_operand.vmem [shape: f32[256,19], index: 0, kind: input, shape index: {}]   ;;  %s7537_s3 = inlined_call_operand.vmem [shape: bf16[64,1024], index: 3, kind: input, shape index: {}]   ;;  %s7538_s4 = inlined_call_operand.vmem [shape: f32[1,1024], index: 4, kind: input, shape index: {}]   ;;  %s7539_s2 = inlined_call_operand.vmem [shape: f32[1,64], index: 2, kind: input, shape index: {}]   ;;  %s7540_s5 = inlined_call_operand.vmem [shape: bf16[1024,64], index: 5, kind: input, shape index: {}]   ;;  %s7541_s7 = inlined_call_operand.vmem [shape: bf16[64,64], index: 7, kind: input, shape index: {}]   ;;  %s7542_s6 = inlined_call_operand.vmem [shape: f32[1,64], index: 6, kind: input, shape index: {}]   ;;  %s7543_s8 = inlined_call_operand.vmem [shape: f32[1,64], index: 8, kind: input, shape index: {}]   ;;  %s7544_s9 = inlined_call_operand.vmem [shape: f32[256,64], index: 9, kind: output, shape index: {}]  }
   0x1   :  { %v4230_v0 = vld [vmem:[%s7535_s1] sm:$0xff]   ;;  %v144_v2 = vsel %vm142_vm0, 4294967295, %v4940_v1  ;;  %v4231_v3 = vld [vmem:[%s7535_s1 + $0x8] ss:$0 sps:$4 sm:$0x33]   ;;  %v35_v9 = vld [vmem:[%s7536_s0 + $0x10] sm:$0xff] }
   0x2   :  { %v145_v4 = vsel %vm143_vm1, %v144_v2, 0  ;;  %4151 = vmatprep.subr.bf16.mxu0 %v4230_v0  ;;  %v33_v5 = vld [vmem:[%s7536_s0] sm:$0xff]  ;;  %v34_v6 = vld [vmem:[%s7536_s0 + $0x8] sm:$0xff]  ;;  %v36_v10 = vld [vmem:[%s7536_s0 + $0x18] sm:$0xff]  ;;  %vm700_vm8 = vcmask 523264  }
   0x3   :  { %4152 = vmatpush3.bf16.msra.mxu0 %v4230_v0  ;;  %v147_v7 = vand.u32 %v4231_v3, %v145_v4  ;;  %v65_v8 = vpack.c.bf16 %v34_v6, %v33_v5  ;;  %v37_v11 = vld [vmem:[%s7536_s0 + $0x20] sm:$0xff]  ;;  %v38_v12 = vld [vmem:[%s7536_s0 + $0x28] sm:$0xff]  ;;  %v66_v13 = vpack.c.bf16 %v36_v10, %v35_v9  ;;  %v39_v15 = vld [vmem:[%s7536_s0 + $0x30] sm:$0xff] }
   0x4   :  { %v67_v14 = vpack.c.bf16 %v38_v12, %v37_v11  ;;  %v40_v16 = vld [vmem:[%s7536_s0 + $0x38] sm:$0xff]  ;;  %v41_v17 = vld [vmem:[%s7536_s0 + $0x40] sm:$0xff]  ;;  %v42_v18 = vld [vmem:[%s7536_s0 + $0x48] sm:$0xff] }
   0x5   :  { %4153 = vmatprep.subr.bf16.mxu0 %v147_v7  ;;  %4155 = vmatprep.mubr.msk.bf16.mxu0 %vm93_vm2, %v65_v8  ;;  %v467_v19 = vld [vmem:[%s7537_s3 + $0x8] sm:$0xff]  ;;  %v68_v23 = vpack.c.bf16 %v40_v16, %v39_v15  ;;  %v466_v27 = vld [vmem:[%s7537_s3] sm:$0xff]  ;;  %v69_v28 = vpack.c.bf16 %v42_v18, %v41_v17  ;;  %v43_v38 = vld [vmem:[%s7536_s0 + $0x50] sm:$0xff] }
   0x6   :  { %v471_v20 = vld [vmem:[%s7537_s3 + $0x28] sm:$0xff]  ;;  %v470_v31 = vld [vmem:[%s7537_s3 + $0x20] sm:$0xff]  ;;  %v44_v40 = vld [vmem:[%s7536_s0 + $0x58] sm:$0xff] }
   0x7   :  { %4154 = vmatpush3.bf16.msra.mxu0 %v147_v7  ;;  %v475_v21 = vld [vmem:[%s7537_s3 + $0x48] sm:$0xff]  ;;  %v3485_v24 = vcombine.low %v467_v19, %v471_v20  ;;  %v3486_v25 = vcombine.high %v467_v19, %v471_v20  ;;  %v3484_v32 = vcombine.high %v466_v27, %v470_v31  ;;  %v3483_v33 = vcombine.low %v466_v27, %v470_v31  ;;  %v474_v34 = vld [vmem:[%s7537_s3 + $0x40] sm:$0xff]  ;;  %v47_v51 = vld [vmem:[%s7536_s0 + $0x70] sm:$0xff] }
   0x8   :  { %v479_v22 = vld [vmem:[%s7537_s3 + $0x68] sm:$0xff]  ;;  %v478_v35 = vld [vmem:[%s7537_s3 + $0x60] sm:$0xff]  ;;  %v70_v47 = vpack.c.bf16 %v44_v40, %v43_v38  ;;  %v48_v52 = vld [vmem:[%s7536_s0 + $0x78] sm:$0xff] }
   0x9   :  { %v3494_v26 = vcombine.high %v475_v21, %v479_v22  ;;  %v483_v29 = vld [vmem:[%s7537_s3 + $0x88] sm:$0xff]  ;;  %942 = vmatprep.subr.bf16.mxu0 %v3486_v25  ;;  %v3493_v36 = vcombine.low %v475_v21, %v479_v22  ;;  %v3492_v37 = vcombine.high %v474_v34, %v478_v35  ;;  %749 = vmatprep.subr.bf16.mxu1 %v3484_v32  ;;  %v45_v43 = vld [vmem:[%s7536_s0 + $0x60] sm:$0xff]  ;;  %v51_v57 = vld [vmem:[%s7536_s0 + $0x90] sm:$0xff]  ;;  %v310_v22 = vlaneseq }
   0xa   :  { %4156 = vmatmul.mubr.msk.bf16.vlgmr.msra.gmra.mrb[0].mxu0 %vm93_vm2, %v66_v13  ;;  %v487_v30 = vld [vmem:[%s7537_s3 + $0xa8] sm:$0xff]  ;;  %750 = vmatpush1.bf16.msra.mxu1 %v3483_v33  ;;  %v3491_v45 = vcombine.low %v474_v34, %v478_v35  ;;  %v49_v53 = vld [vmem:[%s7536_s0 + $0x80] sm:$0xff]  ;;  %v72_v55 = vpack.c.bf16 %v48_v52, %v47_v51  ;;  %v52_v58 = vld [vmem:[%s7536_s0 + $0x98] sm:$0xff]  ;;  %v4941_v25 = vmov 0  }
   0xb   :  { %4159 = vmatprep.mubr.msk.bf16.mxu0 %vm93_vm2, %v67_v14  ;;  %943 = vmatpush1.bf16.msra.mxu0 %v3485_v24  ;;  %v3502_v39 = vcombine.high %v483_v29, %v487_v30  ;;  %v491_v41 = vld [vmem:[%s7537_s3 + $0xc8] sm:$0xff]  ;;  %v3501_v46 = vcombine.low %v483_v29, %v487_v30  ;;  %v53_v59 = vld [vmem:[%s7536_s0 + $0xa0] sm:$0xff]  ;;  %v74_v61 = vpack.c.bf16 %v52_v58, %v51_v57  ;;  %v55_v63 = vld [vmem:[%s7536_s0 + $0xb0] sm:$0xff] }
   0xc   :  { %944 = vmatprep.subr.bf16.mxu0 %v3494_v26  ;;  %v495_v42 = vld [vmem:[%s7537_s3 + $0xe8] sm:$0xff]  ;;  %751 = vmatprep.subr.bf16.mxu1 %v3492_v37  ;;  %v56_v0 = vld [vmem:[%s7536_s0 + $0xb8] sm:$0xff]  ;;  %v57_v1 = vld [vmem:[%s7536_s0 + $0xc0] sm:$0xff] }
   0xd   :  { %v46_v44 = vld [vmem:[%s7536_s0 + $0x68] sm:$0xff]  ;;  %v3510_v48 = vcombine.high %v491_v41, %v495_v42  ;;  %v3509_v50 = vcombine.low %v491_v41, %v495_v42  ;;  %v76_v3 = vpack.c.bf16 %v56_v0, %v55_v63  ;;  %v59_v5 = vld [vmem:[%s7536_s0 + $0xd0] sm:$0xff]  ;;  %v60_v6 = vld [vmem:[%s7536_s0 + $0xd8] sm:$0xff]  ;;  %781 = vmatprep.mubr.bf16.mxu1 %v4941_v25  ;;  %v311_v42 = vand.u32 127, %v310_v22 }
   0xe   :  { %v71_v49 = vpack.c.bf16 %v46_v44, %v45_v43  ;;  %752 = vmatpush1.bf16.msra.mxu1 %v3491_v45  ;;  %v50_v54 = vld [vmem:[%s7536_s0 + $0x88] sm:$0xff]  ;;  %v61_v7 = vld [vmem:[%s7536_s0 + $0xe0] sm:$0xff]  ;;  %v78_v9 = vpack.c.bf16 %v60_v6, %v59_v5  ;;  %v63_v11 = vld [vmem:[%s7536_s0 + $0xf0] sm:$0xff] }
   0xf   :  { %945 = vmatpush1.bf16.msra.mxu0 %v3493_v36  ;;  %v73_v56 = vpack.c.bf16 %v50_v54, %v49_v53  ;;  %v54_v60 = vld [vmem:[%s7536_s0 + $0xa8] sm:$0xff]  ;;  %v64_v12 = vld [vmem:[%s7536_s0 + $0xf8] sm:$0xff]  ;;  %v482_v14 = vld [vmem:[%s7537_s3 + $0x80] sm:$0xff]  ;;  %vm312_vm3 = vcmp.ge.s32.totalorder %v311_v42, 6  ;;  %vm313_vm4 = vcmp.lt.s32.totalorder %v311_v42, 54 }
  0x10   :  { %946 = vmatprep.subr.bf16.mxu0 %v3502_v39  ;;  %v75_v62 = vpack.c.bf16 %v54_v60, %v53_v59  ;;  %v58_v2 = vld [vmem:[%s7536_s0 + $0xc8] sm:$0xff]  ;;  %v80_v13 = vpack.c.bf16 %v64_v12, %v63_v11  ;;  %v486_v15 = vld [vmem:[%s7537_s3 + $0xa0] sm:$0xff]  ;;  %v5167_v24 = vld [vmem:[%s7537_s3 + $0x30] sm:$0xff] }
  0x11   :  { %v77_v4 = vpack.c.bf16 %v58_v2, %v57_v1  ;;  %v62_v8 = vld [vmem:[%s7536_s0 + $0xe8] sm:$0xff]  ;;  %v3500_v16 = vcombine.high %v482_v14, %v486_v15  ;;  %v3499_v17 = vcombine.low %v482_v14, %v486_v15  ;;  %v490_v18 = vld [vmem:[%s7537_s3 + $0xc0] sm:$0xff]  ;;  %v469_v33 = vld [vmem:[%s7537_s3 + $0x18] sm:$0xff] }
  0x12   :  { %4160 = vmatmul.mubr.msk.bf16.gmra.mrb[4].mxu0 %vm93_vm2, %v68_v23  ;;  %v79_v10 = vpack.c.bf16 %v62_v8, %v61_v7  ;;  %v494_v19 = vld [vmem:[%s7537_s3 + $0xe0] sm:$0xff]  ;;  %v5162_v23 = vld [vmem:[%s7537_s3 + $0x10] sm:$0xff]  ;;  %v473_v34 = vld [vmem:[%s7537_s3 + $0x38] sm:$0xff] }
  0x13   :  { %4163 = vmatprep.mubr.msk.bf16.mxu0 %vm93_vm2, %v69_v28  ;;  %947 = vmatpush1.bf16.msra.mxu0 %v3501_v46  ;;  %v3508_v20 = vcombine.high %v490_v18, %v494_v19  ;;  %v3507_v21 = vcombine.low %v490_v18, %v494_v19  ;;  %v3487_v26 = vcombine.low %v5162_v23, %v5167_v24  ;;  %v5175_v28 = vshrl.u32 %v310_v22, 7  ;;  %v5190_v35 = vld [vmem:[%s7538_s4] sm:$0xff]  ;;  %vm5210_vm6 = vmand %vm312_vm3, %vm313_vm4  ;;  %v476_v52 = vld [vmem:[%s7537_s3 + $0x50] sm:$0xff] }
  0x14   :  { %948 = vmatprep.subr.bf16.mxu0 %v3510_v48  ;;  %753 = vmatprep.subr.bf16.mxu1 %v3500_v16  ;;  %v3488_v27 = vcombine.high %v5162_v23, %v5167_v24  ;;  %v3489_v40 = vcombine.low %v469_v33, %v473_v34  ;;  %v3490_v41 = vcombine.high %v469_v33, %v473_v34  ;;  %v5207_v43 = vld [vmem:[%s7539_s2] ss:$0 sm:$0xff]  ;;  %v480_v53 = vld [vmem:[%s7537_s3 + $0x70] sm:$0xff]  ;;  %v477_v54 = vld [vmem:[%s7537_s3 + $0x58] sm:$0xff] }
  0x15   :  { %754 = vmatpush1.bf16.msra.mxu1 %v3499_v17  ;;  %v518_v29 = vsub.s32 4, %v5175_v28  ;;  %v522_v30 = vsub.s32 5, %v5175_v28  ;;  %v526_v31 = vsub.s32 6, %v5175_v28  ;;  %v530_v32 = vsub.s32 7, %v5175_v28  ;;  %v5240_v60 = vld [vmem:[%s7537_s3 + $0x90] sm:$0xff]  ;;  %v5256_v1 = vld [vmem:[%s7537_s3 + $0x98] sm:$0xff] }
  0x16   :  { %755 = vmatprep.subr.bf16.mxu1 %v3508_v20  ;;  %v489_v6 = vld [vmem:[%s7537_s3 + $0xb8] sm:$0xff]  ;;  %v3495_v8 = vcombine.low %v476_v52, %v480_v53  ;;  %v492_v17 = vld [vmem:[%s7537_s3 + $0xd0] sm:$0xff]  ;;  %v4235_v46 = vld [vmem:[%s7540_s5 + $0x80] sm:$0xff]  }
  0x17   :  { %949 = vmatpush1.bf16.msra.mxu0 %v3509_v50  ;;  %v5193_v36 = vrot.slane %v5190_v35, %v518_v29  ;;  %v5196_v37 = vrot.slane %v5190_v35, %v522_v30  ;;  %v5199_v38 = vrot.slane %v5190_v35, %v526_v31  ;;  %v5202_v39 = vrot.slane %v5190_v35, %v530_v32  ;;  %v496_v18 = vld [vmem:[%s7537_s3 + $0xf0] sm:$0xff]  ;;  %v497_v24 = vld [vmem:[%s7537_s3 + $0xf8] sm:$0xff] }
  0x18   :  { %1328 = vmatprep.subr.bf16.mxu0 %v3490_v41  ;;  %v3506_v16 = vcombine.high %v5256_v1, %v489_v6  ;;  %v3505_v31 = vcombine.low %v5256_v1, %v489_v6  ;;  %v3512_v33 = vcombine.high %v492_v17, %v496_v18 }
  0x19   :  { %756 = vmatpush1.bf16.msra.mxu1 %v3507_v21  ;;  %v493_v21 = vld [vmem:[%s7537_s3 + $0xd8] sm:$0xff] }
  0x1a   :  { %4164 = vmatmul.mubr.msk.bf16.gmra.mrb[8].mxu0 %vm93_vm2, %v70_v47  ;;  %1135 = vmatprep.subr.bf16.mxu1 %v3488_v27  ;;  %v4942_v47 = vmov 0.0   ;;  %v3514_v34 = vcombine.high %v493_v21, %v497_v24 }
  0x1b   :  { %4167 = vmatprep.mubr.msk.bf16.mxu0 %vm93_vm2, %v71_v49 }
  0x22   :  { %4168 = vmatmul.mubr.msk.bf16.gmra.mrb[12].mxu0 %vm93_vm2, %v72_v55 }
  0x23   :  { %4171 = vmatprep.mubr.msk.bf16.mxu0 %vm93_vm2, %v73_v56  ;;  %v481_v56 = vld [vmem:[%s7537_s3 + $0x78] sm:$0xff] }
  0x24   :  { %v3498_v5 = vcombine.high %v477_v54, %v481_v56  ;;  %v3497_v11 = vcombine.low %v477_v54, %v481_v56  ;;  %v4234_v54 = vld [vmem:[%s7540_s5 + $0xc0] sm:$0xff]  }
  0x2a   :  { %4172 = vmatmul.mubr.msk.bf16.gmra.mrb[16].mxu0 %vm93_vm2, %v74_v61  ;;  %v5245_v61 = vld [vmem:[%s7537_s3 + $0xb0] sm:$0xff] }
  0x2b   :  { %4175 = vmatprep.mubr.msk.bf16.mxu0 %vm93_vm2, %v75_v62  ;;  %v3504_v12 = vcombine.high %v5240_v60, %v5245_v61  ;;  %v3503_v30 = vcombine.low %v5240_v60, %v5245_v61 }
  0x32   :  { %4176 = vmatmul.mubr.msk.bf16.gmra.mrb[20].mxu0 %vm93_vm2, %v76_v3 }
  0x33   :  { %4179 = vmatprep.mubr.msk.bf16.mxu0 %vm93_vm2, %v77_v4  ;;  %v3496_v4 = vcombine.high %v476_v52, %v480_v53 }
  0x3a   :  { %4180 = vmatmul.mubr.msk.bf16.gmra.mrb[24].mxu0 %vm93_vm2, %v78_v9 }
  0x3b   :  { %4183 = vmatprep.mubr.msk.bf16.mxu0 %vm93_vm2, %v79_v10 }
  0x42   :  { %4184 = vmatmul.mubr.msk.bf16.gmra.mrb[28].mxu0 %vm93_vm2, %v80_v13 }
  0x43   :  { %974 = vmatprep.mubr.bf16.mxu0 %v4941_v25 }
  0xdd   :  { %v4157_v44 = vpop.f32.mrb[0].mxu0 }
  0xde   :  { %vm324_vm5 = vcmp.eq.f32.partialorder %v4157_v44, %v5207_v43  ;;  %v183_v45 = vpop.f32.mrb[1].mxu0 }
  0xdf   :  { %v3453_v48 = vsel %vm324_vm5, 1.0, %v4942_v47  ;;  %vm322_vm7 = vcmp.eq.f32.partialorder %v183_v45, %v5207_v43  ;;  %v4158_v49 = vpop.f32.mrb[2].mxu0 }
  0xe0   :  { %v3451_v50 = vsel %vm322_vm7, 1.0, %v4942_v47  ;;  %vm325_vm9 = vcmp.eq.f32.partialorder %v4158_v49, %v5207_v43  ;;  %v186_v51 = vpop.f32.mrb[3].mxu0  ;;  %v420_v57 = vsel %vm5210_vm6, %v3453_v48, %v4157_v44  ;;  %v3511_v44 = vcombine.low %v492_v17, %v496_v18 }
  0xe1   :  { %v3454_v55 = vsel %vm325_vm9, 1.0, %v4942_v47  ;;  %vm323_vm10 = vcmp.eq.f32.partialorder %v186_v51, %v5207_v43  ;;  %v418_v62 = vsel %vm5210_vm6, %v3451_v50, %v183_v45  ;;  %v4232_v45 = vld [vmem:[%s7540_s5 + $0x40] sm:$0xff]  }
  0xe2   :  { %v421_v58 = vsel %vm5210_vm6, %v3454_v55, %v4158_v49  ;;  %v3452_v59 = vsel %vm323_vm10, 1.0, %v4942_v47 }
  0xe3   :  { %v5249_v63 = vpack.c.bf16 %v421_v58, %v420_v57  ;;  %v419_v0 = vsel %vm5210_vm6, %v3452_v59, %v186_v51  ;;  %v3513_v51 = vcombine.low %v493_v21, %v497_v24 }
  0xe4   :  { %v5258_v2 = vpack.c.bf16 %v419_v0, %v418_v62 }
  0xe5   :  { %v4161_v3 = vpop.f32.mrb[4].mxu0 }
  0xe6   :  { %3515 = vmatmul.mubr.msk.bf16.vlgmr.msra.gmra.mrb[0].mxu1 %vm700_vm8, %v5258_v2  ;;  %3531 = vmatmul.mubr.msk.bf16.vlgmr.msra.gmra.mrb[32].mxu0 %vm700_vm8, %v5258_v2  ;;  %vm328_vm11 = vcmp.eq.f32.partialorder %v4161_v3, %v5207_v43  ;;  %v199_v7 = vpop.f32.mrb[5].mxu0 }
  0xe7   :  { %1136 = vmatpush1.bf16.msra.mxu1 %v3487_v26  ;;  %v3457_v9 = vsel %vm328_vm11, 1.0, %v4942_v47  ;;  %1329 = vmatpush1.bf16.msra.mxu0 %v3489_v40  ;;  %vm326_vm12 = vcmp.eq.f32.partialorder %v199_v7, %v5207_v43  ;;  %v4162_v10 = vpop.f32.mrb[6].mxu0 }
  0xe8   :  { %v424_v13 = vsel %vm5210_vm6, %v3457_v9, %v4161_v3  ;;  %v3455_v14 = vsel %vm326_vm12, 1.0, %v4942_v47  ;;  %vm329_vm13 = vcmp.eq.f32.partialorder %v4162_v10, %v5207_v43  ;;  %v202_v15 = vpop.f32.mrb[7].mxu0  ;;  %791 = vmatprep.mubr.bf16.mxu1 %v4941_v25  ;;  %984 = vmatprep.mubr.bf16.mxu0 %v4941_v25 }
  0xe9   :  { %v422_v19 = vsel %vm5210_vm6, %v3455_v14, %v199_v7  ;;  %v3458_v20 = vsel %vm329_vm13, 1.0, %v4942_v47  ;;  %vm327_vm14 = vcmp.eq.f32.partialorder %v202_v15, %v5207_v43  ;;  %1137 = vmatprep.subr.bf16.mxu1 %v3496_v4  ;;  %1330 = vmatprep.subr.bf16.mxu0 %v3498_v5 }
  0xea   :  { %v425_v22 = vsel %vm5210_vm6, %v3458_v20, %v4162_v10  ;;  %v3456_v23 = vsel %vm327_vm14, 1.0, %v4942_v47 }
  0xeb   :  { %v5298_v26 = vpack.c.bf16 %v425_v22, %v424_v13  ;;  %v423_v27 = vsel %vm5210_vm6, %v3456_v23, %v202_v15  ;;  %1138 = vmatpush1.bf16.msra.mxu1 %v3495_v8  ;;  %1331 = vmatpush1.bf16.msra.mxu0 %v3497_v11 }
  0xec   :  { %v5302_v29 = vpack.c.bf16 %v423_v27, %v422_v19  ;;  %1139 = vmatprep.subr.bf16.mxu1 %v3504_v12  ;;  %1332 = vmatprep.subr.bf16.mxu0 %v3506_v16 }
  0xed   :  { %v4165_v32 = vpop.f32.mrb[8].mxu0 }
  0xee   :  { %3516 = vmatmul.mubr.msk.bf16.gmra.mrb[4].mxu1 %vm700_vm8, %v5249_v63  ;;  %3532 = vmatmul.mubr.msk.bf16.gmra.mrb[36].mxu0 %vm700_vm8, %v5249_v63  ;;  %vm332_vm15 = vcmp.eq.f32.partialorder %v4165_v32, %v5207_v43  ;;  %v215_v40 = vpop.f32.mrb[9].mxu0 }
  0xef   :  { %801 = vmatprep.mubr.bf16.mxu1 %v4941_v25  ;;  %994 = vmatprep.mubr.bf16.mxu0 %v4941_v25  ;;  %v3461_v41 = vsel %vm332_vm15, 1.0, %v4942_v47  ;;  %vm330_vm0 = vcmp.eq.f32.partialorder %v215_v40, %v5207_v43  ;;  %v4166_v42 = vpop.f32.mrb[10].mxu0 }
  0xf0   :  { %v428_v48 = vsel %vm5210_vm6, %v3461_v41, %v4165_v32  ;;  %v3459_v49 = vsel %vm330_vm0, 1.0, %v4942_v47  ;;  %vm333_vm1 = vcmp.eq.f32.partialorder %v4166_v42, %v5207_v43  ;;  %v218_v50 = vpop.f32.mrb[11].mxu0  ;;  %1140 = vmatpush1.bf16.msra.mxu1 %v3503_v30  ;;  %1333 = vmatpush1.bf16.msra.mxu0 %v3505_v31 }
  0xf1   :  { %v426_v52 = vsel %vm5210_vm6, %v3459_v49, %v215_v40  ;;  %v3462_v53 = vsel %vm333_vm1, 1.0, %v4942_v47  ;;  %vm331_vm2 = vcmp.eq.f32.partialorder %v218_v50, %v5207_v43  ;;  %1141 = vmatprep.subr.bf16.mxu1 %v3512_v33  ;;  %1334 = vmatprep.subr.bf16.mxu0 %v3514_v34 }
  0xf2   :  { %v429_v55 = vsel %vm5210_vm6, %v3462_v53, %v4166_v42  ;;  %v3460_v56 = vsel %vm331_vm2, 1.0, %v4942_v47 }
  0xf3   :  { %v5333_v57 = vpack.c.bf16 %v429_v55, %v428_v48  ;;  %v427_v58 = vsel %vm5210_vm6, %v3460_v56, %v218_v50 }
  0xf4   :  { %v5337_v59 = vpack.c.bf16 %v427_v58, %v426_v52  ;;  %1142 = vmatpush1.bf16.msra.mxu1 %v3511_v44  ;;  %1335 = vmatpush1.bf16.msra.mxu0 %v3513_v51 }
  0xf5   :  { %v4169_v60 = vpop.f32.mrb[12].mxu0  ;;  %3683 = vmatprep.subr.bf16.mxu1 %v4232_v45  ;;  %3795 = vmatprep.subr.bf16.mxu0 %v4234_v54 }
  0xf6   :  { %3517 = vmatmul.mubr.msk.bf16.gmra.mrb[8].mxu1 %vm700_vm8, %v5302_v29  ;;  %3533 = vmatmul.mubr.msk.bf16.gmra.mrb[40].mxu0 %vm700_vm8, %v5302_v29  ;;  %vm336_vm3 = vcmp.eq.f32.partialorder %v4169_v60, %v5207_v43  ;;  %v231_v61 = vpop.f32.mrb[13].mxu0 }
  0xf7   :  { %811 = vmatprep.mubr.bf16.mxu1 %v4941_v25  ;;  %1004 = vmatprep.mubr.bf16.mxu0 %v4941_v25  ;;  %v3465_v62 = vsel %vm336_vm3, 1.0, %v4942_v47  ;;  %vm334_vm4 = vcmp.eq.f32.partialorder %v231_v61, %v5207_v43  ;;  %v4170_v0 = vpop.f32.mrb[14].mxu0 }
  0xf8   :  { %v432_v1 = vsel %vm5210_vm6, %v3465_v62, %v4169_v60  ;;  %v3463_v3 = vsel %vm334_vm4, 1.0, %v4942_v47  ;;  %vm337_vm5 = vcmp.eq.f32.partialorder %v4170_v0, %v5207_v43  ;;  %v234_v4 = vpop.f32.mrb[15].mxu0 }
  0xf9   :  { %v430_v5 = vsel %vm5210_vm6, %v3463_v3, %v231_v61  ;;  %v3466_v6 = vsel %vm337_vm5, 1.0, %v4942_v47  ;;  %vm335_vm7 = vcmp.eq.f32.partialorder %v234_v4, %v5207_v43 }
  0xfa   :  { %v433_v7 = vsel %vm5210_vm6, %v3466_v6, %v4170_v0  ;;  %v3464_v8 = vsel %vm335_vm7, 1.0, %v4942_v47 }
  0xfb   :  { %v5359_v9 = vpack.c.bf16 %v433_v7, %v432_v1  ;;  %v431_v10 = vsel %vm5210_vm6, %v3464_v8, %v234_v4 }
  0xfc   :  { %v5363_v11 = vpack.c.bf16 %v431_v10, %v430_v5 }
  0xfd   :  { %v4173_v12 = vpop.f32.mrb[16].mxu0 }
  0xfe   :  { %3518 = vmatmul.mubr.msk.bf16.gmra.mrb[12].mxu1 %vm700_vm8, %v5298_v26  ;;  %3534 = vmatmul.mubr.msk.bf16.gmra.mrb[44].mxu0 %vm700_vm8, %v5298_v26  ;;  %vm340_vm9 = vcmp.eq.f32.partialorder %v4173_v12, %v5207_v43  ;;  %v247_v13 = vpop.f32.mrb[17].mxu0 }
  0xff   :  { %821 = vmatprep.mubr.bf16.mxu1 %v4941_v25  ;;  %1014 = vmatprep.mubr.bf16.mxu0 %v4941_v25  ;;  %v3469_v14 = vsel %vm340_vm9, 1.0, %v4942_v47  ;;  %vm338_vm10 = vcmp.eq.f32.partialorder %v247_v13, %v5207_v43  ;;  %v4174_v15 = vpop.f32.mrb[18].mxu0 }
 0x100   :  { %v436_v16 = vsel %vm5210_vm6, %v3469_v14, %v4173_v12  ;;  %v3467_v17 = vsel %vm338_vm10, 1.0, %v4942_v47  ;;  %vm341_vm11 = vcmp.eq.f32.partialorder %v4174_v15, %v5207_v43  ;;  %v250_v18 = vpop.f32.mrb[19].mxu0 }
 0x101   :  { %v434_v19 = vsel %vm5210_vm6, %v3467_v17, %v247_v13  ;;  %v3470_v20 = vsel %vm341_vm11, 1.0, %v4942_v47  ;;  %vm339_vm12 = vcmp.eq.f32.partialorder %v250_v18, %v5207_v43 }
 0x102   :  { %v437_v21 = vsel %vm5210_vm6, %v3470_v20, %v4174_v15  ;;  %v3468_v22 = vsel %vm339_vm12, 1.0, %v4942_v47 }
 0x103   :  { %v5385_v23 = vpack.c.bf16 %v437_v21, %v436_v16  ;;  %v435_v24 = vsel %vm5210_vm6, %v3468_v22, %v250_v18  ;;  %v4238_v22 = vld [vmem:[%s7540_s5 + $0xc8] sm:$0xff]  }
 0x104   :  { %v5389_v27 = vpack.c.bf16 %v435_v24, %v434_v19  ;;  %v4237_v24 = vld [vmem:[%s7540_s5 + $0x8] sm:$0xff]  }
 0x105   :  { %v4177_v30 = vpop.f32.mrb[20].mxu0 }
 0x106   :  { %3519 = vmatmul.mubr.msk.bf16.gmra.mrb[16].mxu1 %vm700_vm8, %v5337_v59  ;;  %3535 = vmatmul.mubr.msk.bf16.gmra.mrb[48].mxu0 %vm700_vm8, %v5337_v59  ;;  %vm344_vm13 = vcmp.eq.f32.partialorder %v4177_v30, %v5207_v43  ;;  %v263_v31 = vpop.f32.mrb[21].mxu0 }
 0x107   :  { %831 = vmatprep.mubr.bf16.mxu1 %v4941_v25  ;;  %1024 = vmatprep.mubr.bf16.mxu0 %v4941_v25  ;;  %v3473_v32 = vsel %vm344_vm13, 1.0, %v4942_v47  ;;  %vm342_vm14 = vcmp.eq.f32.partialorder %v263_v31, %v5207_v43  ;;  %v4178_v33 = vpop.f32.mrb[22].mxu0 }
 0x108   :  { %v440_v34 = vsel %vm5210_vm6, %v3473_v32, %v4177_v30  ;;  %v3471_v40 = vsel %vm342_vm14, 1.0, %v4942_v47  ;;  %vm345_vm15 = vcmp.eq.f32.partialorder %v4178_v33, %v5207_v43  ;;  %v266_v41 = vpop.f32.mrb[23].mxu0  ;;  %v4239_v30 = vld [vmem:[%s7540_s5 + $0x88] sm:$0xff]   ;;  %v4241_v32 = vld [vmem:[%s7540_s5 + $0x10] sm:$0xff]  }
 0x109   :  { %v438_v42 = vsel %vm5210_vm6, %v3471_v40, %v263_v31  ;;  %v3474_v44 = vsel %vm345_vm15, 1.0, %v4942_v47  ;;  %vm343_vm0 = vcmp.eq.f32.partialorder %v266_v41, %v5207_v43  ;;  %v4240_v31 = vld [vmem:[%s7540_s5 + $0x50] sm:$0xff]   ;;  %v4246_v40 = vld [vmem:[%s7540_s5 + $0xd8] sm:$0xff]  }
 0x10a   :  { %v441_v45 = vsel %vm5210_vm6, %v3474_v44, %v4178_v33  ;;  %v3472_v48 = vsel %vm343_vm0, 1.0, %v4942_v47  ;;  %v4243_v33 = vld [vmem:[%s7540_s5 + $0x90] sm:$0xff]   ;;  %v4250_v44 = vld [vmem:[%s7540_s5 + $0xe0] sm:$0xff]  }
 0x10b   :  { %v5411_v49 = vpack.c.bf16 %v441_v45, %v440_v34  ;;  %v439_v50 = vsel %vm5210_vm6, %v3472_v48, %v266_v41  ;;  %v4244_v34 = vld [vmem:[%s7540_s5 + $0x58] sm:$0xff]   ;;  %v4249_v45 = vld [vmem:[%s7540_s5 + $0x20] sm:$0xff]  }
 0x10c   :  { %v5415_v51 = vpack.c.bf16 %v439_v50, %v438_v42  ;;  %v4245_v41 = vld [vmem:[%s7540_s5 + $0x18] sm:$0xff]   ;;  %v4251_v48 = vld [vmem:[%s7540_s5 + $0xa0] sm:$0xff]   ;;  %v4252_v50 = vld [vmem:[%s7540_s5 + $0x68] sm:$0xff]  }
 0x10d   :  { %v4181_v52 = vpop.f32.mrb[24].mxu0  ;;  %v4247_v42 = vld [vmem:[%s7540_s5 + $0x98] sm:$0xff]  }
 0x10e   :  { %3520 = vmatmul.mubr.msk.bf16.gmra.mrb[20].mxu1 %vm700_vm8, %v5333_v57  ;;  %3536 = vmatmul.mubr.msk.bf16.gmra.mrb[52].mxu0 %vm700_vm8, %v5333_v57  ;;  %vm348_vm1 = vcmp.eq.f32.partialorder %v4181_v52, %v5207_v43  ;;  %v279_v53 = vpop.f32.mrb[25].mxu0 }
 0x10f   :  { %841 = vmatprep.mubr.bf16.mxu1 %v4941_v25  ;;  %1034 = vmatprep.mubr.bf16.mxu0 %v4941_v25  ;;  %v3477_v54 = vsel %vm348_vm1, 1.0, %v4942_v47  ;;  %vm346_vm2 = vcmp.eq.f32.partialorder %v279_v53, %v5207_v43  ;;  %v4182_v55 = vpop.f32.mrb[26].mxu0 }
 0x110   :  { %v444_v56 = vsel %vm5210_vm6, %v3477_v54, %v4181_v52  ;;  %v3475_v58 = vsel %vm346_vm2, 1.0, %v4942_v47  ;;  %vm349_vm3 = vcmp.eq.f32.partialorder %v4182_v55, %v5207_v43  ;;  %v282_v60 = vpop.f32.mrb[27].mxu0  ;;  %v4254_v52 = vld [vmem:[%s7540_s5 + $0xe8] sm:$0xff]  }
 0x111   :  { %v442_v61 = vsel %vm5210_vm6, %v3475_v58, %v279_v53  ;;  %v3478_v62 = vsel %vm349_vm3, 1.0, %v4942_v47  ;;  %vm347_vm4 = vcmp.eq.f32.partialorder %v282_v60, %v5207_v43  ;;  %v4253_v53 = vld [vmem:[%s7540_s5 + $0x28] sm:$0xff]   ;;  %v4259_v58 = vld [vmem:[%s7540_s5 + $0xb0] sm:$0xff]  }
 0x112   :  { %v445_v0 = vsel %vm5210_vm6, %v3478_v62, %v4182_v55  ;;  %v3476_v1 = vsel %vm347_vm4, 1.0, %v4942_v47  ;;  %v4255_v54 = vld [vmem:[%s7540_s5 + $0xa8] sm:$0xff]   ;;  %v4258_v55 = vld [vmem:[%s7540_s5 + $0xf0] sm:$0xff]   ;;  %v4261_v62 = vld [vmem:[%s7540_s5 + $0x38] sm:$0xff]  }
 0x113   :  { %v5437_v3 = vpack.c.bf16 %v445_v0, %v444_v56  ;;  %v443_v4 = vsel %vm5210_vm6, %v3476_v1, %v282_v60  ;;  %v4257_v56 = vld [vmem:[%s7540_s5 + $0x30] sm:$0xff]   ;;  %v4260_v60 = vld [vmem:[%s7540_s5 + $0x78] sm:$0xff]   ;;  %v4266_v1 = vld [vmem:[%s7540_s5 + $0x1c0] sm:$0xff]  }
 0x114   :  { %v5441_v5 = vpack.c.bf16 %v443_v4, %v442_v61  ;;  %v4262_v61 = vld [vmem:[%s7540_s5 + $0xf8] sm:$0xff]  }
 0x115   :  { %v4185_v6 = vpop.f32.mrb[28].mxu0  ;;  %v4263_v0 = vld [vmem:[%s7540_s5 + $0xb8] sm:$0xff]  }
 0x116   :  { %3521 = vmatmul.mubr.msk.bf16.gmra.mrb[24].mxu1 %vm700_vm8, %v5363_v11  ;;  %3537 = vmatmul.mubr.msk.bf16.gmra.mrb[56].mxu0 %vm700_vm8, %v5363_v11  ;;  %vm352_vm5 = vcmp.eq.f32.partialorder %v4185_v6, %v5207_v43  ;;  %v295_v7 = vpop.f32.mrb[29].mxu0 }
 0x117   :  { %851 = vmatprep.mubr.bf16.mxu1 %v4941_v25  ;;  %1044 = vmatprep.mubr.bf16.mxu0 %v4941_v25  ;;  %v3481_v8 = vsel %vm352_vm5, 1.0, %v4942_v47  ;;  %vm350_vm7 = vcmp.eq.f32.partialorder %v295_v7, %v5207_v43  ;;  %v4186_v10 = vpop.f32.mrb[30].mxu0 }
 0x118   :  { %v448_v12 = vsel %vm5210_vm6, %v3481_v8, %v4185_v6  ;;  %v3479_v13 = vsel %vm350_vm7, 1.0, %v4942_v47  ;;  %vm353_vm9 = vcmp.eq.f32.partialorder %v4186_v10, %v5207_v43  ;;  %v298_v14 = vpop.f32.mrb[31].mxu0 }
 0x119   :  { %v446_v15 = vsel %vm5210_vm6, %v3479_v13, %v295_v7  ;;  %v3482_v16 = vsel %vm353_vm9, 1.0, %v4942_v47  ;;  %vm351_vm10 = vcmp.eq.f32.partialorder %v298_v14, %v5207_v43  ;;  %v4233_v43 = vld [vmem:[%s7540_s5] sm:$0xff]  }
 0x11a   :  { %v449_v17 = vsel %vm5210_vm6, %v3482_v16, %v4186_v10  ;;  %v3480_v18 = vsel %vm351_vm10, 1.0, %v4942_v47  ;;  %v4236_v47 = vld [vmem:[%s7540_s5 + $0x48] sm:$0xff]  }
 0x11b   :  { %v5463_v19 = vpack.c.bf16 %v449_v17, %v448_v12  ;;  %v447_v20 = vsel %vm5210_vm6, %v3480_v18, %v298_v14 }
 0x11c   :  { %v5467_v21 = vpack.c.bf16 %v447_v20, %v446_v15 }
 0x11e   :  { %3522 = vmatmul.mubr.msk.bf16.gmra.mrb[28].mxu1 %vm700_vm8, %v5359_v9  ;;  %3538 = vmatmul.mubr.msk.bf16.gmra.mrb[60].mxu0 %vm700_vm8, %v5359_v9 }
 0x11f   :  { %861 = vmatprep.mubr.bf16.mxu1 %v4941_v25  ;;  %1054 = vmatprep.mubr.bf16.mxu0 %v4941_v25 }
 0x126   :  { %3523 = vmatmul.mubr.msk.bf16.gmra.mrb[32].mxu1 %vm700_vm8, %v5389_v27  ;;  %3539 = vmatmul.mubr.msk.bf16.gmra.mrb[64].mxu0 %vm700_vm8, %v5389_v27 }
 0x127   :  { %871 = vmatprep.mubr.bf16.mxu1 %v4941_v25  ;;  %1064 = vmatprep.mubr.bf16.mxu0 %v4941_v25 }
 0x12e   :  { %3524 = vmatmul.mubr.msk.bf16.gmra.mrb[36].mxu1 %vm700_vm8, %v5385_v23  ;;  %3540 = vmatmul.mubr.msk.bf16.gmra.mrb[68].mxu0 %vm700_vm8, %v5385_v23 }
 0x12f   :  { %881 = vmatprep.mubr.bf16.mxu1 %v4941_v25  ;;  %1074 = vmatprep.mubr.bf16.mxu0 %v4941_v25 }
 0x136   :  { %3525 = vmatmul.mubr.msk.bf16.gmra.mrb[40].mxu1 %vm700_vm8, %v5415_v51  ;;  %3541 = vmatmul.mubr.msk.bf16.gmra.mrb[72].mxu0 %vm700_vm8, %v5415_v51 }
 0x137   :  { %891 = vmatprep.mubr.bf16.mxu1 %v4941_v25  ;;  %1084 = vmatprep.mubr.bf16.mxu0 %v4941_v25 }
 0x13e   :  { %3526 = vmatmul.mubr.msk.bf16.gmra.mrb[44].mxu1 %vm700_vm8, %v5411_v49  ;;  %3542 = vmatmul.mubr.msk.bf16.gmra.mrb[76].mxu0 %vm700_vm8, %v5411_v49 }
 0x13f   :  { %901 = vmatprep.mubr.bf16.mxu1 %v4941_v25  ;;  %1094 = vmatprep.mubr.bf16.mxu0 %v4941_v25 }
 0x146   :  { %3527 = vmatmul.mubr.msk.bf16.gmra.mrb[48].mxu1 %vm700_vm8, %v5441_v5  ;;  %3543 = vmatmul.mubr.msk.bf16.gmra.mrb[80].mxu0 %vm700_vm8, %v5441_v5 }
 0x147   :  { %911 = vmatprep.mubr.bf16.mxu1 %v4941_v25  ;;  %1104 = vmatprep.mubr.bf16.mxu0 %v4941_v25 }
 0x14e   :  { %3528 = vmatmul.mubr.msk.bf16.gmra.mrb[52].mxu1 %vm700_vm8, %v5437_v3  ;;  %3544 = vmatmul.mubr.msk.bf16.gmra.mrb[84].mxu0 %vm700_vm8, %v5437_v3 }
 0x14f   :  { %921 = vmatprep.mubr.bf16.mxu1 %v4941_v25  ;;  %1114 = vmatprep.mubr.bf16.mxu0 %v4941_v25 }
 0x156   :  { %3529 = vmatmul.mubr.msk.bf16.gmra.mrb[56].mxu1 %vm700_vm8, %v5467_v21  ;;  %3545 = vmatmul.mubr.msk.bf16.gmra.mrb[88].mxu0 %vm700_vm8, %v5467_v21 }
 0x157   :  { %931 = vmatprep.mubr.bf16.mxu1 %v4941_v25  ;;  %1124 = vmatprep.mubr.bf16.mxu0 %v4941_v25 }
 0x15e   :  { %3530 = vmatmul.mubr.msk.bf16.gmra.mrb[60].mxu1 %vm700_vm8, %v5463_v19  ;;  %3546 = vmatmul.mubr.msk.bf16.gmra.mrb[92].mxu0 %vm700_vm8, %v5463_v19 }
 0x15f   :  { %1167 = vmatprep.mubr.bf16.mxu1 %v4941_v25  ;;  %1360 = vmatprep.mubr.bf16.mxu0 %v4941_v25 }
 0x166   :  { %3547 = vmatmul.mubr.msk.bf16.vlgmr.msra.gmra.mrb[64].mxu1 %vm700_vm8, %v5258_v2  ;;  %3563 = vmatmul.mubr.msk.bf16.vlgmr.msra.gmra.mrb[96].mxu0 %vm700_vm8, %v5258_v2  ;;  %v4242_v2 = vld [vmem:[%s7540_s5 + $0xd0] sm:$0xff]  }
 0x167   :  { %3684 = vmatpush3.bf16.msra.mxu1 %v4233_v43  ;;  %3796 = vmatpush3.bf16.msra.mxu0 %v4235_v46 }
 0x168   :  { %1177 = vmatprep.mubr.bf16.mxu1 %v4941_v25  ;;  %1370 = vmatprep.mubr.bf16.mxu0 %v4941_v25 }
 0x169   :  { %3685 = vmatprep.subr.bf16.mxu1 %v4236_v47  ;;  %3797 = vmatprep.subr.bf16.mxu0 %v4238_v22 }
 0x16b   :  { %3686 = vmatpush3.bf16.msra.mxu1 %v4237_v24  ;;  %3798 = vmatpush3.bf16.msra.mxu0 %v4239_v30 }
 0x16c   :  { %3687 = vmatprep.subr.bf16.mxu1 %v4240_v31  ;;  %3799 = vmatprep.subr.bf16.mxu0 %v4242_v2 }
 0x16e   :  { %3548 = vmatmul.mubr.msk.bf16.gmra.mrb[68].mxu1 %vm700_vm8, %v5249_v63  ;;  %3564 = vmatmul.mubr.msk.bf16.gmra.mrb[100].mxu0 %vm700_vm8, %v5249_v63  ;;  %v4248_v63 = vld [vmem:[%s7540_s5 + $0x60] sm:$0xff]  }
 0x16f   :  { %1187 = vmatprep.mubr.bf16.mxu1 %v4941_v25  ;;  %1380 = vmatprep.mubr.bf16.mxu0 %v4941_v25 }
 0x170   :  { %3688 = vmatpush3.bf16.msra.mxu1 %v4241_v32  ;;  %3800 = vmatpush3.bf16.msra.mxu0 %v4243_v33 }
 0x171   :  { %3689 = vmatprep.subr.bf16.mxu1 %v4244_v34  ;;  %3801 = vmatprep.subr.bf16.mxu0 %v4246_v40 }
 0x174   :  { %3690 = vmatpush3.bf16.msra.mxu1 %v4245_v41  ;;  %3802 = vmatpush3.bf16.msra.mxu0 %v4247_v42 }
 0x175   :  { %3691 = vmatprep.subr.bf16.mxu1 %v4248_v63  ;;  %3803 = vmatprep.subr.bf16.mxu0 %v4250_v44 }
 0x176   :  { %3549 = vmatmul.mubr.msk.bf16.gmra.mrb[72].mxu1 %vm700_vm8, %v5302_v29  ;;  %3565 = vmatmul.mubr.msk.bf16.gmra.mrb[104].mxu0 %vm700_vm8, %v5302_v29  ;;  %v4256_v29 = vld [vmem:[%s7540_s5 + $0x70] sm:$0xff]  }
 0x177   :  { %1197 = vmatprep.mubr.bf16.mxu1 %v4941_v25  ;;  %1390 = vmatprep.mubr.bf16.mxu0 %v4941_v25 }
 0x178   :  { %3692 = vmatpush3.bf16.msra.mxu1 %v4249_v45  ;;  %3804 = vmatpush3.bf16.msra.mxu0 %v4251_v48 }
 0x179   :  { %3693 = vmatprep.subr.bf16.mxu1 %v4252_v50  ;;  %3805 = vmatprep.subr.bf16.mxu0 %v4254_v52 }
 0x17c   :  { %3694 = vmatpush3.bf16.msra.mxu1 %v4253_v53  ;;  %3806 = vmatpush3.bf16.msra.mxu0 %v4255_v54 }
 0x17d   :  { %3695 = vmatprep.subr.bf16.mxu1 %v4256_v29  ;;  %3807 = vmatprep.subr.bf16.mxu0 %v4258_v55 }
 0x17e   :  { %3550 = vmatmul.mubr.msk.bf16.gmra.mrb[76].mxu1 %vm700_vm8, %v5298_v26  ;;  %3566 = vmatmul.mubr.msk.bf16.gmra.mrb[108].mxu0 %vm700_vm8, %v5298_v26  ;;  %v4264_v26 = vld [vmem:[%s7540_s5 + $0x140] sm:$0xff]  }
 0x17f   :  { %1207 = vmatprep.mubr.bf16.mxu1 %v4941_v25  ;;  %1400 = vmatprep.mubr.bf16.mxu0 %v4941_v25 }
 0x180   :  { %3696 = vmatpush3.bf16.msra.mxu1 %v4257_v56  ;;  %3808 = vmatpush3.bf16.msra.mxu0 %v4259_v58 }
 0x181   :  { %3697 = vmatprep.subr.bf16.mxu1 %v4260_v60  ;;  %3809 = vmatprep.subr.bf16.mxu0 %v4262_v61 }
 0x184   :  { %3698 = vmatpush3.bf16.msra.mxu1 %v4261_v62  ;;  %3810 = vmatpush3.bf16.msra.mxu0 %v4263_v0 }
 0x185   :  { %3907 = vmatprep.subr.bf16.mxu1 %v4264_v26  ;;  %4019 = vmatprep.subr.bf16.mxu0 %v4266_v1 }
 0x186   :  { %3551 = vmatmul.mubr.msk.bf16.gmra.mrb[80].mxu1 %vm700_vm8, %v5337_v59  ;;  %3567 = vmatmul.mubr.msk.bf16.gmra.mrb[112].mxu0 %vm700_vm8, %v5337_v59  ;;  %v510_v59 = vsub.s32 2, %v5175_v28 }
 0x187   :  { %1217 = vmatprep.mubr.bf16.mxu1 %v4941_v25  ;;  %1410 = vmatprep.mubr.bf16.mxu0 %v4941_v25 }
 0x188   :  { %v5687_v4 = vrot.slane %v5190_v35, %v510_v59 }
 0x18e   :  { %3552 = vmatmul.mubr.msk.bf16.gmra.mrb[84].mxu1 %vm700_vm8, %v5333_v57  ;;  %3568 = vmatmul.mubr.msk.bf16.gmra.mrb[116].mxu0 %vm700_vm8, %v5333_v57  ;;  %v502_v57 = vsub.s32 0, %v5175_v28 }
 0x18f   :  { %1227 = vmatprep.mubr.bf16.mxu1 %v4941_v25  ;;  %1420 = vmatprep.mubr.bf16.mxu0 %v4941_v25 }
 0x196   :  { %3553 = vmatmul.mubr.msk.bf16.gmra.mrb[88].mxu1 %vm700_vm8, %v5363_v11  ;;  %3569 = vmatmul.mubr.msk.bf16.gmra.mrb[120].mxu0 %vm700_vm8, %v5363_v11  ;;  %v514_v11 = vsub.s32 3, %v5175_v28 }
 0x197   :  { %1237 = vmatprep.mubr.bf16.mxu1 %v4941_v25  ;;  %1430 = vmatprep.mubr.bf16.mxu0 %v4941_v25 }
 0x198   :  { %v5697_v6 = vrot.slane %v5190_v35, %v514_v11 }
 0x19e   :  { %3554 = vmatmul.mubr.msk.bf16.gmra.mrb[92].mxu1 %vm700_vm8, %v5359_v9  ;;  %3570 = vmatmul.mubr.msk.bf16.gmra.mrb[124].mxu0 %vm700_vm8, %v5359_v9  ;;  %v506_v9 = vsub.s32 1, %v5175_v28 }
 0x19f   :  { %1247 = vmatprep.mubr.bf16.mxu1 %v4941_v25  ;;  %1440 = vmatprep.mubr.bf16.mxu0 %v4941_v25 }
 0x1a6   :  { %3555 = vmatmul.mubr.msk.bf16.gmra.mrb[96].mxu1 %vm700_vm8, %v5389_v27  ;;  %3571 = vmatmul.mubr.msk.bf16.gmra.mrb[128].mxu0 %vm700_vm8, %v5389_v27  ;;  %v5684_v27 = vrot.slane %v5190_v35, %v502_v57 }
 0x1a7   :  { %1257 = vmatprep.mubr.bf16.mxu1 %v4941_v25  ;;  %1450 = vmatprep.mubr.bf16.mxu0 %v4941_v25 }
 0x1ae   :  { %3556 = vmatmul.mubr.msk.bf16.gmra.mrb[100].mxu1 %vm700_vm8, %v5385_v23  ;;  %3572 = vmatmul.mubr.msk.bf16.gmra.mrb[132].mxu0 %vm700_vm8, %v5385_v23  ;;  %v5694_v23 = vrot.slane %v5190_v35, %v506_v9 }
 0x1af   :  { %1267 = vmatprep.mubr.bf16.mxu1 %v4941_v25  ;;  %1460 = vmatprep.mubr.bf16.mxu0 %v4941_v25 }
 0x1b6   :  { %3557 = vmatmul.mubr.msk.bf16.gmra.mrb[104].mxu1 %vm700_vm8, %v5415_v51  ;;  %3573 = vmatmul.mubr.msk.bf16.gmra.mrb[136].mxu0 %vm700_vm8, %v5415_v51 }
 0x1b7   :  { %1277 = vmatprep.mubr.bf16.mxu1 %v4941_v25  ;;  %1470 = vmatprep.mubr.bf16.mxu0 %v4941_v25 }
 0x1b9   :  { %v783_v28 = vpop.f32.mrb[0].mxu1  ;;  %v976_v7 = vpop.f32.mrb[32].mxu0 }
 0x1ba   :  { %v784_v8 = vadd.f32 %v783_v28, %v5684_v27  ;;  %v977_v10 = vadd.f32 %v976_v7, %v5687_v4  ;;  %v785_v12 = vpop.f32.mrb[1].mxu1  ;;  %v978_v13 = vpop.f32.mrb[33].mxu0 }
 0x1bb   :  { %v786_v51 = vadd.f32 %v785_v12, %v5694_v23  ;;  %v979_v14 = vadd.f32 %v978_v13, %v5697_v6  ;;  %v787_v15 = vpop.f32.mrb[2].mxu1  ;;  %v980_v16 = vpop.f32.mrb[34].mxu0 }
 0x1bc   :  { %4300 = vtanh.f32 %v784_v8  ;;  %v788_v35 = vadd.f32 %v787_v15, %v5684_v27  ;;  %v789_v17 = vpop.f32.mrb[3].mxu1  ;;  %v982_v18 = vpop.f32.mrb[35].mxu0  ;;  %v981_v20 = vadd.f32 %v980_v16, %v5687_v4 }
 0x1bd   :  { %4302 = vtanh.f32 %v977_v10  ;;  %v790_v43 = vadd.f32 %v789_v17, %v5694_v23  ;;  %v983_v46 = vadd.f32 %v982_v18, %v5697_v6 }
 0x1be   :  { %4304 = vtanh.f32 %v786_v51  ;;  %3558 = vmatmul.mubr.msk.bf16.gmra.mrb[108].mxu1 %vm700_vm8, %v5411_v49  ;;  %3574 = vmatmul.mubr.msk.bf16.gmra.mrb[140].mxu0 %vm700_vm8, %v5411_v49 }
 0x1bf   :  { %4306 = vtanh.f32 %v979_v14  ;;  %1287 = vmatprep.mubr.bf16.mxu1 %v4941_v25  ;;  %1480 = vmatprep.mubr.bf16.mxu0 %v4941_v25 }
 0x1c0   :  { %4308 = vtanh.f32 %v788_v35 }
 0x1c1   :  { %4310 = vtanh.f32 %v981_v20  ;;  %v793_v47 = vpop.f32.mrb[4].mxu1  ;;  %v986_v22 = vpop.f32.mrb[36].mxu0 }
 0x1c2   :  { %4312 = vtanh.f32 %v790_v43  ;;  %v794_v24 = vadd.f32 %v793_v47, %v5684_v27  ;;  %v987_v30 = vadd.f32 %v986_v22, %v5687_v4  ;;  %v795_v31 = vpop.f32.mrb[5].mxu1  ;;  %v988_v2 = vpop.f32.mrb[37].mxu0 }
 0x1c3   :  { %4314 = vtanh.f32 %v983_v46  ;;  %v796_v49 = vadd.f32 %v795_v31, %v5694_v23  ;;  %v989_v32 = vadd.f32 %v988_v2, %v5697_v6  ;;  %v797_v33 = vpop.f32.mrb[6].mxu1  ;;  %v990_v34 = vpop.f32.mrb[38].mxu0 }
 0x1c4   :  { %4316 = vtanh.f32 %v794_v24  ;;  %v798_v40 = vadd.f32 %v797_v33, %v5684_v27  ;;  %v799_v41 = vpop.f32.mrb[7].mxu1  ;;  %v992_v42 = vpop.f32.mrb[39].mxu0  ;;  %v991_v63 = vadd.f32 %v990_v34, %v5687_v4 }
 0x1c5   :  { %4318 = vtanh.f32 %v987_v30  ;;  %v800_v45 = vadd.f32 %v799_v41, %v5694_v23  ;;  %v993_v50 = vadd.f32 %v992_v42, %v5697_v6 }
 0x1c6   :  { %v5721_v44 = vpop.eup %4300  ;;  %4320 = vtanh.f32 %v796_v49  ;;  %3559 = vmatmul.mubr.msk.bf16.gmra.mrb[112].mxu1 %vm700_vm8, %v5441_v5  ;;  %3575 = vmatmul.mubr.msk.bf16.gmra.mrb[144].mxu0 %vm700_vm8, %v5441_v5 }
 0x1c7   :  { %v5728_v48 = vpop.eup %4302  ;;  %4322 = vtanh.f32 %v989_v32  ;;  %1297 = vmatprep.mubr.bf16.mxu1 %v4941_v25  ;;  %1490 = vmatprep.mubr.bf16.mxu0 %v4941_v25 }
 0x1c8   :  { %v5733_v52 = vpop.eup %4304  ;;  %4324 = vtanh.f32 %v798_v40 }
 0x1c9   :  { %v5735_v53 = vpop.eup %4306  ;;  %4326 = vtanh.f32 %v991_v63  ;;  %v803_v54 = vpop.f32.mrb[8].mxu1 }
 0x1ca   :  { %v996_v29 = vpop.f32.mrb[40].mxu0  ;;  %v5737_v55 = vpop.eup %4308  ;;  %4328 = vtanh.f32 %v800_v45  ;;  %v804_v5 = vadd.f32 %v803_v54, %v5684_v27 }
 0x1cb   :  { %v997_v56 = vadd.f32 %v996_v29, %v5687_v4  ;;  %v805_v58 = vpop.f32.mrb[9].mxu1  ;;  %v998_v60 = vpop.f32.mrb[41].mxu0  ;;  %4330 = vtanh.f32 %v993_v50  ;;  %v1777_v57 = vpack.c.bf16 %v5737_v55, %v5721_v44  ;;  %v4269_v44 = vld [vmem:[%s7540_s5 + $0x108] sm:$0xff]  }
 0x1cc   :  { %v5741_v61 = vpop.eup %4310  ;;  %v806_v62 = vadd.f32 %v805_v58, %v5694_v23  ;;  %v999_v0 = vadd.f32 %v998_v60, %v5697_v6  ;;  %v807_v26 = vpop.f32.mrb[10].mxu1  ;;  %4332 = vtanh.f32 %v804_v5 }
 0x1cd   :  { %v1000_v1 = vpop.f32.mrb[42].mxu0  ;;  %v5747_v59 = vpop.eup %4312  ;;  %v808_v9 = vadd.f32 %v807_v26, %v5684_v27  ;;  %v1779_v7 = vpack.c.bf16 %v5741_v61, %v5728_v48  ;;  %4334 = vtanh.f32 %v997_v56  ;;  %v4271_v48 = vld [vmem:[%s7540_s5 + $0x188] sm:$0xff]   ;;  %v4272_v61 = vld [vmem:[%s7540_s5 + $0x150] sm:$0xff]  }
 0x1ce   :  { %v809_v11 = vpop.f32.mrb[11].mxu1  ;;  %v1002_v28 = vpop.f32.mrb[43].mxu0  ;;  %v1001_v10 = vadd.f32 %v1000_v1, %v5687_v4  ;;  %v1778_v12 = vpack.c.bf16 %v5747_v59, %v5733_v52  ;;  %4336 = vtanh.f32 %v806_v62  ;;  %3560 = vmatmul.mubr.msk.bf16.gmra.mrb[116].mxu1 %vm700_vm8, %v5437_v3  ;;  %3576 = vmatmul.mubr.msk.bf16.gmra.mrb[148].mxu0 %vm700_vm8, %v5437_v3 }
 0x1cf   :  { %v5752_v8 = vpop.eup %4314  ;;  %v810_v51 = vadd.f32 %v809_v11, %v5694_v23  ;;  %4338 = vtanh.f32 %v999_v0  ;;  %v1003_v16 = vadd.f32 %v1002_v28, %v5697_v6  ;;  %1307 = vmatprep.mubr.bf16.mxu1 %v4941_v25  ;;  %1500 = vmatprep.mubr.bf16.mxu0 %v4941_v25 }
 0x1d0   :  { %v5757_v13 = vpop.eup %4316  ;;  %v1780_v14 = vpack.c.bf16 %v5752_v8, %v5735_v53  ;;  %4340 = vtanh.f32 %v808_v9 }
 0x1d1   :  { %v5766_v15 = vpop.eup %4318  ;;  %4342 = vtanh.f32 %v1001_v10  ;;  %v813_v18 = vpop.f32.mrb[12].mxu1 }
 0x1d2   :  { %v5771_v35 = vpop.eup %4320  ;;  %v1006_v3 = vpop.f32.mrb[44].mxu0  ;;  %4344 = vtanh.f32 %v810_v51  ;;  %v814_v43 = vadd.f32 %v813_v18, %v5684_v27 }
 0x1d3   :  { %v5773_v17 = vpop.eup %4322  ;;  %v1007_v46 = vadd.f32 %v1006_v3, %v5687_v4  ;;  %v815_v47 = vpop.f32.mrb[13].mxu1  ;;  %4346 = vtanh.f32 %v1003_v16 }
 0x1d4   :  { %v5775_v20 = vpop.eup %4324  ;;  %v1008_v22 = vpop.f32.mrb[45].mxu0  ;;  %v816_v30 = vadd.f32 %v815_v47, %v5694_v23  ;;  %4348 = vtanh.f32 %v814_v43 }
 0x1d5   :  { %v5779_v24 = vpop.eup %4326  ;;  %v1009_v31 = vadd.f32 %v1008_v22, %v5697_v6  ;;  %v817_v2 = vpop.f32.mrb[14].mxu1  ;;  %v1785_v32 = vpack.c.bf16 %v5775_v20, %v5757_v13  ;;  %4350 = vtanh.f32 %v1007_v46  ;;  %v4279_v20 = vld [vmem:[%s7540_s5 + $0x198] sm:$0xff]  }
 0x1d6   :  { %v1010_v49 = vpop.f32.mrb[46].mxu0  ;;  %v5785_v33 = vpop.eup %4328  ;;  %v818_v34 = vadd.f32 %v817_v2, %v5684_v27  ;;  %v1787_v42 = vpack.c.bf16 %v5779_v24, %v5766_v15  ;;  %4352 = vtanh.f32 %v816_v30  ;;  %3561 = vmatmul.mubr.msk.bf16.gmra.mrb[120].mxu1 %vm700_vm8, %v5467_v21  ;;  %3577 = vmatmul.mubr.msk.bf16.gmra.mrb[152].mxu0 %vm700_vm8, %v5467_v21  ;;  %v4277_v15 = vld [vmem:[%s7540_s5 + $0x118] sm:$0xff]  }
 0x1d7   :  { %v819_v40 = vpop.f32.mrb[15].mxu1  ;;  %v1012_v41 = vpop.f32.mrb[47].mxu0  ;;  %v1011_v45 = vadd.f32 %v1010_v49, %v5687_v4  ;;  %v1786_v50 = vpack.c.bf16 %v5785_v33, %v5771_v35  ;;  %4354 = vtanh.f32 %v1009_v31  ;;  %1317 = vmatprep.mubr.bf16.mxu1 %v4941_v25  ;;  %1510 = vmatprep.mubr.bf16.mxu0 %v4941_v25 }
 0x1d8   :  { %v5790_v63 = vpop.eup %4330  ;;  %v820_v29 = vadd.f32 %v819_v40, %v5694_v23  ;;  %v1013_v58 = vadd.f32 %v1012_v41, %v5697_v6  ;;  %4356 = vtanh.f32 %v818_v34 }
 0x1d9   :  { %v5795_v54 = vpop.eup %4332  ;;  %v1788_v5 = vpack.c.bf16 %v5790_v63, %v5773_v17  ;;  %4358 = vtanh.f32 %v1011_v45  ;;  %v823_v0 = vpop.f32.mrb[16].mxu1  ;;  %v4274_v17 = vld [vmem:[%s7540_s5 + $0x1d0] sm:$0xff]  }
 0x1da   :  { %v5804_v56 = vpop.eup %4334  ;;  %v1016_v21 = vpop.f32.mrb[48].mxu0  ;;  %4360 = vtanh.f32 %v820_v29  ;;  %v824_v1 = vadd.f32 %v823_v0, %v5684_v27 }
 0x1db   :  { %v5809_v60 = vpop.eup %4336  ;;  %v1017_v9 = vadd.f32 %v1016_v21, %v5687_v4  ;;  %v825_v11 = vpop.f32.mrb[17].mxu1  ;;  %4362 = vtanh.f32 %v1013_v58 }
 0x1dc   :  { %v5811_v62 = vpop.eup %4338  ;;  %v1018_v28 = vpop.f32.mrb[49].mxu0  ;;  %v826_v25 = vadd.f32 %v825_v11, %v5694_v23  ;;  %4364 = vtanh.f32 %v824_v1 }
 0x1dd   :  { %v5813_v26 = vpop.eup %4340  ;;  %v1019_v51 = vadd.f32 %v1018_v28, %v5697_v6  ;;  %v827_v16 = vpop.f32.mrb[18].mxu1  ;;  %4366 = vtanh.f32 %v1017_v9 }
 0x1de   :  { %v5817_v10 = vpop.eup %4342  ;;  %v1020_v18 = vpop.f32.mrb[50].mxu0  ;;  %v1793_v3 = vpack.c.bf16 %v5813_v26, %v5795_v54  ;;  %v828_v46 = vadd.f32 %v827_v16, %v5684_v27  ;;  %4368 = vtanh.f32 %v826_v25  ;;  %3562 = vmatmul.mubr.msk.bf16.gmra.mrb[124].mxu1 %vm700_vm8, %v5463_v19  ;;  %3578 = vmatmul.mubr.msk.bf16.gmra.mrb[156].mxu0 %vm700_vm8, %v5463_v19  ;;  %v4265_v25 = vld [vmem:[%s7540_s5 + $0x100] sm:$0xff]   ;;  %v4287_v26 = vld [vmem:[%s7540_s5 + $0x1a8] sm:$0xff]  }
 0x1df   :  { %v5823_v43 = vpop.eup %4344  ;;  %v829_v47 = vpop.f32.mrb[19].mxu1  ;;  %v1795_v30 = vpack.c.bf16 %v5817_v10, %v5804_v56  ;;  %v1021_v2 = vadd.f32 %v1020_v18, %v5687_v4  ;;  %4370 = vtanh.f32 %v1019_v51  ;;  %2456 = vmatprep.mubr.bf16.mxu1 %v1778_v12  ;;  %2617 = vmatprep.mubr.bf16.mxu0 %v1780_v14  ;;  %v4285_v56 = vld [vmem:[%s7540_s5 + $0x128] sm:$0xff]  }
 0x1e0   :  { %v1022_v22 = vpop.f32.mrb[51].mxu0  ;;  %v5828_v31 = vpop.eup %4346  ;;  %v1794_v49 = vpack.c.bf16 %v5823_v43, %v5809_v60  ;;  %v830_v40 = vadd.f32 %v829_v47, %v5694_v23  ;;  %4372 = vtanh.f32 %v828_v46  ;;  %v4280_v60 = vld [vmem:[%s7540_s5 + $0x160] sm:$0xff]  }
 0x1e1   :  { %v5833_v34 = vpop.eup %4348  ;;  %v1796_v41 = vpack.c.bf16 %v5828_v31, %v5811_v62  ;;  %v1023_v29 = vadd.f32 %v1022_v22, %v5697_v6  ;;  %4374 = vtanh.f32 %v1021_v2  ;;  %v833_v0 = vpop.f32.mrb[20].mxu1  ;;  %v4267_v22 = vld [vmem:[%s7540_s5 + $0x180] sm:$0xff]  }
 0x1e2   :  { %v5842_v45 = vpop.eup %4350  ;;  %v1026_v21 = vpop.f32.mrb[52].mxu0  ;;  %4376 = vtanh.f32 %v830_v40  ;;  %v834_v9 = vadd.f32 %v833_v0, %v5684_v27  ;;  %v4268_v0 = vld [vmem:[%s7540_s5 + $0x148] sm:$0xff]   ;;  %v4282_v62 = vld [vmem:[%s7540_s5 + $0x1e0] sm:$0xff]  }
 0x1e3   :  { %v5851_v58 = vpop.eup %4352  ;;  %v1027_v52 = vadd.f32 %v1026_v21, %v5687_v4  ;;  %v835_v59 = vpop.f32.mrb[21].mxu1  ;;  %4378 = vtanh.f32 %v1023_v29 }
 0x1e4   :  { %v5853_v19 = vpop.eup %4354  ;;  %v1028_v12 = vpop.f32.mrb[53].mxu0  ;;  %v836_v53 = vadd.f32 %v835_v59, %v5694_v23  ;;  %4380 = vtanh.f32 %v834_v9  ;;  %v4270_v9 = vld [vmem:[%s7540_s5 + $0x1c8] sm:$0xff]  }
 0x1e5   :  { %v5855_v1 = vpop.eup %4356  ;;  %v1029_v8 = vadd.f32 %v1028_v12, %v5697_v6  ;;  %v837_v14 = vpop.f32.mrb[22].mxu1  ;;  %4382 = vtanh.f32 %v1027_v52 }
 0x1e6   :  { %v5859_v11 = vpop.eup %4358  ;;  %v1030_v28 = vpop.f32.mrb[54].mxu0  ;;  %v1801_v51 = vpack.c.bf16 %v5855_v1, %v5833_v34  ;;  %v838_v18 = vadd.f32 %v837_v14, %v5684_v27  ;;  %4384 = vtanh.f32 %v836_v53  ;;  %2457 = vmatmul.mubr.bf16.vlgmr.msra.gmra.mrb[128].mxu1 %v1777_v57  ;;  %2618 = vmatmul.mubr.bf16.vlgmr.msra.gmra.mrb[160].mxu0 %v1779_v7  ;;  %v4295_v1 = vld [vmem:[%s7540_s5 + $0x1b8] sm:$0xff]  }
 0x1e7   :  { %v5868_v16 = vpop.eup %4360  ;;  %v839_v46 = vpop.f32.mrb[23].mxu1  ;;  %v1803_v2 = vpack.c.bf16 %v5859_v11, %v5842_v45  ;;  %v1031_v29 = vadd.f32 %v1030_v28, %v5687_v4  ;;  %4386 = vtanh.f32 %v1029_v8  ;;  %3908 = vmatpush3.bf16.msra.mxu1 %v4265_v25  ;;  %2464 = vmatprep.mubr.bf16.mxu1 %v1786_v50  ;;  %v4293_v45 = vld [vmem:[%s7540_s5 + $0x138] sm:$0xff]  }
 0x1e8   :  { %v1032_v47 = vpop.f32.mrb[55].mxu0  ;;  %v5876_v40 = vpop.eup %4362  ;;  %v1802_v21 = vpack.c.bf16 %v5868_v16, %v5851_v58  ;;  %v840_v12 = vadd.f32 %v839_v46, %v5694_v23  ;;  %4388 = vtanh.f32 %v838_v18  ;;  %2625 = vmatprep.mubr.bf16.mxu0 %v1788_v5  ;;  %4020 = vmatpush3.bf16.msra.mxu0 %v4267_v22  ;;  %v4288_v58 = vld [vmem:[%s7540_s5 + $0x170] sm:$0xff]  }
 0x1e9   :  { %v5887_v59 = vpop.eup %4364  ;;  %v1804_v52 = vpack.c.bf16 %v5876_v40, %v5853_v19  ;;  %v1033_v28 = vadd.f32 %v1032_v47, %v5697_v6  ;;  %4390 = vtanh.f32 %v1031_v29  ;;  %v843_v7 = vpop.f32.mrb[24].mxu1  ;;  %3909 = vmatprep.subr.bf16.mxu1 %v4268_v0  ;;  %4021 = vmatprep.subr.bf16.mxu0 %v4270_v9  ;;  %v4290_v19 = vld [vmem:[%s7540_s5 + $0x1f0] sm:$0xff]  }
 0x1ea   :  { %v5898_v14 = vpop.eup %4366  ;;  %v1036_v35 = vpop.f32.mrb[56].mxu0  ;;  %4392 = vtanh.f32 %v840_v12  ;;  %v844_v63 = vadd.f32 %v843_v7, %v5684_v27  ;;  %v4273_v7 = vld [vmem:[%s7540_s5 + $0x110] sm:$0xff]  }
 0x1eb   :  { %v5907_v55 = vpop.eup %4368  ;;  %v1037_v50 = vadd.f32 %v1036_v35, %v5687_v4  ;;  %v845_v5 = vpop.f32.mrb[25].mxu1  ;;  %4394 = vtanh.f32 %v1033_v28  ;;  %3910 = vmatpush3.bf16.msra.mxu1 %v4269_v44  ;;  %v4275_v44 = vld [vmem:[%s7540_s5 + $0x190] sm:$0xff]  }
 0x1ec   :  { %v5918_v57 = vpop.eup %4370  ;;  %v1038_v53 = vpop.f32.mrb[57].mxu0  ;;  %v846_v25 = vadd.f32 %v845_v5, %v5694_v23  ;;  %4396 = vtanh.f32 %v844_v63  ;;  %4022 = vmatpush3.bf16.msra.mxu0 %v4271_v48  ;;  %3911 = vmatprep.subr.bf16.mxu1 %v4272_v61  ;;  %v4276_v61 = vld [vmem:[%s7540_s5 + $0x158] sm:$0xff]  }
 0x1ed   :  { %v5923_v33 = vpop.eup %4372  ;;  %v1039_v18 = vadd.f32 %v1038_v53, %v5697_v6  ;;  %v847_v46 = vpop.f32.mrb[26].mxu1  ;;  %4398 = vtanh.f32 %v1037_v50  ;;  %4023 = vmatprep.subr.bf16.mxu0 %v4274_v17  ;;  %v4278_v5 = vld [vmem:[%s7540_s5 + $0x1d8] sm:$0xff]  }
 0x1ee   :  { %v5927_v8 = vpop.eup %4374  ;;  %v1040_v47 = vpop.f32.mrb[58].mxu0  ;;  %v1809_v22 = vpack.c.bf16 %v5923_v33, %v5887_v59  ;;  %v848_v0 = vadd.f32 %v847_v46, %v5684_v27  ;;  %4400 = vtanh.f32 %v846_v25  ;;  %2465 = vmatmul.mubr.bf16.gmra.mrb[132].mxu1 %v1785_v32  ;;  %2626 = vmatmul.mubr.bf16.gmra.mrb[164].mxu0 %v1787_v42 }
 0x1ef   :  { %v5933_v29 = vpop.eup %4376  ;;  %v849_v9 = vpop.f32.mrb[27].mxu1  ;;  %v1811_v28 = vpack.c.bf16 %v5927_v8, %v5898_v14  ;;  %v1041_v63 = vadd.f32 %v1040_v47, %v5687_v4  ;;  %4402 = vtanh.f32 %v1039_v18  ;;  %2472 = vmatprep.mubr.bf16.mxu1 %v1794_v49  ;;  %2633 = vmatprep.mubr.bf16.mxu0 %v1796_v41 }
 0x1f0   :  { %v1042_v12 = vpop.f32.mrb[59].mxu0  ;;  %v5944_v35 = vpop.eup %4378  ;;  %v1810_v48 = vpack.c.bf16 %v5933_v29, %v5907_v55  ;;  %v850_v46 = vadd.f32 %v849_v9, %v5694_v23  ;;  %4404 = vtanh.f32 %v848_v0  ;;  %3912 = vmatpush3.bf16.msra.mxu1 %v4273_v7  ;;  %4024 = vmatpush3.bf16.msra.mxu0 %v4275_v44 }
 0x1f1   :  { %v5955_v53 = vpop.eup %4380  ;;  %v1812_v17 = vpack.c.bf16 %v5944_v35, %v5918_v57  ;;  %v1043_v47 = vadd.f32 %v1042_v12, %v5697_v6  ;;  %4406 = vtanh.f32 %v1041_v63  ;;  %v853_v32 = vpop.f32.mrb[28].mxu1  ;;  %3913 = vmatprep.subr.bf16.mxu1 %v4276_v61  ;;  %4025 = vmatprep.subr.bf16.mxu0 %v4278_v5 }
 0x1f2   :  { %v5966_v50 = vpop.eup %4382  ;;  %v1046_v42 = vpop.f32.mrb[60].mxu0  ;;  %4408 = vtanh.f32 %v850_v46  ;;  %v854_v31 = vadd.f32 %v853_v32, %v5684_v27 }
 0x1f3   :  { %v5975_v13 = vpop.eup %4384  ;;  %v1047_v49 = vadd.f32 %v1046_v42, %v5687_v4  ;;  %v855_v41 = vpop.f32.mrb[29].mxu1  ;;  %4410 = vtanh.f32 %v1043_v47  ;;  %v4281_v47 = vld [vmem:[%s7540_s5 + $0x120] sm:$0xff]  }
 0x1f4   :  { %v5983_v24 = vpop.eup %4386  ;;  %v1048_v25 = vpop.f32.mrb[61].mxu0  ;;  %v856_v0 = vadd.f32 %v855_v41, %v5694_v23  ;;  %4412 = vtanh.f32 %v854_v31  ;;  %3914 = vmatpush3.bf16.msra.mxu1 %v4277_v15  ;;  %4026 = vmatpush3.bf16.msra.mxu0 %v4279_v20  ;;  %v4283_v42 = vld [vmem:[%s7540_s5 + $0x1a0] sm:$0xff]   ;;  %v4284_v15 = vld [vmem:[%s7540_s5 + $0x168] sm:$0xff]  }
 0x1f5   :  { %v5991_v43 = vpop.eup %4388  ;;  %v1049_v9 = vadd.f32 %v1048_v25, %v5697_v6  ;;  %v857_v12 = vpop.f32.mrb[30].mxu1  ;;  %4414 = vtanh.f32 %v1047_v49  ;;  %3915 = vmatprep.subr.bf16.mxu1 %v4280_v60  ;;  %4027 = vmatprep.subr.bf16.mxu0 %v4282_v62  ;;  %v4286_v20 = vld [vmem:[%s7540_s5 + $0x1e8] sm:$0xff]  }
 0x1f6   :  { %v5995_v18 = vpop.eup %4390  ;;  %v1050_v7 = vpop.f32.mrb[62].mxu0  ;;  %v1817_v44 = vpack.c.bf16 %v5991_v43, %v5955_v53  ;;  %v858_v61 = vadd.f32 %v857_v12, %v5684_v27  ;;  %4416 = vtanh.f32 %v856_v0  ;;  %2473 = vmatmul.mubr.bf16.gmra.mrb[136].mxu1 %v1793_v3  ;;  %2634 = vmatmul.mubr.bf16.gmra.mrb[168].mxu0 %v1795_v30 }
 0x1f7   :  { %v6001_v63 = vpop.eup %4392  ;;  %v859_v5 = vpop.f32.mrb[31].mxu1  ;;  %v1819_v32 = vpack.c.bf16 %v5995_v18, %v5966_v50  ;;  %v1051_v31 = vadd.f32 %v1050_v7, %v5687_v4  ;;  %4418 = vtanh.f32 %v1049_v9  ;;  %2480 = vmatprep.mubr.bf16.mxu1 %v1802_v21  ;;  %2641 = vmatprep.mubr.bf16.mxu0 %v1804_v52 }
 0x1f8   :  { %v1052_v46 = vpop.f32.mrb[63].mxu0  ;;  %v6012_v41 = vpop.eup %4394  ;;  %v1818_v25 = vpack.c.bf16 %v6001_v63, %v5975_v13  ;;  %v860_v49 = vadd.f32 %v859_v5, %v5694_v23  ;;  %4420 = vtanh.f32 %v858_v61  ;;  %3916 = vmatpush3.bf16.msra.mxu1 %v4281_v47  ;;  %4028 = vmatpush3.bf16.msra.mxu0 %v4283_v42 }
 0x1f9   :  { %v6023_v12 = vpop.eup %4396  ;;  %v1820_v60 = vpack.c.bf16 %v6012_v41, %v5983_v24  ;;  %v1053_v7 = vadd.f32 %v1052_v46, %v5697_v6  ;;  %4422 = vtanh.f32 %v1051_v31  ;;  %v863_v3 = vpop.f32.mrb[32].mxu1  ;;  %3917 = vmatprep.subr.bf16.mxu1 %v4284_v15  ;;  %4029 = vmatprep.subr.bf16.mxu0 %v4286_v20 }
 0x1fa   :  { %v6034_v62 = vpop.eup %4398  ;;  %v1056_v30 = vpop.f32.mrb[64].mxu0  ;;  %4424 = vtanh.f32 %v860_v49  ;;  %v864_v40 = vadd.f32 %v863_v3, %v5684_v27 }
 0x1fb   :  { %v6043_v54 = vpop.eup %4400  ;;  %v1057_v21 = vadd.f32 %v1056_v30, %v5687_v4  ;;  %v865_v52 = vpop.f32.mrb[33].mxu1  ;;  %4426 = vtanh.f32 %v1053_v7  ;;  %v4289_v7 = vld [vmem:[%s7540_s5 + $0x130] sm:$0xff]  }
 0x1fc   :  { %v6051_v10 = vpop.eup %4402  ;;  %v1058_v0 = vpop.f32.mrb[65].mxu0  ;;  %v866_v61 = vadd.f32 %v865_v52, %v5694_v23  ;;  %4428 = vtanh.f32 %v864_v40  ;;  %3918 = vmatpush3.bf16.msra.mxu1 %v4285_v56  ;;  %4030 = vmatpush3.bf16.msra.mxu0 %v4287_v26  ;;  %v4291_v30 = vld [vmem:[%s7540_s5 + $0x1b0] sm:$0xff]   ;;  %v4292_v56 = vld [vmem:[%s7540_s5 + $0x178] sm:$0xff]  }
 0x1fd   :  { %v6059_v16 = vpop.eup %4404  ;;  %v1059_v5 = vadd.f32 %v1058_v0, %v5697_v6  ;;  %v867_v46 = vpop.f32.mrb[34].mxu1  ;;  %4430 = vtanh.f32 %v1057_v21  ;;  %3919 = vmatprep.subr.bf16.mxu1 %v4288_v58  ;;  %4031 = vmatprep.subr.bf16.mxu0 %v4290_v19  ;;  %v4294_v26 = vld [vmem:[%s7540_s5 + $0x1f8] sm:$0xff]  }
 0x1fe   :  { %v6063_v9 = vpop.eup %4406  ;;  %v1060_v47 = vpop.f32.mrb[66].mxu0  ;;  %v1825_v42 = vpack.c.bf16 %v6059_v16, %v6023_v12  ;;  %v868_v15 = vadd.f32 %v867_v46, %v5684_v27  ;;  %4432 = vtanh.f32 %v866_v61  ;;  %2481 = vmatmul.mubr.bf16.gmra.mrb[140].mxu1 %v1801_v51  ;;  %2642 = vmatmul.mubr.bf16.gmra.mrb[172].mxu0 %v1803_v2 }
 0x1ff   :  { %v6069_v31 = vpop.eup %4408  ;;  %v869_v20 = vpop.f32.mrb[35].mxu1  ;;  %v1827_v3 = vpack.c.bf16 %v6063_v9, %v6034_v62  ;;  %v1061_v40 = vadd.f32 %v1060_v47, %v5687_v4  ;;  %4434 = vtanh.f32 %v1059_v5  ;;  %2488 = vmatprep.mubr.bf16.mxu1 %v1810_v48  ;;  %2649 = vmatprep.mubr.bf16.mxu0 %v1812_v17 }
 0x200   :  { %v1062_v49 = vpop.f32.mrb[67].mxu0  ;;  %v6080_v52 = vpop.eup %4410  ;;  %v1826_v0 = vpack.c.bf16 %v6069_v31, %v6043_v54  ;;  %v870_v21 = vadd.f32 %v869_v20, %v5694_v23  ;;  %4436 = vtanh.f32 %v868_v15  ;;  %3920 = vmatpush3.bf16.msra.mxu1 %v4289_v7  ;;  %4032 = vmatpush3.bf16.msra.mxu0 %v4291_v30 }
 0x201   :  { %v6091_v46 = vpop.eup %4412  ;;  %v1828_v58 = vpack.c.bf16 %v6080_v52, %v6051_v10  ;;  %v1063_v47 = vadd.f32 %v1062_v49, %v5697_v6  ;;  %4438 = vtanh.f32 %v1061_v40  ;;  %v873_v51 = vpop.f32.mrb[36].mxu1  ;;  %3921 = vmatprep.subr.bf16.mxu1 %v4292_v56  ;;  %4033 = vmatprep.subr.bf16.mxu0 %v4294_v26 }
 0x202   :  { %v6102_v19 = vpop.eup %4414  ;;  %v1066_v2 = vpop.f32.mrb[68].mxu0  ;;  %4440 = vtanh.f32 %v870_v21  ;;  %v874_v57 = vadd.f32 %v873_v51, %v5684_v27 }
 0x203   :  { %v6111_v34 = vpop.eup %4416  ;;  %v1067_v29 = vadd.f32 %v1066_v2, %v5687_v4  ;;  %v875_v35 = vpop.f32.mrb[37].mxu1  ;;  %4442 = vtanh.f32 %v1063_v47 }
 0x204   :  { %v6119_v11 = vpop.eup %4418  ;;  %v1068_v48 = vpop.f32.mrb[69].mxu0  ;;  %v876_v61 = vadd.f32 %v875_v35, %v5694_v23  ;;  %4444 = vtanh.f32 %v874_v57  ;;  %3922 = vmatpush3.bf16.msra.mxu1 %v4293_v45  ;;  %4034 = vmatpush3.bf16.msra.mxu0 %v4295_v1 }
 0x205   :  { %v6121_v55 = vpop.eup %4420  ;;  %v1069_v5 = vadd.f32 %v1068_v48, %v5697_v6  ;;  %v877_v15 = vpop.f32.mrb[38].mxu1  ;;  %4446 = vtanh.f32 %v1067_v29 }
 0x206   :  { %v6125_v17 = vpop.eup %4422  ;;  %v1070_v20 = vpop.f32.mrb[70].mxu0  ;;  %v1833_v49 = vpack.c.bf16 %v6121_v55, %v6091_v46  ;;  %v878_v30 = vadd.f32 %v877_v15, %v5684_v27  ;;  %4448 = vtanh.f32 %v876_v61  ;;  %2489 = vmatmul.mubr.bf16.gmra.mrb[144].mxu1 %v1809_v22  ;;  %2650 = vmatmul.mubr.bf16.gmra.mrb[176].mxu0 %v1811_v28 }
 0x207   :  { %v6131_v7 = vpop.eup %4424  ;;  %v879_v40 = vpop.f32.mrb[39].mxu1  ;;  %v1835_v26 = vpack.c.bf16 %v6125_v17, %v6102_v19  ;;  %v1071_v47 = vadd.f32 %v1070_v20, %v5687_v4  ;;  %4450 = vtanh.f32 %v1069_v5  ;;  %2496 = vmatprep.mubr.bf16.mxu1 %v1818_v25  ;;  %2657 = vmatprep.mubr.bf16.mxu0 %v1820_v60 }
 0x208   :  { %v1072_v56 = vpop.f32.mrb[71].mxu0  ;;  %v6136_v21 = vpop.eup %4426  ;;  %v1834_v51 = vpack.c.bf16 %v6131_v7, %v6111_v34  ;;  %v880_v57 = vadd.f32 %v879_v40, %v5694_v23  ;;  %4452 = vtanh.f32 %v878_v30 }
 0x209   :  { %v6141_v2 = vpop.eup %4428  ;;  %v1836_v45 = vpack.c.bf16 %v6136_v21, %v6119_v11  ;;  %v1073_v29 = vadd.f32 %v1072_v56, %v5697_v6  ;;  %4454 = vtanh.f32 %v1071_v47  ;;  %v883_v33 = vpop.f32.mrb[40].mxu1 }
 0x20a   :  { %v6152_v1 = vpop.eup %4430  ;;  %v1076_v8 = vpop.f32.mrb[72].mxu0  ;;  %4456 = vtanh.f32 %v880_v57  ;;  %v884_v28 = vadd.f32 %v883_v33, %v5684_v27 }
 0x20b   :  { %v6161_v59 = vpop.eup %4432  ;;  %v1077_v13 = vadd.f32 %v1076_v8, %v5687_v4  ;;  %v885_v63 = vpop.f32.mrb[41].mxu1  ;;  %4458 = vtanh.f32 %v1073_v29 }
 0x20c   :  { %v6163_v14 = vpop.eup %4434  ;;  %v1078_v25 = vpop.f32.mrb[73].mxu0  ;;  %v886_v24 = vadd.f32 %v885_v63, %v5694_v23  ;;  %4460 = vtanh.f32 %v884_v28 }
 0x20d   :  { %v6165_v22 = vpop.eup %4436  ;;  %v1079_v41 = vadd.f32 %v1078_v25, %v5697_v6  ;;  %v887_v60 = vpop.f32.mrb[42].mxu1  ;;  %4462 = vtanh.f32 %v1077_v13 }
 0x20e   :  { %v6169_v35 = vpop.eup %4438  ;;  %v1080_v48 = vpop.f32.mrb[74].mxu0  ;;  %v1841_v61 = vpack.c.bf16 %v6165_v22, %v6141_v2  ;;  %v888_v15 = vadd.f32 %v887_v60, %v5684_v27  ;;  %4464 = vtanh.f32 %v886_v24  ;;  %2497 = vmatmul.mubr.bf16.gmra.mrb[148].mxu1 %v1817_v44  ;;  %2658 = vmatmul.mubr.bf16.gmra.mrb[180].mxu0 %v1819_v32 }
 0x20f   :  { %v6175_v5 = vpop.eup %4440  ;;  %v889_v20 = vpop.f32.mrb[43].mxu1  ;;  %v1843_v40 = vpack.c.bf16 %v6169_v35, %v6152_v1  ;;  %v1081_v47 = vadd.f32 %v1080_v48, %v5687_v4  ;;  %4466 = vtanh.f32 %v1079_v41  ;;  %2504 = vmatprep.mubr.bf16.mxu1 %v1826_v0  ;;  %2665 = vmatprep.mubr.bf16.mxu0 %v1828_v58 }
 0x210   :  { %v1082_v30 = vpop.f32.mrb[75].mxu0  ;;  %v6180_v56 = vpop.eup %4442  ;;  %v1842_v57 = vpack.c.bf16 %v6175_v5, %v6161_v59  ;;  %v890_v33 = vadd.f32 %v889_v20, %v5694_v23  ;;  %4468 = vtanh.f32 %v888_v15 }
 0x211   :  { %v6185_v29 = vpop.eup %4444  ;;  %v1844_v8 = vpack.c.bf16 %v6180_v56, %v6163_v14  ;;  %v1083_v13 = vadd.f32 %v1082_v30, %v5697_v6  ;;  %4470 = vtanh.f32 %v1081_v47  ;;  %v893_v43 = vpop.f32.mrb[44].mxu1 }
 0x212   :  { %v6196_v28 = vpop.eup %4446  ;;  %v1086_v18 = vpop.f32.mrb[76].mxu0  ;;  %4472 = vtanh.f32 %v890_v33  ;;  %v894_v32 = vadd.f32 %v893_v43, %v5684_v27 }
 0x213   :  { %v6205_v53 = vpop.eup %4448  ;;  %v1087_v54 = vadd.f32 %v1086_v18, %v5687_v4  ;;  %v895_v31 = vpop.f32.mrb[45].mxu1  ;;  %4474 = vtanh.f32 %v1083_v13 }
 0x214   :  { %v6207_v50 = vpop.eup %4450  ;;  %v1088_v0 = vpop.f32.mrb[77].mxu0  ;;  %v896_v10 = vadd.f32 %v895_v31, %v5694_v23  ;;  %4476 = vtanh.f32 %v894_v32 }
 0x215   :  { %v6209_v44 = vpop.eup %4452  ;;  %v1089_v52 = vadd.f32 %v1088_v0, %v5697_v6  ;;  %v897_v58 = vpop.f32.mrb[46].mxu1  ;;  %4478 = vtanh.f32 %v1087_v54 }
 0x216   :  { %v6213_v63 = vpop.eup %4454  ;;  %v1090_v25 = vpop.f32.mrb[78].mxu0  ;;  %v1849_v24 = vpack.c.bf16 %v6209_v44, %v6185_v29  ;;  %v898_v60 = vadd.f32 %v897_v58, %v5684_v27  ;;  %4480 = vtanh.f32 %v896_v10  ;;  %2505 = vmatmul.mubr.bf16.gmra.mrb[152].mxu1 %v1825_v42  ;;  %2666 = vmatmul.mubr.bf16.gmra.mrb[184].mxu0 %v1827_v3 }
 0x217   :  { %v6219_v41 = vpop.eup %4456  ;;  %v899_v48 = vpop.f32.mrb[47].mxu1  ;;  %v1851_v20 = vpack.c.bf16 %v6213_v63, %v6196_v28  ;;  %v1091_v47 = vadd.f32 %v1090_v25, %v5687_v4  ;;  %4482 = vtanh.f32 %v1089_v52  ;;  %2512 = vmatprep.mubr.bf16.mxu1 %v1834_v51  ;;  %2673 = vmatprep.mubr.bf16.mxu0 %v1836_v45 }
 0x218   :  { %v1092_v15 = vpop.f32.mrb[79].mxu0  ;;  %v6224_v30 = vpop.eup %4458  ;;  %v1850_v33 = vpack.c.bf16 %v6219_v41, %v6205_v53  ;;  %v900_v43 = vadd.f32 %v899_v48, %v5694_v23  ;;  %4484 = vtanh.f32 %v898_v60 }
 0x219   :  { %v6229_v13 = vpop.eup %4460  ;;  %v1852_v18 = vpack.c.bf16 %v6224_v30, %v6207_v50  ;;  %v1093_v54 = vadd.f32 %v1092_v15, %v5697_v6  ;;  %4486 = vtanh.f32 %v1091_v47  ;;  %v903_v16 = vpop.f32.mrb[48].mxu1 }
 0x21a   :  { %v6240_v32 = vpop.eup %4462  ;;  %v1096_v9 = vpop.f32.mrb[80].mxu0  ;;  %4488 = vtanh.f32 %v900_v43  ;;  %v904_v3 = vadd.f32 %v903_v16, %v5684_v27 }
 0x21b   :  { %v6249_v12 = vpop.eup %4464  ;;  %v1097_v34 = vadd.f32 %v1096_v9, %v5687_v4  ;;  %v905_v7 = vpop.f32.mrb[49].mxu1  ;;  %4490 = vtanh.f32 %v1093_v54 }
 0x21c   :  { %v6251_v62 = vpop.eup %4466  ;;  %v1098_v51 = vpop.f32.mrb[81].mxu0  ;;  %v906_v11 = vadd.f32 %v905_v7, %v5694_v23  ;;  %4492 = vtanh.f32 %v904_v3 }
 0x21d   :  { %v6253_v42 = vpop.eup %4468  ;;  %v1099_v21 = vadd.f32 %v1098_v51, %v5697_v6  ;;  %v907_v45 = vpop.f32.mrb[50].mxu1  ;;  %4494 = vtanh.f32 %v1097_v34 }
 0x21e   :  { %v6257_v31 = vpop.eup %4470  ;;  %v1100_v0 = vpop.f32.mrb[82].mxu0  ;;  %v1857_v10 = vpack.c.bf16 %v6253_v42, %v6229_v13  ;;  %v908_v58 = vadd.f32 %v907_v45, %v5684_v27  ;;  %4496 = vtanh.f32 %v906_v11  ;;  %2513 = vmatmul.mubr.bf16.gmra.mrb[156].mxu1 %v1833_v49  ;;  %2674 = vmatmul.mubr.bf16.gmra.mrb[188].mxu0 %v1835_v26 }
 0x21f   :  { %v6263_v52 = vpop.eup %4472  ;;  %v909_v25 = vpop.f32.mrb[51].mxu1  ;;  %v1859_v48 = vpack.c.bf16 %v6257_v31, %v6240_v32  ;;  %v1101_v47 = vadd.f32 %v1100_v0, %v5687_v4  ;;  %4498 = vtanh.f32 %v1099_v21  ;;  %2520 = vmatprep.mubr.bf16.mxu1 %v1842_v57  ;;  %2681 = vmatprep.mubr.bf16.mxu0 %v1844_v8 }
 0x220   :  { %v1102_v60 = vpop.f32.mrb[83].mxu0  ;;  %v6268_v15 = vpop.eup %4474  ;;  %v1858_v43 = vpack.c.bf16 %v6263_v52, %v6249_v12  ;;  %v910_v16 = vadd.f32 %v909_v25, %v5694_v23  ;;  %4500 = vtanh.f32 %v908_v58 }
 0x221   :  { %v6273_v54 = vpop.eup %4476  ;;  %v1860_v9 = vpack.c.bf16 %v6268_v15, %v6251_v62  ;;  %v1103_v34 = vadd.f32 %v1102_v60, %v5697_v6  ;;  %4502 = vtanh.f32 %v1101_v47  ;;  %v913_v55 = vpop.f32.mrb[52].mxu1 }
 0x222   :  { %v6284_v3 = vpop.eup %4478  ;;  %v1106_v17 = vpop.f32.mrb[84].mxu0  ;;  %4504 = vtanh.f32 %v910_v16  ;;  %v914_v26 = vadd.f32 %v913_v55, %v5684_v27 }
 0x223   :  { %v6293_v46 = vpop.eup %4480  ;;  %v1107_v59 = vadd.f32 %v1106_v17, %v5687_v4  ;;  %v915_v5 = vpop.f32.mrb[53].mxu1  ;;  %4506 = vtanh.f32 %v1103_v34 }
 0x224   :  { %v6295_v19 = vpop.eup %4482  ;;  %v1108_v57 = vpop.f32.mrb[85].mxu0  ;;  %v916_v14 = vadd.f32 %v915_v5, %v5694_v23  ;;  %4508 = vtanh.f32 %v914_v26 }
 0x225   :  { %v6297_v49 = vpop.eup %4484  ;;  %v1109_v56 = vadd.f32 %v1108_v57, %v5697_v6  ;;  %v917_v8 = vpop.f32.mrb[54].mxu1  ;;  %4510 = vtanh.f32 %v1107_v59 }
 0x226   :  { %v6301_v7 = vpop.eup %4486  ;;  %v1110_v51 = vpop.f32.mrb[86].mxu0  ;;  %v1865_v11 = vpack.c.bf16 %v6297_v49, %v6273_v54  ;;  %v918_v45 = vadd.f32 %v917_v8, %v5684_v27  ;;  %4512 = vtanh.f32 %v916_v14  ;;  %2521 = vmatmul.mubr.bf16.gmra.mrb[160].mxu1 %v1841_v61  ;;  %2682 = vmatmul.mubr.bf16.gmra.mrb[192].mxu0 %v1843_v40 }
 0x227   :  { %v6307_v21 = vpop.eup %4488  ;;  %v919_v0 = vpop.f32.mrb[55].mxu1  ;;  %v1867_v25 = vpack.c.bf16 %v6301_v7, %v6284_v3  ;;  %v1111_v47 = vadd.f32 %v1110_v51, %v5687_v4  ;;  %4514 = vtanh.f32 %v1109_v56  ;;  %2528 = vmatprep.mubr.bf16.mxu1 %v1850_v33  ;;  %2689 = vmatprep.mubr.bf16.mxu0 %v1852_v18 }
 0x228   :  { %v1112_v58 = vpop.f32.mrb[87].mxu0  ;;  %v6312_v60 = vpop.eup %4490  ;;  %v1866_v16 = vpack.c.bf16 %v6307_v21, %v6293_v46  ;;  %v920_v55 = vadd.f32 %v919_v0, %v5694_v23  ;;  %4516 = vtanh.f32 %v918_v45 }
 0x229   :  { %v6317_v34 = vpop.eup %4492  ;;  %v1868_v17 = vpack.c.bf16 %v6312_v60, %v6295_v19  ;;  %v1113_v59 = vadd.f32 %v1112_v58, %v5697_v6  ;;  %4518 = vtanh.f32 %v1111_v47  ;;  %v923_v22 = vpop.f32.mrb[56].mxu1 }
 0x22a   :  { %v6328_v26 = vpop.eup %4494  ;;  %v1116_v35 = vpop.f32.mrb[88].mxu0  ;;  %4520 = vtanh.f32 %v920_v55  ;;  %v924_v40 = vadd.f32 %v923_v22, %v5684_v27 }
 0x22b   :  { %v6337_v2 = vpop.eup %4496  ;;  %v1117_v53 = vadd.f32 %v1116_v35, %v5687_v4  ;;  %v925_v41 = vpop.f32.mrb[57].mxu1  ;;  %4522 = vtanh.f32 %v1113_v59 }
 0x22c   :  { %v6339_v1 = vpop.eup %4498  ;;  %v1118_v33 = vpop.f32.mrb[89].mxu0  ;;  %v926_v50 = vadd.f32 %v925_v41, %v5694_v23  ;;  %4524 = vtanh.f32 %v924_v40 }
 0x22d   :  { %v6341_v61 = vpop.eup %4500  ;;  %v1119_v30 = vadd.f32 %v1118_v33, %v5697_v6  ;;  %v927_v18 = vpop.f32.mrb[58].mxu1  ;;  %4526 = vtanh.f32 %v1117_v53 }
 0x22e   :  { %v6345_v5 = vpop.eup %4502  ;;  %v1120_v57 = vpop.f32.mrb[90].mxu0  ;;  %v1873_v14 = vpack.c.bf16 %v6341_v61, %v6317_v34  ;;  %v928_v8 = vadd.f32 %v927_v18, %v5684_v27  ;;  %4528 = vtanh.f32 %v926_v50  ;;  %2529 = vmatmul.mubr.bf16.gmra.mrb[164].mxu1 %v1849_v24  ;;  %2690 = vmatmul.mubr.bf16.gmra.mrb[196].mxu0 %v1851_v20 }
 0x22f   :  { %v6351_v56 = vpop.eup %4504  ;;  %v929_v51 = vpop.f32.mrb[59].mxu1  ;;  %v1875_v0 = vpack.c.bf16 %v6345_v5, %v6328_v26  ;;  %v1121_v47 = vadd.f32 %v1120_v57, %v5687_v4  ;;  %4530 = vtanh.f32 %v1119_v30  ;;  %2536 = vmatprep.mubr.bf16.mxu1 %v1858_v43  ;;  %2697 = vmatprep.mubr.bf16.mxu0 %v1860_v9 }
 0x230   :  { %v1122_v45 = vpop.f32.mrb[91].mxu0  ;;  %v6356_v58 = vpop.eup %4506  ;;  %v1874_v55 = vpack.c.bf16 %v6351_v56, %v6337_v2  ;;  %v930_v22 = vadd.f32 %v929_v51, %v5694_v23  ;;  %4532 = vtanh.f32 %v928_v8 }
 0x231   :  { %v6361_v59 = vpop.eup %4508  ;;  %v1876_v35 = vpack.c.bf16 %v6356_v58, %v6339_v1  ;;  %v1123_v53 = vadd.f32 %v1122_v45, %v5697_v6  ;;  %4534 = vtanh.f32 %v1121_v47  ;;  %v933_v44 = vpop.f32.mrb[60].mxu1 }
 0x232   :  { %v6372_v40 = vpop.eup %4510  ;;  %v1126_v63 = vpop.f32.mrb[92].mxu0  ;;  %4536 = vtanh.f32 %v930_v22  ;;  %v934_v20 = vadd.f32 %v933_v44, %v5684_v27 }
 0x233   :  { %v6381_v29 = vpop.eup %4512  ;;  %v1127_v12 = vadd.f32 %v1126_v63, %v5687_v4  ;;  %v935_v52 = vpop.f32.mrb[61].mxu1  ;;  %4538 = vtanh.f32 %v1123_v53 }
 0x234   :  { %v6383_v28 = vpop.eup %4514  ;;  %v1128_v43 = vpop.f32.mrb[93].mxu0  ;;  %v936_v62 = vadd.f32 %v935_v52, %v5694_v23  ;;  %4540 = vtanh.f32 %v934_v20 }
 0x235   :  { %v6385_v24 = vpop.eup %4516  ;;  %v1129_v15 = vadd.f32 %v1128_v43, %v5697_v6  ;;  %v937_v9 = vpop.f32.mrb[62].mxu1  ;;  %4542 = vtanh.f32 %v1127_v12 }
 0x236   :  { %v6389_v41 = vpop.eup %4518  ;;  %v1130_v33 = vpop.f32.mrb[94].mxu0  ;;  %v1881_v50 = vpack.c.bf16 %v6385_v24, %v6361_v59  ;;  %v938_v18 = vadd.f32 %v937_v9, %v5684_v27  ;;  %4544 = vtanh.f32 %v936_v62  ;;  %2537 = vmatmul.mubr.bf16.gmra.mrb[168].mxu1 %v1857_v10  ;;  %2698 = vmatmul.mubr.bf16.gmra.mrb[200].mxu0 %v1859_v48 }
 0x237   :  { %v6395_v30 = vpop.eup %4520  ;;  %v939_v57 = vpop.f32.mrb[63].mxu1  ;;  %v1883_v51 = vpack.c.bf16 %v6389_v41, %v6372_v40  ;;  %v1131_v47 = vadd.f32 %v1130_v33, %v5687_v4  ;;  %4546 = vtanh.f32 %v1129_v15  ;;  %2544 = vmatprep.mubr.bf16.mxu1 %v1866_v16  ;;  %2705 = vmatprep.mubr.bf16.mxu0 %v1868_v17 }
 0x238   :  { %v1132_v8 = vpop.f32.mrb[95].mxu0  ;;  %v6400_v45 = vpop.eup %4522  ;;  %v1882_v22 = vpack.c.bf16 %v6395_v30, %v6381_v29  ;;  %v940_v44 = vadd.f32 %v939_v57, %v5694_v23  ;;  %4548 = vtanh.f32 %v938_v18 }
 0x239   :  { %v6405_v53 = vpop.eup %4524  ;;  %v1884_v27 = vpack.c.bf16 %v6400_v45, %v6383_v28  ;;  %v1133_v63 = vadd.f32 %v1132_v8, %v5697_v6  ;;  %4550 = vtanh.f32 %v1131_v47  ;;  %v1169_v32 = vpop.f32.mrb[64].mxu1 }
 0x23a   :  { %v6416_v4 = vpop.eup %4526  ;;  %v1362_v42 = vpop.f32.mrb[96].mxu0  ;;  %4552 = vtanh.f32 %v940_v44  ;;  %v1170_v6 = vadd.f32 %v1169_v32, %v5193_v36 }
 0x23b   :  { %v6425_v23 = vpop.eup %4528  ;;  %v1363_v10 = vadd.f32 %v1362_v42, %v5199_v38  ;;  %v1171_v48 = vpop.f32.mrb[65].mxu1  ;;  %4554 = vtanh.f32 %v1133_v63 }
 0x23c   :  { %v6427_v13 = vpop.eup %4530  ;;  %v1364_v46 = vpop.f32.mrb[97].mxu0  ;;  %v1172_v19 = vadd.f32 %v1171_v48, %v5196_v37  ;;  %4556 = vtanh.f32 %v1170_v6 }
 0x23d   :  { %v6429_v31 = vpop.eup %4532  ;;  %v1365_v60 = vadd.f32 %v1364_v46, %v5202_v39  ;;  %v1173_v16 = vpop.f32.mrb[66].mxu1  ;;  %4558 = vtanh.f32 %v1363_v10 }
 0x23e   :  { %v6433_v21 = vpop.eup %4534  ;;  %v1366_v17 = vpop.f32.mrb[98].mxu0  ;;  %v1889_v20 = vpack.c.bf16 %v6429_v31, %v6405_v53  ;;  %v1174_v52 = vadd.f32 %v1173_v16, %v5193_v36  ;;  %4560 = vtanh.f32 %v1172_v19  ;;  %2545 = vmatmul.mubr.bf16.gmra.mrb[172].mxu1 %v1865_v11  ;;  %2706 = vmatmul.mubr.bf16.gmra.mrb[204].mxu0 %v1867_v25 }
 0x23f   :  { %v6439_v12 = vpop.eup %4536  ;;  %v1175_v43 = vpop.f32.mrb[67].mxu1  ;;  %v1891_v15 = vpack.c.bf16 %v6433_v21, %v6416_v4  ;;  %v1367_v33 = vadd.f32 %v1366_v17, %v5199_v38  ;;  %4562 = vtanh.f32 %v1365_v60  ;;  %2552 = vmatprep.mubr.bf16.mxu1 %v1874_v55  ;;  %2713 = vmatprep.mubr.bf16.mxu0 %v1876_v35 }
 0x240   :  { %v1368_v62 = vpop.f32.mrb[99].mxu0  ;;  %v6444_v9 = vpop.eup %4538  ;;  %v1890_v18 = vpack.c.bf16 %v6439_v12, %v6425_v23  ;;  %v1176_v8 = vadd.f32 %v1175_v43, %v5196_v37  ;;  %4564 = vtanh.f32 %v1174_v52 }
 0x241   :  { %v6449_v57 = vpop.eup %4540  ;;  %v1892_v47 = vpack.c.bf16 %v6444_v9, %v6427_v13  ;;  %v1369_v63 = vadd.f32 %v1368_v62, %v5202_v39  ;;  %4566 = vtanh.f32 %v1367_v33  ;;  %v1179_v49 = vpop.f32.mrb[68].mxu1 }
 0x242   :  { %v6460_v44 = vpop.eup %4542  ;;  %v1372_v7 = vpop.f32.mrb[100].mxu0  ;;  %4568 = vtanh.f32 %v1176_v8  ;;  %v1180_v25 = vadd.f32 %v1179_v49, %v5193_v36 }
 0x243   :  { %v6469_v54 = vpop.eup %4544  ;;  %v1373_v2 = vadd.f32 %v1372_v7, %v5199_v38  ;;  %v1181_v56 = vpop.f32.mrb[69].mxu1  ;;  %4570 = vtanh.f32 %v1369_v63 }
 0x244   :  { %v6471_v3 = vpop.eup %4546  ;;  %v1374_v55 = vpop.f32.mrb[101].mxu0  ;;  %v1182_v1 = vadd.f32 %v1181_v56, %v5196_v37  ;;  %4572 = vtanh.f32 %v1180_v25 }
 0x245   :  { %v6473_v11 = vpop.eup %4548  ;;  %v1375_v58 = vadd.f32 %v1374_v55, %v5202_v39  ;;  %v1183_v35 = vpop.f32.mrb[70].mxu1  ;;  %4574 = vtanh.f32 %v1373_v2 }
 0x246   :  { %v6477_v32 = vpop.eup %4550  ;;  %v1376_v42 = vpop.f32.mrb[102].mxu0  ;;  %v1897_v6 = vpack.c.bf16 %v6473_v11, %v6449_v57  ;;  %v1184_v48 = vadd.f32 %v1183_v35, %v5193_v36  ;;  %4576 = vtanh.f32 %v1182_v1  ;;  %2553 = vmatmul.mubr.bf16.gmra.mrb[176].mxu1 %v1873_v14  ;;  %2714 = vmatmul.mubr.bf16.gmra.mrb[208].mxu0 %v1875_v0 }
 0x247   :  { %v6483_v10 = vpop.eup %4552  ;;  %v1185_v46 = vpop.f32.mrb[71].mxu1  ;;  %v1899_v60 = vpack.c.bf16 %v6477_v32, %v6460_v44  ;;  %v1377_v17 = vadd.f32 %v1376_v42, %v5199_v38  ;;  %4578 = vtanh.f32 %v1375_v58  ;;  %2560 = vmatprep.mubr.bf16.mxu1 %v1882_v22  ;;  %2721 = vmatprep.mubr.bf16.mxu0 %v1884_v27 }
 0x248   :  { %v1378_v19 = vpop.f32.mrb[103].mxu0  ;;  %v6488_v16 = vpop.eup %4554  ;;  %v1898_v52 = vpack.c.bf16 %v6483_v10, %v6469_v54  ;;  %v1186_v62 = vadd.f32 %v1185_v46, %v5196_v37  ;;  %4580 = vtanh.f32 %v1184_v48 }
 0x249   :  { %v6493_v43 = vpop.eup %4556  ;;  %v1900_v33 = vpack.c.bf16 %v6488_v16, %v6471_v3  ;;  %v1379_v63 = vadd.f32 %v1378_v19, %v5202_v39  ;;  %4582 = vtanh.f32 %v1377_v17  ;;  %v1189_v61 = vpop.f32.mrb[72].mxu1 }
 0x24a   :  { %v6504_v8 = vpop.eup %4558  ;;  %v1382_v5 = vpop.f32.mrb[104].mxu0  ;;  %4584 = vtanh.f32 %v1186_v62  ;;  %v1190_v0 = vadd.f32 %v1189_v61, %v5193_v36 }
 0x24b   :  { %v6513_v34 = vpop.eup %4560  ;;  %v1383_v29 = vadd.f32 %v1382_v5, %v5199_v38  ;;  %v1191_v30 = vpop.f32.mrb[73].mxu1  ;;  %4586 = vtanh.f32 %v1379_v63 }
 0x24c   :  { %v6515_v26 = vpop.eup %4562  ;;  %v1384_v22 = vpop.f32.mrb[105].mxu0  ;;  %v1192_v28 = vadd.f32 %v1191_v30, %v5196_v37  ;;  %4588 = vtanh.f32 %v1190_v0 }
 0x24d   :  { %v6517_v14 = vpop.eup %4564  ;;  %v1385_v45 = vadd.f32 %v1384_v22, %v5202_v39  ;;  %v1193_v27 = vpop.f32.mrb[74].mxu1  ;;  %4590 = vtanh.f32 %v1383_v29 }
 0x24e   :  { %v6521_v49 = vpop.eup %4566  ;;  %v1386_v7 = vpop.f32.mrb[106].mxu0  ;;  %v1781_v25 = vpack.c.bf16 %v6517_v14, %v6493_v43  ;;  %v1194_v56 = vadd.f32 %v1193_v27, %v5193_v36  ;;  %4592 = vtanh.f32 %v1192_v28  ;;  %2561 = vmatmul.mubr.bf16.gmra.mrb[180].mxu1 %v1881_v50  ;;  %2722 = vmatmul.mubr.bf16.gmra.mrb[212].mxu0 %v1883_v51 }
 0x24f   :  { %v6527_v2 = vpop.eup %4568  ;;  %v1195_v55 = vpop.f32.mrb[75].mxu1  ;;  %v1783_v58 = vpack.c.bf16 %v6521_v49, %v6504_v8  ;;  %v1387_v42 = vadd.f32 %v1386_v7, %v5199_v38  ;;  %4594 = vtanh.f32 %v1385_v45  ;;  %2568 = vmatprep.mubr.bf16.mxu1 %v1890_v18  ;;  %2729 = vmatprep.mubr.bf16.mxu0 %v1892_v47 }
 0x250   :  { %v1388_v1 = vpop.f32.mrb[107].mxu0  ;;  %v6532_v35 = vpop.eup %4570  ;;  %v1782_v48 = vpack.c.bf16 %v6527_v2, %v6513_v34  ;;  %v1196_v19 = vadd.f32 %v1195_v55, %v5196_v37  ;;  %4596 = vtanh.f32 %v1194_v56 }
 0x251   :  { %v6537_v46 = vpop.eup %4572  ;;  %v1784_v17 = vpack.c.bf16 %v6532_v35, %v6515_v26  ;;  %v1389_v63 = vadd.f32 %v1388_v1, %v5202_v39  ;;  %4598 = vtanh.f32 %v1387_v42  ;;  %v1199_v24 = vpop.f32.mrb[76].mxu1 }
 0x252   :  { %v6548_v62 = vpop.eup %4574  ;;  %v1392_v41 = vpop.f32.mrb[108].mxu0  ;;  %4600 = vtanh.f32 %v1196_v19  ;;  %v1200_v51 = vadd.f32 %v1199_v24, %v5193_v36 }
 0x253   :  { %v6557_v59 = vpop.eup %4576  ;;  %v1393_v23 = vadd.f32 %v1392_v41, %v5199_v38  ;;  %v1201_v12 = vpop.f32.mrb[77].mxu1  ;;  %4602 = vtanh.f32 %v1389_v63 }
 0x254   :  { %v6559_v40 = vpop.eup %4578  ;;  %v1394_v18 = vpop.f32.mrb[109].mxu0  ;;  %v1202_v13 = vadd.f32 %v1201_v12, %v5196_v37  ;;  %4604 = vtanh.f32 %v1200_v51 }
 0x255   :  { %v6561_v50 = vpop.eup %4580  ;;  %v1395_v9 = vadd.f32 %v1394_v18, %v5202_v39  ;;  %v1203_v47 = vpop.f32.mrb[78].mxu1  ;;  %4606 = vtanh.f32 %v1393_v23 }
 0x256   :  { %v6565_v61 = vpop.eup %4582  ;;  %v1396_v5 = vpop.f32.mrb[110].mxu0  ;;  %v1789_v0 = vpack.c.bf16 %v6561_v50, %v6537_v46  ;;  %v1204_v30 = vadd.f32 %v1203_v47, %v5193_v36  ;;  %4608 = vtanh.f32 %v1202_v13  ;;  %2569 = vmatmul.mubr.bf16.gmra.mrb[184].mxu1 %v1889_v20  ;;  %2730 = vmatmul.mubr.bf16.gmra.mrb[216].mxu0 %v1891_v15 }
 0x257   :  { %v6571_v29 = vpop.eup %4584  ;;  %v1205_v22 = vpop.f32.mrb[79].mxu1  ;;  %v1791_v45 = vpack.c.bf16 %v6565_v61, %v6548_v62  ;;  %v1397_v7 = vadd.f32 %v1396_v5, %v5199_v38  ;;  %4610 = vtanh.f32 %v1395_v9  ;;  %2576 = vmatprep.mubr.bf16.mxu1 %v1898_v52  ;;  %2737 = vmatprep.mubr.bf16.mxu0 %v1900_v33 }
 0x258   :  { %v1398_v28 = vpop.f32.mrb[111].mxu0  ;;  %v6576_v27 = vpop.eup %4586  ;;  %v1790_v56 = vpack.c.bf16 %v6571_v29, %v6557_v59  ;;  %v1206_v1 = vadd.f32 %v1205_v22, %v5196_v37  ;;  %4612 = vtanh.f32 %v1204_v30 }
 0x259   :  { %v6581_v55 = vpop.eup %4588  ;;  %v1792_v42 = vpack.c.bf16 %v6576_v27, %v6559_v40  ;;  %v1399_v63 = vadd.f32 %v1398_v28, %v5202_v39  ;;  %4614 = vtanh.f32 %v1397_v7  ;;  %v1209_v31 = vpop.f32.mrb[80].mxu1 }
 0x25a   :  { %v6592_v19 = vpop.eup %4590  ;;  %v1402_v21 = vpop.f32.mrb[112].mxu0  ;;  %4616 = vtanh.f32 %v1206_v1  ;;  %v1210_v15 = vadd.f32 %v1209_v31, %v5193_v36 }
 0x25b   :  { %v6601_v53 = vpop.eup %4592  ;;  %v1403_v54 = vadd.f32 %v1402_v21, %v5199_v38  ;;  %v1211_v10 = vpop.f32.mrb[81].mxu1  ;;  %4618 = vtanh.f32 %v1399_v63 }
 0x25c   :  { %v6603_v4 = vpop.eup %4594  ;;  %v1404_v52 = vpop.f32.mrb[113].mxu0  ;;  %v1212_v3 = vadd.f32 %v1211_v10, %v5196_v37  ;;  %4620 = vtanh.f32 %v1210_v15 }
 0x25d   :  { %v6605_v20 = vpop.eup %4596  ;;  %v1405_v16 = vadd.f32 %v1404_v52, %v5202_v39  ;;  %v1213_v33 = vpop.f32.mrb[82].mxu1  ;;  %4622 = vtanh.f32 %v1403_v54 }
 0x25e   :  { %v6609_v24 = vpop.eup %4598  ;;  %v1406_v41 = vpop.f32.mrb[114].mxu0  ;;  %v1797_v51 = vpack.c.bf16 %v6605_v20, %v6581_v55  ;;  %v1214_v12 = vadd.f32 %v1213_v33, %v5193_v36  ;;  %4624 = vtanh.f32 %v1212_v3  ;;  %2577 = vmatmul.mubr.bf16.gmra.mrb[188].mxu1 %v1897_v6  ;;  %2738 = vmatmul.mubr.bf16.gmra.mrb[220].mxu0 %v1899_v60 }
 0x25f   :  { %v6615_v23 = vpop.eup %4600  ;;  %v1215_v18 = vpop.f32.mrb[83].mxu1  ;;  %v1799_v9 = vpack.c.bf16 %v6609_v24, %v6592_v19  ;;  %v1407_v5 = vadd.f32 %v1406_v41, %v5199_v38  ;;  %4626 = vtanh.f32 %v1405_v16  ;;  %2778 = vmatprep.mubr.bf16.mxu1 %v1782_v48  ;;  %2939 = vmatprep.mubr.bf16.mxu0 %v1784_v17 }
 0x260   :  { %v1408_v13 = vpop.f32.mrb[115].mxu0  ;;  %v6620_v47 = vpop.eup %4602  ;;  %v1798_v30 = vpack.c.bf16 %v6615_v23, %v6601_v53  ;;  %v1216_v28 = vadd.f32 %v1215_v18, %v5196_v37  ;;  %4628 = vtanh.f32 %v1214_v12 }
 0x261   :  { %v6625_v22 = vpop.eup %4604  ;;  %v1800_v7 = vpack.c.bf16 %v6620_v47, %v6603_v4  ;;  %v1409_v63 = vadd.f32 %v1408_v13, %v5202_v39  ;;  %4630 = vtanh.f32 %v1407_v5  ;;  %v1219_v11 = vpop.f32.mrb[84].mxu1 }
 0x262   :  { %v6636_v1 = vpop.eup %4606  ;;  %v1412_v32 = vpop.f32.mrb[116].mxu0  ;;  %4632 = vtanh.f32 %v1216_v28  ;;  %v1220_v60 = vadd.f32 %v1219_v11, %v5193_v36 }
 0x263   :  { %v6645_v57 = vpop.eup %4608  ;;  %v1413_v34 = vadd.f32 %v1412_v32, %v5199_v38  ;;  %v1221_v2 = vpop.f32.mrb[85].mxu1  ;;  %4634 = vtanh.f32 %v1409_v63 }
 0x264   :  { %v6647_v44 = vpop.eup %4610  ;;  %v1414_v48 = vpop.f32.mrb[117].mxu0  ;;  %v1222_v26 = vadd.f32 %v1221_v2, %v5196_v37  ;;  %4636 = vtanh.f32 %v1220_v60 }
 0x265   :  { %v6649_v6 = vpop.eup %4612  ;;  %v1415_v35 = vadd.f32 %v1414_v48, %v5202_v39  ;;  %v1223_v17 = vpop.f32.mrb[86].mxu1  ;;  %4638 = vtanh.f32 %v1413_v34 }
 0x266   :  { %v6653_v31 = vpop.eup %4614  ;;  %v1416_v21 = vpop.f32.mrb[118].mxu0  ;;  %v1805_v15 = vpack.c.bf16 %v6649_v6, %v6625_v22  ;;  %v1224_v10 = vadd.f32 %v1223_v17, %v5193_v36  ;;  %4640 = vtanh.f32 %v1222_v26  ;;  %2779 = vmatmul.mubr.bf16.vlgmr.msra.gmra.mrb[192].mxu1 %v1781_v25  ;;  %2940 = vmatmul.mubr.bf16.vlgmr.msra.gmra.mrb[224].mxu0 %v1783_v58 }
 0x267   :  { %v6659_v54 = vpop.eup %4616  ;;  %v1225_v52 = vpop.f32.mrb[87].mxu1  ;;  %v1807_v16 = vpack.c.bf16 %v6653_v31, %v6636_v1  ;;  %v1417_v41 = vadd.f32 %v1416_v21, %v5199_v38  ;;  %4642 = vtanh.f32 %v1415_v35  ;;  %2786 = vmatprep.mubr.bf16.mxu1 %v1790_v56  ;;  %2947 = vmatprep.mubr.bf16.mxu0 %v1792_v42 }
 0x268   :  { %v1418_v3 = vpop.f32.mrb[119].mxu0  ;;  %v6664_v33 = vpop.eup %4618  ;;  %v1806_v12 = vpack.c.bf16 %v6659_v54, %v6645_v57  ;;  %v1226_v13 = vadd.f32 %v1225_v52, %v5196_v37  ;;  %4644 = vtanh.f32 %v1224_v10 }
 0x269   :  { %v6669_v18 = vpop.eup %4620  ;;  %v1808_v5 = vpack.c.bf16 %v6664_v33, %v6647_v44  ;;  %v1419_v63 = vadd.f32 %v1418_v3, %v5202_v39  ;;  %4646 = vtanh.f32 %v1417_v41  ;;  %v1229_v14 = vpop.f32.mrb[88].mxu1 }
 0x26a   :  { %v6680_v28 = vpop.eup %4622  ;;  %v1422_v49 = vpop.f32.mrb[120].mxu0  ;;  %4648 = vtanh.f32 %v1226_v13  ;;  %v1230_v58 = vadd.f32 %v1229_v14, %v5193_v36 }
 0x26b   :  { %v6689_v43 = vpop.eup %4624  ;;  %v1423_v59 = vadd.f32 %v1422_v49, %v5199_v38  ;;  %v1231_v29 = vpop.f32.mrb[89].mxu1  ;;  %4650 = vtanh.f32 %v1419_v63 }
 0x26c   :  { %v6691_v8 = vpop.eup %4626  ;;  %v1424_v56 = vpop.f32.mrb[121].mxu0  ;;  %v1232_v40 = vadd.f32 %v1231_v29, %v5196_v37  ;;  %4652 = vtanh.f32 %v1230_v58 }
 0x26d   :  { %v6693_v25 = vpop.eup %4628  ;;  %v1425_v27 = vadd.f32 %v1424_v56, %v5202_v39  ;;  %v1233_v42 = vpop.f32.mrb[90].mxu1  ;;  %4654 = vtanh.f32 %v1423_v59 }
 0x26e   :  { %v6697_v11 = vpop.eup %4630  ;;  %v1426_v32 = vpop.f32.mrb[122].mxu0  ;;  %v1813_v60 = vpack.c.bf16 %v6693_v25, %v6669_v18  ;;  %v1234_v2 = vadd.f32 %v1233_v42, %v5193_v36  ;;  %4656 = vtanh.f32 %v1232_v40  ;;  %2787 = vmatmul.mubr.bf16.gmra.mrb[196].mxu1 %v1789_v0  ;;  %2948 = vmatmul.mubr.bf16.gmra.mrb[228].mxu0 %v1791_v45 }
 0x26f   :  { %v6703_v34 = vpop.eup %4632  ;;  %v1235_v48 = vpop.f32.mrb[91].mxu1  ;;  %v1815_v35 = vpack.c.bf16 %v6697_v11, %v6680_v28  ;;  %v1427_v21 = vadd.f32 %v1426_v32, %v5199_v38  ;;  %4658 = vtanh.f32 %v1425_v27  ;;  %2794 = vmatprep.mubr.bf16.mxu1 %v1798_v30  ;;  %2955 = vmatprep.mubr.bf16.mxu0 %v1800_v7 }
 0x270   :  { %v1428_v26 = vpop.f32.mrb[123].mxu0  ;;  %v6708_v17 = vpop.eup %4634  ;;  %v1814_v10 = vpack.c.bf16 %v6703_v34, %v6689_v43  ;;  %v1236_v3 = vadd.f32 %v1235_v48, %v5196_v37  ;;  %4660 = vtanh.f32 %v1234_v2 }
 0x271   :  { %v6713_v52 = vpop.eup %4636  ;;  %v1816_v41 = vpack.c.bf16 %v6708_v17, %v6691_v8  ;;  %v1429_v63 = vadd.f32 %v1428_v26, %v5202_v39  ;;  %4662 = vtanh.f32 %v1427_v21  ;;  %v1239_v50 = vpop.f32.mrb[92].mxu1 }
 0x272   :  { %v6724_v13 = vpop.eup %4638  ;;  %v1432_v61 = vpop.f32.mrb[124].mxu0  ;;  %4664 = vtanh.f32 %v1236_v3  ;;  %v1240_v45 = vadd.f32 %v1239_v50, %v5193_v36 }
 0x273   :  { %v6733_v46 = vpop.eup %4640  ;;  %v1433_v53 = vadd.f32 %v1432_v61, %v5199_v38  ;;  %v1241_v23 = vpop.f32.mrb[93].mxu1  ;;  %4666 = vtanh.f32 %v1429_v63 }
 0x274   :  { %v6735_v62 = vpop.eup %4642  ;;  %v1434_v30 = vpop.f32.mrb[125].mxu0  ;;  %v1242_v4 = vadd.f32 %v1241_v23, %v5196_v37  ;;  %4668 = vtanh.f32 %v1240_v45 }
 0x275   :  { %v6737_v0 = vpop.eup %4644  ;;  %v1435_v47 = vadd.f32 %v1434_v30, %v5202_v39  ;;  %v1243_v7 = vpop.f32.mrb[94].mxu1  ;;  %4670 = vtanh.f32 %v1433_v53 }
 0x276   :  { %v6741_v14 = vpop.eup %4646  ;;  %v1436_v49 = vpop.f32.mrb[126].mxu0  ;;  %v1821_v58 = vpack.c.bf16 %v6737_v0, %v6713_v52  ;;  %v1244_v29 = vadd.f32 %v1243_v7, %v5193_v36  ;;  %4672 = vtanh.f32 %v1242_v4  ;;  %2795 = vmatmul.mubr.bf16.gmra.mrb[200].mxu1 %v1797_v51  ;;  %2956 = vmatmul.mubr.bf16.gmra.mrb[232].mxu0 %v1799_v9 }
 0x277   :  { %v6747_v59 = vpop.eup %4648  ;;  %v1245_v56 = vpop.f32.mrb[95].mxu1  ;;  %v1823_v27 = vpack.c.bf16 %v6741_v14, %v6724_v13  ;;  %v1437_v32 = vadd.f32 %v1436_v49, %v5199_v38  ;;  %4674 = vtanh.f32 %v1435_v47  ;;  %2802 = vmatprep.mubr.bf16.mxu1 %v1806_v12  ;;  %2963 = vmatprep.mubr.bf16.mxu0 %v1808_v5 }
 0x278   :  { %v1438_v40 = vpop.f32.mrb[127].mxu0  ;;  %v6752_v42 = vpop.eup %4650  ;;  %v1822_v2 = vpack.c.bf16 %v6747_v59, %v6733_v46  ;;  %v1246_v26 = vadd.f32 %v1245_v56, %v5196_v37  ;;  %4676 = vtanh.f32 %v1244_v29 }
 0x279   :  { %v6757_v48 = vpop.eup %4652  ;;  %v1824_v21 = vpack.c.bf16 %v6752_v42, %v6735_v62  ;;  %v1439_v63 = vadd.f32 %v1438_v40, %v5202_v39  ;;  %4678 = vtanh.f32 %v1437_v32  ;;  %v1249_v20 = vpop.f32.mrb[96].mxu1 }
 0x27a   :  { %v6768_v3 = vpop.eup %4654  ;;  %v1442_v24 = vpop.f32.mrb[128].mxu0  ;;  %4680 = vtanh.f32 %v1246_v26  ;;  %v1250_v9 = vadd.f32 %v1249_v20, %v5193_v36 }
 0x27b   :  { %v6777_v55 = vpop.eup %4656  ;;  %v1443_v57 = vadd.f32 %v1442_v24, %v5199_v38  ;;  %v1251_v54 = vpop.f32.mrb[97].mxu1  ;;  %4682 = vtanh.f32 %v1439_v63 }
 0x27c   :  { %v6779_v19 = vpop.eup %4658  ;;  %v1444_v12 = vpop.f32.mrb[129].mxu0  ;;  %v1252_v44 = vadd.f32 %v1251_v54, %v5196_v37  ;;  %4684 = vtanh.f32 %v1250_v9 }
 0x27d   :  { %v6781_v51 = vpop.eup %4660  ;;  %v1445_v33 = vadd.f32 %v1444_v12, %v5202_v39  ;;  %v1253_v5 = vpop.f32.mrb[98].mxu1  ;;  %4686 = vtanh.f32 %v1443_v57 }
 0x27e   :  { %v6785_v50 = vpop.eup %4662  ;;  %v1446_v61 = vpop.f32.mrb[130].mxu0  ;;  %v1829_v45 = vpack.c.bf16 %v6781_v51, %v6757_v48  ;;  %v1254_v23 = vadd.f32 %v1253_v5, %v5193_v36  ;;  %4688 = vtanh.f32 %v1252_v44  ;;  %2803 = vmatmul.mubr.bf16.gmra.mrb[204].mxu1 %v1805_v15  ;;  %2964 = vmatmul.mubr.bf16.gmra.mrb[236].mxu0 %v1807_v16 }
 0x27f   :  { %v6791_v53 = vpop.eup %4664  ;;  %v1255_v30 = vpop.f32.mrb[99].mxu1  ;;  %v1831_v47 = vpack.c.bf16 %v6785_v50, %v6768_v3  ;;  %v1447_v49 = vadd.f32 %v1446_v61, %v5199_v38  ;;  %4690 = vtanh.f32 %v1445_v33  ;;  %2810 = vmatprep.mubr.bf16.mxu1 %v1814_v10  ;;  %2971 = vmatprep.mubr.bf16.mxu0 %v1816_v41 }
 0x280   :  { %v1448_v4 = vpop.f32.mrb[131].mxu0  ;;  %v6796_v7 = vpop.eup %4666  ;;  %v1830_v29 = vpack.c.bf16 %v6791_v53, %v6777_v55  ;;  %v1256_v40 = vadd.f32 %v1255_v30, %v5196_v37  ;;  %4692 = vtanh.f32 %v1254_v23 }
 0x281   :  { %v6801_v56 = vpop.eup %4668  ;;  %v1832_v32 = vpack.c.bf16 %v6796_v7, %v6779_v19  ;;  %v1449_v63 = vadd.f32 %v1448_v4, %v5202_v39  ;;  %4694 = vtanh.f32 %v1447_v49  ;;  %v1259_v6 = vpop.f32.mrb[100].mxu1 }
 0x282   :  { %v6812_v26 = vpop.eup %4670  ;;  %v1452_v31 = vpop.f32.mrb[132].mxu0  ;;  %4696 = vtanh.f32 %v1256_v40  ;;  %v1260_v16 = vadd.f32 %v1259_v6, %v5193_v36 }
 0x283   :  { %v6821_v22 = vpop.eup %4672  ;;  %v1453_v43 = vadd.f32 %v1452_v31, %v5199_v38  ;;  %v1261_v34 = vpop.f32.mrb[101].mxu1  ;;  %4698 = vtanh.f32 %v1449_v63 }
 0x284   :  { %v6823_v1 = vpop.eup %4674  ;;  %v1454_v10 = vpop.f32.mrb[133].mxu0  ;;  %v1262_v8 = vadd.f32 %v1261_v34, %v5196_v37  ;;  %4700 = vtanh.f32 %v1260_v16 }
 0x285   :  { %v6825_v15 = vpop.eup %4676  ;;  %v1455_v17 = vadd.f32 %v1454_v10, %v5202_v39  ;;  %v1263_v41 = vpop.f32.mrb[102].mxu1  ;;  %4702 = vtanh.f32 %v1453_v43 }
 0x286   :  { %v6829_v20 = vpop.eup %4678  ;;  %v1456_v24 = vpop.f32.mrb[134].mxu0  ;;  %v1837_v9 = vpack.c.bf16 %v6825_v15, %v6801_v56  ;;  %v1264_v54 = vadd.f32 %v1263_v41, %v5193_v36  ;;  %4704 = vtanh.f32 %v1262_v8  ;;  %2811 = vmatmul.mubr.bf16.gmra.mrb[208].mxu1 %v1813_v60  ;;  %2972 = vmatmul.mubr.bf16.gmra.mrb[240].mxu0 %v1815_v35 }
 0x287   :  { %v6835_v57 = vpop.eup %4680  ;;  %v1265_v12 = vpop.f32.mrb[103].mxu1  ;;  %v1839_v33 = vpack.c.bf16 %v6829_v20, %v6812_v26  ;;  %v1457_v61 = vadd.f32 %v1456_v24, %v5199_v38  ;;  %4706 = vtanh.f32 %v1455_v17  ;;  %2818 = vmatprep.mubr.bf16.mxu1 %v1822_v2  ;;  %2979 = vmatprep.mubr.bf16.mxu0 %v1824_v21 }
 0x288   :  { %v1458_v44 = vpop.f32.mrb[135].mxu0  ;;  %v6840_v5 = vpop.eup %4682  ;;  %v1838_v23 = vpack.c.bf16 %v6835_v57, %v6821_v22  ;;  %v1266_v4 = vadd.f32 %v1265_v12, %v5196_v37  ;;  %4708 = vtanh.f32 %v1264_v54 }
 0x289   :  { %v6845_v30 = vpop.eup %4684  ;;  %v1840_v49 = vpack.c.bf16 %v6840_v5, %v6823_v1  ;;  %v1459_v63 = vadd.f32 %v1458_v44, %v5202_v39  ;;  %4710 = vtanh.f32 %v1457_v61  ;;  %v1269_v25 = vpop.f32.mrb[104].mxu1 }
 0x28a   :  { %v6856_v40 = vpop.eup %4686  ;;  %v1462_v11 = vpop.f32.mrb[136].mxu0  ;;  %4712 = vtanh.f32 %v1266_v4  ;;  %v1270_v35 = vadd.f32 %v1269_v25, %v5193_v36 }
 0x28b   :  { %v6865_v18 = vpop.eup %4688  ;;  %v1463_v46 = vadd.f32 %v1462_v11, %v5199_v38  ;;  %v1271_v59 = vpop.f32.mrb[105].mxu1  ;;  %4714 = vtanh.f32 %v1459_v63 }
 0x28c   :  { %v6867_v28 = vpop.eup %4690  ;;  %v1464_v2 = vpop.f32.mrb[137].mxu0  ;;  %v1272_v62 = vadd.f32 %v1271_v59, %v5196_v37  ;;  %4716 = vtanh.f32 %v1270_v35 }
 0x28d   :  { %v6869_v60 = vpop.eup %4692  ;;  %v1465_v42 = vadd.f32 %v1464_v2, %v5202_v39  ;;  %v1273_v21 = vpop.f32.mrb[106].mxu1  ;;  %4718 = vtanh.f32 %v1463_v46  ;;  %v4296_v46 = vld [vmem:[%s7541_s7] sm:$0xff]  }
 0x28e   :  { %v6873_v6 = vpop.eup %4694  ;;  %v1466_v31 = vpop.f32.mrb[138].mxu0  ;;  %v1845_v16 = vpack.c.bf16 %v6869_v60, %v6845_v30  ;;  %v1274_v10 = vadd.f32 %v1273_v21, %v5193_v36  ;;  %4720 = vtanh.f32 %v1272_v62  ;;  %2819 = vmatmul.mubr.bf16.gmra.mrb[212].mxu1 %v1821_v58  ;;  %2980 = vmatmul.mubr.bf16.gmra.mrb[244].mxu0 %v1823_v27 }
 0x28f   :  { %v6879_v43 = vpop.eup %4696  ;;  %v1847_v34 = vpack.c.bf16 %v6873_v6, %v6856_v40  ;;  %v1275_v8 = vpop.f32.mrb[107].mxu1  ;;  %v1467_v24 = vadd.f32 %v1466_v31, %v5199_v38  ;;  %4722 = vtanh.f32 %v1465_v42  ;;  %2826 = vmatprep.mubr.bf16.mxu1 %v1830_v29  ;;  %2987 = vmatprep.mubr.bf16.mxu0 %v1832_v32 }
 0x290   :  { %v1468_v17 = vpop.f32.mrb[139].mxu0  ;;  %v6884_v41 = vpop.eup %4698  ;;  %v1846_v54 = vpack.c.bf16 %v6879_v43, %v6865_v18  ;;  %v1276_v44 = vadd.f32 %v1275_v8, %v5196_v37  ;;  %4724 = vtanh.f32 %v1274_v10  ;;  %4187 = vmatprep.subr.bf16.mxu1 %v4296_v46 }
 0x291   :  { %v6889_v12 = vpop.eup %4700  ;;  %v1848_v61 = vpack.c.bf16 %v6884_v41, %v6867_v28  ;;  %v1469_v63 = vadd.f32 %v1468_v17, %v5202_v39  ;;  %4726 = vtanh.f32 %v1467_v24  ;;  %v1279_v0 = vpop.f32.mrb[108].mxu1  ;;  %4188 = vmatpush3.bf16.msra.mxu1 %v4296_v46 }
 0x292   :  { %v6900_v4 = vpop.eup %4702  ;;  %v1472_v14 = vpop.f32.mrb[140].mxu0  ;;  %4728 = vtanh.f32 %v1276_v44  ;;  %v1280_v27 = vadd.f32 %v1279_v0, %v5193_v36 }
 0x293   :  { %v6909_v52 = vpop.eup %4704  ;;  %v1473_v55 = vadd.f32 %v1472_v14, %v5199_v38  ;;  %v1281_v53 = vpop.f32.mrb[109].mxu1  ;;  %4730 = vtanh.f32 %v1469_v63 }
 0x294   :  { %v6911_v13 = vpop.eup %4706  ;;  %v1474_v29 = vpop.f32.mrb[141].mxu0  ;;  %v1282_v19 = vadd.f32 %v1281_v53, %v5196_v37  ;;  %4732 = vtanh.f32 %v1280_v27 }
 0x295   :  { %v6913_v58 = vpop.eup %4708  ;;  %v1475_v7 = vadd.f32 %v1474_v29, %v5202_v39  ;;  %v1283_v32 = vpop.f32.mrb[110].mxu1  ;;  %4734 = vtanh.f32 %v1473_v55 }
 0x296   :  { %v6917_v25 = vpop.eup %4710  ;;  %v1476_v11 = vpop.f32.mrb[142].mxu0  ;;  %v1853_v35 = vpack.c.bf16 %v6913_v58, %v6889_v12  ;;  %v1284_v62 = vadd.f32 %v1283_v32, %v5193_v36  ;;  %4736 = vtanh.f32 %v1282_v19  ;;  %2827 = vmatmul.mubr.bf16.gmra.mrb[216].mxu1 %v1829_v45  ;;  %2988 = vmatmul.mubr.bf16.gmra.mrb[248].mxu0 %v1831_v47 }
 0x297   :  { %v6926_v59 = vpop.eup %4712  ;;  %v1855_v2 = vpack.c.bf16 %v6917_v25, %v6900_v4  ;;  %v1285_v42 = vpop.f32.mrb[111].mxu1  ;;  %v1477_v10 = vadd.f32 %v1476_v11, %v5199_v38  ;;  %4738 = vtanh.f32 %v1475_v7  ;;  %2834 = vmatprep.mubr.bf16.mxu1 %v1838_v23  ;;  %2995 = vmatprep.mubr.bf16.mxu0 %v1840_v49 }
 0x298   :  { %v1478_v21 = vpop.f32.mrb[143].mxu0  ;;  %v6931_v31 = vpop.eup %4714  ;;  %v1854_v8 = vpack.c.bf16 %v6926_v59, %v6909_v52  ;;  %v1286_v24 = vadd.f32 %v1285_v42, %v5196_v37  ;;  %4740 = vtanh.f32 %v1284_v62 }
 0x299   :  { %v6936_v17 = vpop.eup %4716  ;;  %v1856_v44 = vpack.c.bf16 %v6931_v31, %v6911_v13  ;;  %v1479_v0 = vadd.f32 %v1478_v21, %v5202_v39  ;;  %4742 = vtanh.f32 %v1477_v10  ;;  %v1289_v51 = vpop.f32.mrb[112].mxu1 }
 0x29a   :  { %v6947_v63 = vpop.eup %4718  ;;  %v1482_v50 = vpop.f32.mrb[144].mxu0  ;;  %4744 = vtanh.f32 %v1286_v24  ;;  %v1290_v47 = vadd.f32 %v1289_v51, %v5193_v36 }
 0x29b   :  { %v6956_v48 = vpop.eup %4720  ;;  %v1483_v22 = vadd.f32 %v1482_v50, %v5199_v38  ;;  %v1291_v57 = vpop.f32.mrb[113].mxu1  ;;  %4746 = vtanh.f32 %v1479_v0 }
 0x29c   :  { %v6958_v3 = vpop.eup %4722  ;;  %v1484_v23 = vpop.f32.mrb[145].mxu0  ;;  %v1292_v5 = vadd.f32 %v1291_v57, %v5196_v37  ;;  %4748 = vtanh.f32 %v1290_v47 }
 0x29d   :  { %v6960_v45 = vpop.eup %4724  ;;  %v1485_v49 = vadd.f32 %v1484_v23, %v5202_v39  ;;  %v1293_v14 = vpop.f32.mrb[114].mxu1  ;;  %4750 = vtanh.f32 %v1483_v22 }
 0x29e   :  { %v6964_v1 = vpop.eup %4726  ;;  %v1486_v27 = vpop.f32.mrb[146].mxu0  ;;  %v1861_v55 = vpack.c.bf16 %v6960_v45, %v6936_v17  ;;  %v1294_v19 = vadd.f32 %v1293_v14, %v5193_v36  ;;  %4752 = vtanh.f32 %v1292_v5  ;;  %2835 = vmatmul.mubr.bf16.gmra.mrb[220].mxu1 %v1837_v9  ;;  %2996 = vmatmul.mubr.bf16.gmra.mrb[252].mxu0 %v1839_v33 }
 0x29f   :  { %v6970_v53 = vpop.eup %4728  ;;  %v1863_v29 = vpack.c.bf16 %v6964_v1, %v6947_v63  ;;  %v1295_v7 = vpop.f32.mrb[115].mxu1  ;;  %v1487_v46 = vadd.f32 %v1486_v27, %v5199_v38  ;;  %4754 = vtanh.f32 %v1485_v49  ;;  %2842 = vmatprep.mubr.bf16.mxu1 %v1846_v54  ;;  %3003 = vmatprep.mubr.bf16.mxu0 %v1848_v61 }
 0x2a0   :  { %v1488_v32 = vpop.f32.mrb[147].mxu0  ;;  %v6975_v11 = vpop.eup %4730  ;;  %v1862_v62 = vpack.c.bf16 %v6970_v53, %v6956_v48  ;;  %v1296_v21 = vadd.f32 %v1295_v7, %v5196_v37  ;;  %4756 = vtanh.f32 %v1294_v19 }
 0x2a1   :  { %v6980_v42 = vpop.eup %4732  ;;  %v1864_v10 = vpack.c.bf16 %v6975_v11, %v6958_v3  ;;  %v1489_v0 = vadd.f32 %v1488_v32, %v5202_v39  ;;  %4758 = vtanh.f32 %v1487_v46  ;;  %v1299_v15 = vpop.f32.mrb[116].mxu1 }
 0x2a2   :  { %v6991_v24 = vpop.eup %4734  ;;  %v1492_v20 = vpop.f32.mrb[148].mxu0  ;;  %4760 = vtanh.f32 %v1296_v21  ;;  %v1300_v33 = vadd.f32 %v1299_v15, %v5193_v36 }
 0x2a3   :  { %v7000_v56 = vpop.eup %4736  ;;  %v1493_v18 = vadd.f32 %v1492_v20, %v5199_v38  ;;  %v1301_v43 = vpop.f32.mrb[117].mxu1  ;;  %4762 = vtanh.f32 %v1489_v0 }
 0x2a4   :  { %v7002_v26 = vpop.eup %4738  ;;  %v1494_v54 = vpop.f32.mrb[149].mxu0  ;;  %v1302_v28 = vadd.f32 %v1301_v43, %v5196_v37  ;;  %4764 = vtanh.f32 %v1300_v33 }
 0x2a5   :  { %v7004_v9 = vpop.eup %4740  ;;  %v1495_v41 = vadd.f32 %v1494_v54, %v5202_v39  ;;  %v1303_v61 = vpop.f32.mrb[118].mxu1  ;;  %4766 = vtanh.f32 %v1493_v18 }
 0x2a6   :  { %v7008_v51 = vpop.eup %4742  ;;  %v1496_v50 = vpop.f32.mrb[150].mxu0  ;;  %v1869_v47 = vpack.c.bf16 %v7004_v9, %v6980_v42  ;;  %v1304_v23 = vadd.f32 %v1303_v61, %v5193_v36  ;;  %4768 = vtanh.f32 %v1302_v28  ;;  %2843 = vmatmul.mubr.bf16.gmra.mrb[224].mxu1 %v1845_v16  ;;  %3004 = vmatmul.mubr.bf16.gmra.mrb[0].mxu0 %v1847_v34 }
 0x2a7   :  { %v7014_v22 = vpop.eup %4744  ;;  %v1871_v57 = vpack.c.bf16 %v7008_v51, %v6991_v24  ;;  %v1305_v5 = vpop.f32.mrb[119].mxu1  ;;  %v1497_v27 = vadd.f32 %v1496_v50, %v5199_v38  ;;  %4770 = vtanh.f32 %v1495_v41  ;;  %2850 = vmatprep.mubr.bf16.mxu1 %v1854_v8  ;;  %3011 = vmatprep.mubr.bf16.mxu0 %v1856_v44 }
 0x2a8   :  { %v1498_v49 = vpop.f32.mrb[151].mxu0  ;;  %v7019_v14 = vpop.eup %4746  ;;  %v1870_v19 = vpack.c.bf16 %v7014_v22, %v7000_v56  ;;  %v1306_v32 = vadd.f32 %v1305_v5, %v5196_v37  ;;  %4772 = vtanh.f32 %v1304_v23 }
 0x2a9   :  { %v7024_v7 = vpop.eup %4748  ;;  %v1872_v46 = vpack.c.bf16 %v7019_v14, %v7002_v26  ;;  %v1499_v0 = vadd.f32 %v1498_v49, %v5202_v39  ;;  %4774 = vtanh.f32 %v1497_v27  ;;  %v1309_v60 = vpop.f32.mrb[120].mxu1 }
 0x2aa   :  { %v7035_v21 = vpop.eup %4750  ;;  %v1502_v6 = vpop.f32.mrb[152].mxu0  ;;  %4776 = vtanh.f32 %v1306_v32  ;;  %v1310_v34 = vadd.f32 %v1309_v60, %v5193_v36 }
 0x2ab   :  { %v7044_v30 = vpop.eup %4752  ;;  %v1503_v52 = vadd.f32 %v1502_v6, %v5199_v38  ;;  %v1311_v59 = vpop.f32.mrb[121].mxu1  ;;  %4778 = vtanh.f32 %v1499_v0 }
 0x2ac   :  { %v7046_v40 = vpop.eup %4754  ;;  %v1504_v8 = vpop.f32.mrb[153].mxu0  ;;  %v1312_v13 = vadd.f32 %v1311_v59, %v5196_v37  ;;  %4780 = vtanh.f32 %v1310_v34 }
 0x2ad   :  { %v7048_v16 = vpop.eup %4756  ;;  %v1505_v31 = vadd.f32 %v1504_v8, %v5202_v39  ;;  %v1313_v44 = vpop.f32.mrb[122].mxu1  ;;  %4782 = vtanh.f32 %v1503_v52 }
 0x2ae   :  { %v7052_v15 = vpop.eup %4758  ;;  %v1506_v20 = vpop.f32.mrb[154].mxu0  ;;  %v1877_v33 = vpack.c.bf16 %v7048_v16, %v7024_v7  ;;  %v1314_v54 = vadd.f32 %v1313_v44, %v5193_v36  ;;  %4784 = vtanh.f32 %v1312_v13  ;;  %2851 = vmatmul.mubr.bf16.gmra.mrb[228].mxu1 %v1853_v35  ;;  %3012 = vmatmul.mubr.bf16.gmra.mrb[4].mxu0 %v1855_v2  ;;  %v4297_v35 = vld [vmem:[%s7541_s7 + $0x8] sm:$0xff]  }
 0x2af   :  { %v7058_v18 = vpop.eup %4760  ;;  %v1879_v43 = vpack.c.bf16 %v7052_v15, %v7035_v21  ;;  %v1315_v28 = vpop.f32.mrb[123].mxu1  ;;  %v1507_v50 = vadd.f32 %v1506_v20, %v5199_v38  ;;  %4786 = vtanh.f32 %v1505_v31  ;;  %2858 = vmatprep.mubr.bf16.mxu1 %v1862_v62  ;;  %3019 = vmatprep.mubr.bf16.mxu0 %v1864_v10 }
 0x2b0   :  { %v1508_v41 = vpop.f32.mrb[155].mxu0  ;;  %v7063_v61 = vpop.eup %4762  ;;  %v1878_v23 = vpack.c.bf16 %v7058_v18, %v7044_v30  ;;  %v1316_v49 = vadd.f32 %v1315_v28, %v5196_v37  ;;  %4788 = vtanh.f32 %v1314_v54  ;;  %4189 = vmatprep.subr.bf16.mxu1 %v4297_v35 }
 0x2b1   :  { %v7068_v5 = vpop.eup %4764  ;;  %v1880_v27 = vpack.c.bf16 %v7063_v61, %v7046_v40  ;;  %v1509_v0 = vadd.f32 %v1508_v41, %v5202_v39  ;;  %4790 = vtanh.f32 %v1507_v50  ;;  %v1319_v58 = vpop.f32.mrb[124].mxu1  ;;  %4190 = vmatpush3.bf16.msra.mxu1 %v4297_v35 }
 0x2b2   :  { %v7079_v32 = vpop.eup %4766  ;;  %v1512_v25 = vpop.f32.mrb[156].mxu0  ;;  %4792 = vtanh.f32 %v1316_v49  ;;  %v1320_v48 = vadd.f32 %v1319_v58, %v5193_v36 }
 0x2b3   :  { %v7088_v12 = vpop.eup %4768  ;;  %v1513_v3 = vadd.f32 %v1512_v25, %v5199_v38  ;;  %v1321_v53 = vpop.f32.mrb[125].mxu1  ;;  %4794 = vtanh.f32 %v1509_v0 }
 0x2b4   :  { %v7090_v4 = vpop.eup %4770  ;;  %v1514_v11 = vpop.f32.mrb[157].mxu0  ;;  %v1322_v10 = vadd.f32 %v1321_v53, %v5196_v37  ;;  %4796 = vtanh.f32 %v1320_v48 }
 0x2b5   :  { %v7095_v2 = vpop.eup %4772  ;;  %v1515_v60 = vadd.f32 %v1514_v11, %v5202_v39  ;;  %v1323_v6 = vpop.f32.mrb[126].mxu1  ;;  %4798 = vtanh.f32 %v1513_v3 }
 0x2b6   :  { %v7099_v62 = vpop.eup %4774  ;;  %v1516_v34 = vpop.f32.mrb[158].mxu0  ;;  %v1885_v52 = vpack.c.bf16 %v7095_v2, %v7068_v5  ;;  %v1324_v13 = vadd.f32 %v1323_v6, %v5193_v36  ;;  %4800 = vtanh.f32 %v1322_v10  ;;  %2859 = vmatmul.mubr.bf16.gmra.mrb[232].mxu1 %v1861_v55  ;;  %3020 = vmatmul.mubr.bf16.gmra.mrb[8].mxu0 %v1863_v29  ;;  %v4298_v5 = vld [vmem:[%s7541_s7 + $0x10] sm:$0xff]  }
 0x2b7   :  { %v7105_v59 = vpop.eup %4776  ;;  %v1887_v8 = vpack.c.bf16 %v7099_v62, %v7079_v32  ;;  %v1325_v31 = vpop.f32.mrb[127].mxu1  ;;  %v1517_v54 = vadd.f32 %v1516_v34, %v5199_v38  ;;  %4802 = vtanh.f32 %v1515_v60  ;;  %2866 = vmatprep.mubr.bf16.mxu1 %v1870_v19  ;;  %3027 = vmatprep.mubr.bf16.mxu0 %v1872_v46 }
 0x2b8   :  { %v1518_v44 = vpop.f32.mrb[159].mxu0  ;;  %v7110_v20 = vpop.eup %4778  ;;  %v1886_v28 = vpack.c.bf16 %v7105_v59, %v7088_v12  ;;  %v1326_v50 = vadd.f32 %v1325_v31, %v5196_v37  ;;  %4804 = vtanh.f32 %v1324_v13  ;;  %4191 = vmatprep.subr.bf16.mxu1 %v4298_v5 }
 0x2b9   :  { %v7115_v41 = vpop.eup %4780  ;;  %v1888_v36 = vpack.c.bf16 %v7110_v20, %v7090_v4  ;;  %v1519_v49 = vadd.f32 %v1518_v44, %v5202_v39  ;;  %4806 = vtanh.f32 %v1517_v54  ;;  %v3699_v63 = vpop.f32.mrb[128].mxu1  ;;  %v7144_v39 = vld [vmem:[%s7542_s6] ss:$0 sm:$0xff]  ;;  %4192 = vmatpush3.bf16.msra.mxu1 %v4298_v5 }
 0x2ba   :  { %v7126_v38 = vpop.eup %4782  ;;  %v3811_v45 = vpop.f32.mrb[160].mxu0  ;;  %4808 = vtanh.f32 %v1326_v50 }
 0x2bb   :  { %v7135_v37 = vpop.eup %4784  ;;  %v3700_v55 = vpop.f32.mrb[129].mxu1  ;;  %4810 = vtanh.f32 %v1519_v49 }
 0x2bc   :  { %v7137_v17 = vpop.eup %4786  ;;  %v3812_v29 = vpop.f32.mrb[161].mxu0  ;;  %v3701_v26 = vadd.f32 %v3700_v55, %v3699_v63 }
 0x2bd   :  { %v7139_v1 = vpop.eup %4788  ;;  %v3813_v22 = vadd.f32 %v3812_v29, %v3811_v45  ;;  %v3702_v14 = vpop.f32.mrb[130].mxu1 }
 0x2be   :  { %v7146_v56 = vpop.eup %4790  ;;  %v3814_v19 = vpop.f32.mrb[162].mxu0  ;;  %v1893_v46 = vpack.c.bf16 %v7139_v1, %v7115_v41  ;;  %v2459_v3 = vadd.f32 %v3701_v26, %v7144_v39  ;;  %2867 = vmatmul.mubr.bf16.gmra.mrb[236].mxu1 %v1869_v47  ;;  %3028 = vmatmul.mubr.bf16.gmra.mrb[12].mxu0 %v1871_v57 }
 0x2bf   :  { %v7150_v0 = vpop.eup %4792  ;;  %v1895_v58 = vpack.c.bf16 %v7146_v56, %v7126_v38  ;;  %v3703_v25 = vpop.f32.mrb[131].mxu1  ;;  %2874 = vmatprep.mubr.bf16.mxu1 %v1878_v23  ;;  %3035 = vmatprep.mubr.bf16.mxu0 %v1880_v27 }
 0x2c0   :  { %v3815_v35 = vpop.f32.mrb[163].mxu0  ;;  %v7154_v48 = vpop.eup %4794  ;;  %v3704_v53 = vadd.f32 %v3703_v25, %v3702_v14  ;;  %v1894_v10 = vpack.c.bf16 %v7150_v0, %v7135_v37  ;;  %v7171_v13 = vadd.f32 %v3813_v22, %v2459_v3 }
 0x2c1   :  { %v3816_v11 = vadd.f32 %v3815_v35, %v3814_v19  ;;  %v7159_v60 = vpop.eup %4796  ;;  %v1896_v6 = vpack.c.bf16 %v7154_v48, %v7137_v17  ;;  %v3705_v51 = vpop.f32.mrb[132].mxu1 }
 0x2c2   :  { %v7169_v34 = vpop.eup %4798  ;;  %v2462_v31 = vadd.f32 %v3704_v53, %v7144_v39  ;;  %v3817_v47 = vpop.f32.mrb[164].mxu0 }
 0x2c3   :  { %v7180_v42 = vpop.eup %4800  ;;  %v3706_v44 = vpop.f32.mrb[133].mxu1 }
 0x2c4   :  { %v7182_v24 = vpop.eup %4802  ;;  %v7184_v9 = vadd.f32 %v3816_v11, %v2462_v31  ;;  %v3818_v54 = vpop.f32.mrb[165].mxu0  ;;  %v3707_v30 = vadd.f32 %v3706_v44, %v3705_v51 }
 0x2c5   :  { %v7186_v57 = vpop.eup %4804  ;;  %v3819_v18 = vadd.f32 %v3818_v54, %v3817_v47  ;;  %v3708_v23 = vpop.f32.mrb[134].mxu1  ;;  %v4299_v47 = vld [vmem:[%s7541_s7 + $0x18] sm:$0xff]  }
 0x2c6   :  { %v7188_v50 = vpop.eup %4806  ;;  %v3820_v49 = vpop.f32.mrb[166].mxu0  ;;  %v1901_v40 = vpack.c.bf16 %v7186_v57, %v7159_v60  ;;  %v2467_v45 = vadd.f32 %v3707_v30, %v7144_v39  ;;  %2875 = vmatmul.mubr.bf16.gmra.mrb[240].mxu1 %v1877_v33  ;;  %3036 = vmatmul.mubr.bf16.gmra.mrb[16].mxu0 %v1879_v43 }
 0x2c7   :  { %v4809_v61 = vpop.eup %4808  ;;  %v1903_v27 = vpack.c.bf16 %v7188_v50, %v7169_v34  ;;  %v3709_v37 = vpop.f32.mrb[135].mxu1  ;;  %2882 = vmatprep.mubr.bf16.mxu1 %v1886_v28  ;;  %3043 = vmatprep.mubr.bf16.mxu0 %v1888_v36 }
 0x2c8   :  { %v3821_v17 = vpop.f32.mrb[167].mxu0  ;;  %v4811_v63 = vpop.eup %4810  ;;  %v3710_v55 = vadd.f32 %v3709_v37, %v3708_v23  ;;  %v1902_v26 = vpack.c.bf16 %v4809_v61, %v7180_v42  ;;  %v7203_v14 = vadd.f32 %v3819_v18, %v2467_v45  ;;  %4193 = vmatprep.subr.bf16.mxu1 %v4299_v47 }
 0x2c9   :  { %v3822_v29 = vadd.f32 %v3821_v17, %v3820_v49  ;;  %v1904_v22 = vpack.c.bf16 %v4811_v63, %v7182_v24  ;;  %v3711_v16 = vpop.f32.mrb[136].mxu1  ;;  %v3823_v33 = vpop.f32.mrb[168].mxu0  ;;  %4194 = vmatpush3.bf16.msra.mxu1 %v4299_v47 }
 0x2ca   :  { %v2470_v19 = vadd.f32 %v3710_v55, %v7144_v39  ;;  %v3712_v21 = vpop.f32.mrb[137].mxu1  ;;  %v3824_v15 = vpop.f32.mrb[169].mxu0 }
 0x2cb   :  { %v3713_v43 = vadd.f32 %v3712_v21, %v3711_v16  ;;  %v3825_v0 = vadd.f32 %v3824_v15, %v3823_v33  ;;  %v3714_v25 = vpop.f32.mrb[138].mxu1  ;;  %v3826_v35 = vpop.f32.mrb[170].mxu0 }
 0x2cc   :  { %v7212_v7 = vadd.f32 %v3822_v29, %v2470_v19  ;;  %v3715_v48 = vpop.f32.mrb[139].mxu1  ;;  %v3827_v3 = vpop.f32.mrb[171].mxu0 }
 0x2cd   :  { %v2475_v53 = vadd.f32 %v3713_v43, %v7144_v39  ;;  %v3716_v12 = vadd.f32 %v3715_v48, %v3714_v25  ;;  %v3828_v59 = vadd.f32 %v3827_v3, %v3826_v35 }
 0x2ce   :  { %2883 = vmatmul.mubr.bf16.gmra.mrb[244].mxu1 %v1885_v52  ;;  %3044 = vmatmul.mubr.bf16.gmra.mrb[20].mxu0 %v1887_v8 }
 0x2cf   :  { %v7221_v4 = vadd.f32 %v3825_v0, %v2475_v53  ;;  %v2478_v20 = vadd.f32 %v3716_v12, %v7144_v39  ;;  %2890 = vmatprep.mubr.bf16.mxu1 %v1894_v10  ;;  %3051 = vmatprep.mubr.bf16.mxu0 %v1896_v6 }
 0x2d1   :  { %v7224_v28 = vadd.f32 %v3828_v59, %v2478_v20  ;;  %v3717_v36 = vpop.f32.mrb[140].mxu1  ;;  %v3829_v11 = vpop.f32.mrb[172].mxu0 }
 0x2d2   :  { %v3718_v31 = vpop.f32.mrb[141].mxu1  ;;  %v3830_v42 = vpop.f32.mrb[173].mxu0 }
 0x2d3   :  { %v3719_v2 = vadd.f32 %v3718_v31, %v3717_v36  ;;  %v3831_v52 = vadd.f32 %v3830_v42, %v3829_v11  ;;  %v3720_v32 = vpop.f32.mrb[142].mxu1  ;;  %v3832_v62 = vpop.f32.mrb[174].mxu0 }
 0x2d4   :  { %v3721_v8 = vpop.f32.mrb[143].mxu1  ;;  %v3833_v24 = vpop.f32.mrb[175].mxu0 }
 0x2d5   :  { %v2483_v10 = vadd.f32 %v3719_v2, %v7144_v39  ;;  %v3722_v6 = vadd.f32 %v3721_v8, %v3720_v32  ;;  %v3834_v51 = vadd.f32 %v3833_v24, %v3832_v62 }
 0x2d6   :  { %2891 = vmatmul.mubr.bf16.gmra.mrb[248].mxu1 %v1893_v46  ;;  %3052 = vmatmul.mubr.bf16.gmra.mrb[24].mxu0 %v1895_v58 }
 0x2d7   :  { %v7239_v44 = vadd.f32 %v3831_v52, %v2483_v10  ;;  %v2486_v54 = vadd.f32 %v3722_v6, %v7144_v39  ;;  %2898 = vmatprep.mubr.bf16.mxu1 %v1902_v26  ;;  %3059 = vmatprep.mubr.bf16.mxu0 %v1904_v22 }
 0x2d9   :  { %v7242_v30 = vadd.f32 %v3834_v51, %v2486_v54  ;;  %v3723_v18 = vpop.f32.mrb[144].mxu1  ;;  %v3835_v41 = vpop.f32.mrb[176].mxu0 }
 0x2da   :  { %v3724_v1 = vpop.f32.mrb[145].mxu1  ;;  %v3836_v46 = vpop.f32.mrb[177].mxu0 }
 0x2db   :  { %v3725_v38 = vadd.f32 %v3724_v1, %v3723_v18  ;;  %v3837_v56 = vadd.f32 %v3836_v46, %v3835_v41  ;;  %v3726_v58 = vpop.f32.mrb[146].mxu1  ;;  %v3838_v23 = vpop.f32.mrb[178].mxu0 }
 0x2dc   :  { %v3727_v49 = vpop.f32.mrb[147].mxu1  ;;  %v3839_v61 = vpop.f32.mrb[179].mxu0 }
 0x2dd   :  { %v2491_v37 = vadd.f32 %v3725_v38, %v7144_v39  ;;  %v3728_v17 = vadd.f32 %v3727_v49, %v3726_v58  ;;  %v3840_v63 = vadd.f32 %v3839_v61, %v3838_v23 }
 0x2de   :  { %2899 = vmatmul.mubr.bf16.gmra.mrb[252].mxu1 %v1901_v40  ;;  %3060 = vmatmul.mubr.bf16.gmra.mrb[28].mxu0 %v1903_v27 }
 0x2df   :  { %v7251_v45 = vadd.f32 %v3837_v56, %v2491_v37  ;;  %v2494_v55 = vadd.f32 %v3728_v17, %v7144_v39 }
 0x2e1   :  { %v7254_v29 = vadd.f32 %v3840_v63, %v2494_v55  ;;  %v3729_v26 = vpop.f32.mrb[148].mxu1  ;;  %v3841_v22 = vpop.f32.mrb[180].mxu0 }
 0x2e2   :  { %v3730_v19 = vpop.f32.mrb[149].mxu1  ;;  %v3842_v16 = vpop.f32.mrb[181].mxu0 }
 0x2e3   :  { %v3731_v33 = vadd.f32 %v3730_v19, %v3729_v26  ;;  %v3843_v21 = vadd.f32 %v3842_v16, %v3841_v22  ;;  %v3732_v15 = vpop.f32.mrb[150].mxu1  ;;  %v3844_v43 = vpop.f32.mrb[182].mxu0 }
 0x2e4   :  { %v3733_v60 = vpop.f32.mrb[151].mxu1  ;;  %v3845_v57 = vpop.f32.mrb[183].mxu0 }
 0x2e5   :  { %v2499_v40 = vadd.f32 %v3731_v33, %v7144_v39  ;;  %v3734_v34 = vadd.f32 %v3733_v60, %v3732_v15  ;;  %v3846_v50 = vadd.f32 %v3845_v57, %v3844_v43 }
 0x2e7   :  { %v7257_v27 = vadd.f32 %v3843_v21, %v2499_v40  ;;  %v2502_v0 = vadd.f32 %v3734_v34, %v7144_v39 }
 0x2e9   :  { %v7260_v25 = vadd.f32 %v3846_v50, %v2502_v0  ;;  %v3735_v35 = vpop.f32.mrb[152].mxu1  ;;  %v3847_v48 = vpop.f32.mrb[184].mxu0 }
 0x2ea   :  { %v3736_v3 = vpop.f32.mrb[153].mxu1  ;;  %v3848_v53 = vpop.f32.mrb[185].mxu0 }
 0x2eb   :  { %v3737_v12 = vadd.f32 %v3736_v3, %v3735_v35  ;;  %v3849_v59 = vadd.f32 %v3848_v53, %v3847_v48  ;;  %v3738_v20 = vpop.f32.mrb[154].mxu1  ;;  %v3850_v36 = vpop.f32.mrb[186].mxu0 }
 0x2ec   :  { %v3739_v11 = vpop.f32.mrb[155].mxu1  ;;  %v3851_v31 = vpop.f32.mrb[187].mxu0 }
 0x2ed   :  { %v2507_v42 = vadd.f32 %v3737_v12, %v7144_v39  ;;  %v3740_v5 = vadd.f32 %v3739_v11, %v3738_v20  ;;  %v3852_v2 = vadd.f32 %v3851_v31, %v3850_v36 }
 0x2ef   :  { %v7263_v52 = vadd.f32 %v3849_v59, %v2507_v42  ;;  %v2510_v32 = vadd.f32 %v3740_v5, %v7144_v39 }
 0x2f1   :  { %v7266_v62 = vadd.f32 %v3852_v2, %v2510_v32  ;;  %v3741_v8 = vpop.f32.mrb[156].mxu1  ;;  %v3853_v24 = vpop.f32.mrb[188].mxu0 }
 0x2f2   :  { %v3742_v10 = vpop.f32.mrb[157].mxu1  ;;  %v3854_v6 = vpop.f32.mrb[189].mxu0 }
 0x2f3   :  { %v3743_v51 = vadd.f32 %v3742_v10, %v3741_v8  ;;  %v3855_v47 = vadd.f32 %v3854_v6, %v3853_v24  ;;  %v3744_v54 = vpop.f32.mrb[158].mxu1  ;;  %v3856_v18 = vpop.f32.mrb[190].mxu0 }
 0x2f4   :  { %v3745_v41 = vpop.f32.mrb[159].mxu1  ;;  %v3857_v1 = vpop.f32.mrb[191].mxu0 }
 0x2f5   :  { %v2515_v46 = vadd.f32 %v3743_v51, %v7144_v39  ;;  %v3746_v38 = vadd.f32 %v3745_v41, %v3744_v54  ;;  %v3858_v56 = vadd.f32 %v3857_v1, %v3856_v18 }
 0x2f7   :  { %v7269_v58 = vadd.f32 %v3855_v47, %v2515_v46  ;;  %v2518_v23 = vadd.f32 %v3746_v38, %v7144_v39 }
 0x2f9   :  { %v7272_v49 = vadd.f32 %v3858_v56, %v2518_v23  ;;  %v3747_v61 = vpop.f32.mrb[160].mxu1  ;;  %v3859_v37 = vpop.f32.mrb[192].mxu0 }
 0x2fa   :  { %v3748_v17 = vpop.f32.mrb[161].mxu1  ;;  %v3860_v63 = vpop.f32.mrb[193].mxu0 }
 0x2fb   :  { %v3749_v55 = vadd.f32 %v3748_v17, %v3747_v61  ;;  %v3861_v26 = vadd.f32 %v3860_v63, %v3859_v37  ;;  %v3750_v22 = vpop.f32.mrb[162].mxu1  ;;  %v3862_v19 = vpop.f32.mrb[194].mxu0 }
 0x2fc   :  { %v3751_v16 = vpop.f32.mrb[163].mxu1  ;;  %v3863_v33 = vpop.f32.mrb[195].mxu0 }
 0x2fd   :  { %v2523_v21 = vadd.f32 %v3749_v55, %v7144_v39  ;;  %v3752_v15 = vadd.f32 %v3751_v16, %v3750_v22  ;;  %v3864_v43 = vadd.f32 %v3863_v33, %v3862_v19 }
 0x2ff   :  { %v7275_v60 = vadd.f32 %v3861_v26, %v2523_v21  ;;  %v2526_v57 = vadd.f32 %v3752_v15, %v7144_v39 }
 0x301   :  { %v7278_v40 = vadd.f32 %v3864_v43, %v2526_v57  ;;  %v3753_v34 = vpop.f32.mrb[164].mxu1  ;;  %v3865_v50 = vpop.f32.mrb[196].mxu0 }
 0x302   :  { %v3754_v0 = vpop.f32.mrb[165].mxu1  ;;  %v3866_v35 = vpop.f32.mrb[197].mxu0 }
 0x303   :  { %v3755_v48 = vadd.f32 %v3754_v0, %v3753_v34  ;;  %v3867_v3 = vadd.f32 %v3866_v35, %v3865_v50  ;;  %v3756_v53 = vpop.f32.mrb[166].mxu1  ;;  %v3868_v12 = vpop.f32.mrb[198].mxu0 }
 0x304   :  { %v3757_v59 = vpop.f32.mrb[167].mxu1  ;;  %v3869_v20 = vpop.f32.mrb[199].mxu0 }
 0x305   :  { %v2531_v36 = vadd.f32 %v3755_v48, %v7144_v39  ;;  %v3758_v11 = vadd.f32 %v3757_v59, %v3756_v53  ;;  %v3870_v31 = vadd.f32 %v3869_v20, %v3868_v12 }
 0x307   :  { %v7281_v42 = vadd.f32 %v3867_v3, %v2531_v36  ;;  %v2534_v5 = vadd.f32 %v3758_v11, %v7144_v39 }
 0x309   :  { %v7284_v2 = vadd.f32 %v3870_v31, %v2534_v5  ;;  %v3759_v32 = vpop.f32.mrb[168].mxu1  ;;  %v3871_v8 = vpop.f32.mrb[200].mxu0 }
 0x30a   :  { %v3760_v24 = vpop.f32.mrb[169].mxu1  ;;  %v3872_v10 = vpop.f32.mrb[201].mxu0 }
 0x30b   :  { %v3761_v6 = vadd.f32 %v3760_v24, %v3759_v32  ;;  %v3873_v51 = vadd.f32 %v3872_v10, %v3871_v8  ;;  %v3762_v47 = vpop.f32.mrb[170].mxu1  ;;  %v3874_v54 = vpop.f32.mrb[202].mxu0 }
 0x30c   :  { %v3763_v18 = vpop.f32.mrb[171].mxu1  ;;  %v3875_v41 = vpop.f32.mrb[203].mxu0 }
 0x30d   :  { %v2539_v1 = vadd.f32 %v3761_v6, %v7144_v39  ;;  %v3764_v46 = vadd.f32 %v3763_v18, %v3762_v47  ;;  %v3876_v38 = vadd.f32 %v3875_v41, %v3874_v54 }
 0x30f   :  { %v7287_v56 = vadd.f32 %v3873_v51, %v2539_v1  ;;  %v2542_v23 = vadd.f32 %v3764_v46, %v7144_v39 }
 0x311   :  { %v7290_v61 = vadd.f32 %v3876_v38, %v2542_v23  ;;  %v3765_v37 = vpop.f32.mrb[172].mxu1  ;;  %v3877_v17 = vpop.f32.mrb[204].mxu0 }
 0x312   :  { %v3766_v63 = vpop.f32.mrb[173].mxu1  ;;  %v3878_v55 = vpop.f32.mrb[205].mxu0 }
 0x313   :  { %v3767_v26 = vadd.f32 %v3766_v63, %v3765_v37  ;;  %v3879_v22 = vadd.f32 %v3878_v55, %v3877_v17  ;;  %v3768_v19 = vpop.f32.mrb[174].mxu1  ;;  %v3880_v16 = vpop.f32.mrb[206].mxu0 }
 0x314   :  { %v3769_v33 = vpop.f32.mrb[175].mxu1  ;;  %v3881_v21 = vpop.f32.mrb[207].mxu0 }
 0x315   :  { %v2547_v15 = vadd.f32 %v3767_v26, %v7144_v39  ;;  %v3770_v43 = vadd.f32 %v3769_v33, %v3768_v19  ;;  %v3882_v57 = vadd.f32 %v3881_v21, %v3880_v16 }
 0x317   :  { %v7293_v34 = vadd.f32 %v3879_v22, %v2547_v15  ;;  %v2550_v50 = vadd.f32 %v3770_v43, %v7144_v39 }
 0x319   :  { %v7296_v0 = vadd.f32 %v3882_v57, %v2550_v50  ;;  %v3771_v35 = vpop.f32.mrb[176].mxu1  ;;  %v3883_v48 = vpop.f32.mrb[208].mxu0 }
 0x31a   :  { %v3772_v3 = vpop.f32.mrb[177].mxu1  ;;  %v3884_v53 = vpop.f32.mrb[209].mxu0 }
 0x31b   :  { %v3773_v12 = vadd.f32 %v3772_v3, %v3771_v35  ;;  %v3885_v59 = vadd.f32 %v3884_v53, %v3883_v48  ;;  %v3774_v20 = vpop.f32.mrb[178].mxu1  ;;  %v3886_v36 = vpop.f32.mrb[210].mxu0 }
 0x31c   :  { %v3775_v11 = vpop.f32.mrb[179].mxu1  ;;  %v3887_v31 = vpop.f32.mrb[211].mxu0 }
 0x31d   :  { %v2555_v5 = vadd.f32 %v3773_v12, %v7144_v39  ;;  %v3776_v32 = vadd.f32 %v3775_v11, %v3774_v20  ;;  %v3888_v8 = vadd.f32 %v3887_v31, %v3886_v36 }
 0x31f   :  { %v7299_v24 = vadd.f32 %v3885_v59, %v2555_v5  ;;  %v2558_v10 = vadd.f32 %v3776_v32, %v7144_v39 }
 0x321   :  { %v7302_v6 = vadd.f32 %v3888_v8, %v2558_v10  ;;  %v3777_v51 = vpop.f32.mrb[180].mxu1  ;;  %v3889_v47 = vpop.f32.mrb[212].mxu0 }
 0x322   :  { %v3778_v54 = vpop.f32.mrb[181].mxu1  ;;  %v3890_v18 = vpop.f32.mrb[213].mxu0 }
 0x323   :  { %v3779_v41 = vadd.f32 %v3778_v54, %v3777_v51  ;;  %v3891_v1 = vadd.f32 %v3890_v18, %v3889_v47  ;;  %v3780_v46 = vpop.f32.mrb[182].mxu1  ;;  %v3892_v38 = vpop.f32.mrb[214].mxu0 }
 0x324   :  { %v3781_v23 = vpop.f32.mrb[183].mxu1  ;;  %v3893_v37 = vpop.f32.mrb[215].mxu0 }
 0x325   :  { %v2563_v17 = vadd.f32 %v3779_v41, %v7144_v39  ;;  %v3782_v63 = vadd.f32 %v3781_v23, %v3780_v46  ;;  %v3894_v55 = vadd.f32 %v3893_v37, %v3892_v38 }
 0x327   :  { %v7305_v26 = vadd.f32 %v3891_v1, %v2563_v17  ;;  %v2566_v22 = vadd.f32 %v3782_v63, %v7144_v39 }
 0x329   :  { %v7308_v19 = vadd.f32 %v3894_v55, %v2566_v22  ;;  %v3783_v16 = vpop.f32.mrb[184].mxu1  ;;  %v3895_v33 = vpop.f32.mrb[216].mxu0 }
 0x32a   :  { %v3784_v21 = vpop.f32.mrb[185].mxu1  ;;  %v3896_v15 = vpop.f32.mrb[217].mxu0 }
 0x32b   :  { %v3785_v43 = vadd.f32 %v3784_v21, %v3783_v16  ;;  %v3897_v57 = vadd.f32 %v3896_v15, %v3895_v33  ;;  %v3786_v50 = vpop.f32.mrb[186].mxu1  ;;  %v3898_v35 = vpop.f32.mrb[218].mxu0 }
 0x32c   :  { %v3787_v48 = vpop.f32.mrb[187].mxu1  ;;  %v3899_v3 = vpop.f32.mrb[219].mxu0 }
 0x32d   :  { %v2571_v53 = vadd.f32 %v3785_v43, %v7144_v39  ;;  %v3788_v12 = vadd.f32 %v3787_v48, %v3786_v50  ;;  %v3900_v59 = vadd.f32 %v3899_v3, %v3898_v35 }
 0x32f   :  { %v7311_v20 = vadd.f32 %v3897_v57, %v2571_v53  ;;  %v2574_v36 = vadd.f32 %v3788_v12, %v7144_v39 }
 0x331   :  { %v7314_v11 = vadd.f32 %v3900_v59, %v2574_v36  ;;  %v3789_v31 = vpop.f32.mrb[188].mxu1  ;;  %v3901_v5 = vpop.f32.mrb[220].mxu0 }
 0x332   :  { %v3790_v32 = vpop.f32.mrb[189].mxu1  ;;  %v3902_v8 = vpop.f32.mrb[221].mxu0 }
 0x333   :  { %v3791_v10 = vadd.f32 %v3790_v32, %v3789_v31  ;;  %v3903_v51 = vadd.f32 %v3902_v8, %v3901_v5  ;;  %v3792_v47 = vpop.f32.mrb[190].mxu1  ;;  %v3904_v54 = vpop.f32.mrb[222].mxu0 }
 0x334   :  { %v3793_v18 = vpop.f32.mrb[191].mxu1  ;;  %v3905_v41 = vpop.f32.mrb[223].mxu0 }
 0x335   :  { %v2579_v1 = vadd.f32 %v3791_v10, %v7144_v39  ;;  %v3794_v46 = vadd.f32 %v3793_v18, %v3792_v47  ;;  %v3906_v38 = vadd.f32 %v3905_v41, %v3904_v54 }
 0x337   :  { %v7317_v23 = vadd.f32 %v3903_v51, %v2579_v1  ;;  %v2582_v37 = vadd.f32 %v3794_v46, %v7144_v39 }
 0x339   :  { %v7320_v17 = vadd.f32 %v3906_v38, %v2582_v37  ;;  %v3923_v63 = vpop.f32.mrb[192].mxu1  ;;  %v4035_v55 = vpop.f32.mrb[224].mxu0 }
 0x33a   :  { %v3924_v22 = vpop.f32.mrb[193].mxu1  ;;  %v4036_v16 = vpop.f32.mrb[225].mxu0 }
 0x33b   :  { %v3925_v33 = vadd.f32 %v3924_v22, %v3923_v63  ;;  %v4037_v21 = vadd.f32 %v4036_v16, %v4035_v55  ;;  %v3926_v15 = vpop.f32.mrb[194].mxu1  ;;  %v4038_v43 = vpop.f32.mrb[226].mxu0 }
 0x33c   :  { %v3927_v57 = vpop.f32.mrb[195].mxu1  ;;  %v4039_v50 = vpop.f32.mrb[227].mxu0 }
 0x33d   :  { %v2781_v35 = vadd.f32 %v3925_v33, %v7171_v13  ;;  %v3928_v48 = vadd.f32 %v3927_v57, %v3926_v15  ;;  %v4040_v3 = vadd.f32 %v4039_v50, %v4038_v43 }
 0x33f   :  { %v2942_v53 = vadd.f32 %v4037_v21, %v2781_v35  ;;  %v2784_v12 = vadd.f32 %v3928_v48, %v7184_v9 }
 0x341   :  { %v2945_v39 = vadd.f32 %v4040_v3, %v2784_v12  ;;  %v3929_v59 = vpop.f32.mrb[196].mxu1  ;;  %v4041_v36 = vpop.f32.mrb[228].mxu0  ;;  %4812 = vtanh.f32 %v2942_v53 }
 0x342   :  { %v3930_v31 = vpop.f32.mrb[197].mxu1  ;;  %v4042_v5 = vpop.f32.mrb[229].mxu0 }
 0x343   :  { %4814 = vtanh.f32 %v2945_v39  ;;  %v3931_v32 = vadd.f32 %v3930_v31, %v3929_v59  ;;  %v4043_v8 = vadd.f32 %v4042_v5, %v4041_v36  ;;  %v3932_v10 = vpop.f32.mrb[198].mxu1  ;;  %v4044_v51 = vpop.f32.mrb[230].mxu0 }
 0x344   :  { %v3933_v47 = vpop.f32.mrb[199].mxu1  ;;  %v4045_v54 = vpop.f32.mrb[231].mxu0 }
 0x345   :  { %v2789_v13 = vadd.f32 %v3931_v32, %v7203_v14  ;;  %v3934_v18 = vadd.f32 %v3933_v47, %v3932_v10  ;;  %v4046_v41 = vadd.f32 %v4045_v54, %v4044_v51 }
 0x347   :  { %v2950_v1 = vadd.f32 %v4043_v8, %v2789_v13  ;;  %v2792_v9 = vadd.f32 %v3934_v18, %v7212_v7 }
 0x349   :  { %v2953_v46 = vadd.f32 %v4046_v41, %v2792_v9  ;;  %v3935_v38 = vpop.f32.mrb[200].mxu1  ;;  %v4047_v37 = vpop.f32.mrb[232].mxu0  ;;  %4816 = vtanh.f32 %v2950_v1 }
 0x34a   :  { %v3936_v63 = vpop.f32.mrb[201].mxu1  ;;  %v4048_v55 = vpop.f32.mrb[233].mxu0 }
 0x34b   :  { %4818 = vtanh.f32 %v2953_v46  ;;  %v3937_v22 = vadd.f32 %v3936_v63, %v3935_v38  ;;  %v4049_v16 = vadd.f32 %v4048_v55, %v4047_v37  ;;  %v3938_v33 = vpop.f32.mrb[202].mxu1  ;;  %v4050_v21 = vpop.f32.mrb[234].mxu0 }
 0x34c   :  { %v4813_v15 = vpop.eup %4812  ;;  %v3939_v43 = vpop.f32.mrb[203].mxu1 }
 0x34d   :  { %v4051_v57 = vpop.f32.mrb[235].mxu0  ;;  %v4815_v14 = vpop.eup %4814  ;;  %v2797_v50 = vadd.f32 %v3937_v22, %v7221_v4  ;;  %v3940_v35 = vadd.f32 %v3939_v43, %v3938_v33 }
 0x34e   :  { %v4052_v48 = vadd.f32 %v4051_v57, %v4050_v21  ;;  %v3100_v7 = vpack.c.bf16 %v4815_v14, %v4813_v15 }
 0x34f   :  { %v2958_v3 = vadd.f32 %v4049_v16, %v2797_v50  ;;  %v2800_v53 = vadd.f32 %v3940_v35, %v7224_v28 }
 0x350   :  { %4195 = vmatprep.mubr.msk.bf16.mxu1 %vm700_vm8, %v3100_v7 }
 0x351   :  { %v2961_v12 = vadd.f32 %v4052_v48, %v2800_v53  ;;  %v3941_v39 = vpop.f32.mrb[204].mxu1  ;;  %v4053_v59 = vpop.f32.mrb[236].mxu0  ;;  %4820 = vtanh.f32 %v2958_v3 }
 0x352   :  { %v3942_v36 = vpop.f32.mrb[205].mxu1  ;;  %v4054_v31 = vpop.f32.mrb[237].mxu0 }
 0x353   :  { %4822 = vtanh.f32 %v2961_v12  ;;  %v3943_v5 = vadd.f32 %v3942_v36, %v3941_v39  ;;  %v4055_v32 = vadd.f32 %v4054_v31, %v4053_v59  ;;  %v3944_v8 = vpop.f32.mrb[206].mxu1  ;;  %v4056_v10 = vpop.f32.mrb[238].mxu0 }
 0x354   :  { %v4817_v4 = vpop.eup %4816  ;;  %v3945_v51 = vpop.f32.mrb[207].mxu1 }
 0x355   :  { %v4057_v47 = vpop.f32.mrb[239].mxu0  ;;  %v4819_v54 = vpop.eup %4818  ;;  %v2805_v13 = vadd.f32 %v3943_v5, %v7239_v44  ;;  %v3946_v28 = vadd.f32 %v3945_v51, %v3944_v8 }
 0x356   :  { %v4058_v18 = vadd.f32 %v4057_v47, %v4056_v10  ;;  %v3101_v41 = vpack.c.bf16 %v4819_v54, %v4817_v4 }
 0x357   :  { %v2966_v1 = vadd.f32 %v4055_v32, %v2805_v13  ;;  %v2808_v9 = vadd.f32 %v3946_v28, %v7242_v30 }
 0x358   :  { %4196 = vmatmul.mubr.msk.bf16.vlgmr.msra.gmra.mrb[0].mxu1 %vm700_vm8, %v3101_v41 }
 0x359   :  { %v2969_v46 = vadd.f32 %v4058_v18, %v2808_v9  ;;  %v3947_v38 = vpop.f32.mrb[208].mxu1  ;;  %v4059_v37 = vpop.f32.mrb[240].mxu0  ;;  %4824 = vtanh.f32 %v2966_v1 }
 0x35a   :  { %v3948_v63 = vpop.f32.mrb[209].mxu1  ;;  %v4060_v55 = vpop.f32.mrb[241].mxu0 }
 0x35b   :  { %4826 = vtanh.f32 %v2969_v46  ;;  %v3949_v22 = vadd.f32 %v3948_v63, %v3947_v38  ;;  %v4061_v16 = vadd.f32 %v4060_v55, %v4059_v37  ;;  %v3950_v33 = vpop.f32.mrb[210].mxu1  ;;  %v4062_v21 = vpop.f32.mrb[242].mxu0 }
 0x35c   :  { %v4821_v44 = vpop.eup %4820  ;;  %v3951_v15 = vpop.f32.mrb[211].mxu1 }
 0x35d   :  { %v4063_v43 = vpop.f32.mrb[243].mxu0  ;;  %v4823_v57 = vpop.eup %4822  ;;  %v2813_v14 = vadd.f32 %v3949_v22, %v7251_v45  ;;  %v3952_v30 = vadd.f32 %v3951_v15, %v3950_v33 }
 0x35e   :  { %v4064_v50 = vadd.f32 %v4063_v43, %v4062_v21  ;;  %v3102_v35 = vpack.c.bf16 %v4823_v57, %v4821_v44 }
 0x35f   :  { %v2974_v48 = vadd.f32 %v4061_v16, %v2813_v14  ;;  %v2816_v7 = vadd.f32 %v3952_v30, %v7254_v29 }
 0x360   :  { %4199 = vmatprep.mubr.msk.bf16.mxu1 %vm700_vm8, %v3102_v35 }
 0x361   :  { %v2977_v3 = vadd.f32 %v4064_v50, %v2816_v7  ;;  %v3953_v53 = vpop.f32.mrb[212].mxu1  ;;  %v4065_v12 = vpop.f32.mrb[244].mxu0  ;;  %4828 = vtanh.f32 %v2974_v48 }
 0x362   :  { %v3954_v39 = vpop.f32.mrb[213].mxu1  ;;  %v4066_v59 = vpop.f32.mrb[245].mxu0 }
 0x363   :  { %4830 = vtanh.f32 %v2977_v3  ;;  %v3955_v36 = vadd.f32 %v3954_v39, %v3953_v53  ;;  %v4067_v31 = vadd.f32 %v4066_v59, %v4065_v12  ;;  %v3956_v5 = vpop.f32.mrb[214].mxu1  ;;  %v4068_v32 = vpop.f32.mrb[246].mxu0 }
 0x364   :  { %v4825_v45 = vpop.eup %4824  ;;  %v3957_v8 = vpop.f32.mrb[215].mxu1 }
 0x365   :  { %v4069_v10 = vpop.f32.mrb[247].mxu0  ;;  %v4827_v4 = vpop.eup %4826  ;;  %v2821_v51 = vadd.f32 %v3955_v36, %v7257_v27  ;;  %v3958_v29 = vadd.f32 %v3957_v8, %v3956_v5 }
 0x366   :  { %v4070_v47 = vadd.f32 %v4069_v10, %v4068_v32  ;;  %v3103_v54 = vpack.c.bf16 %v4827_v4, %v4825_v45 }
 0x367   :  { %v2982_v13 = vadd.f32 %v4067_v31, %v2821_v51  ;;  %v2824_v28 = vadd.f32 %v3958_v29, %v7260_v25 }
 0x368   :  { %4200 = vmatmul.mubr.msk.bf16.gmra.mrb[4].mxu1 %vm700_vm8, %v3103_v54 }
 0x369   :  { %v2985_v18 = vadd.f32 %v4070_v47, %v2824_v28  ;;  %v3959_v41 = vpop.f32.mrb[216].mxu1  ;;  %v4071_v1 = vpop.f32.mrb[248].mxu0  ;;  %4832 = vtanh.f32 %v2982_v13 }
 0x36a   :  { %v3960_v9 = vpop.f32.mrb[217].mxu1  ;;  %v4072_v46 = vpop.f32.mrb[249].mxu0 }
 0x36b   :  { %4834 = vtanh.f32 %v2985_v18  ;;  %v3961_v38 = vadd.f32 %v3960_v9, %v3959_v41  ;;  %v4073_v37 = vadd.f32 %v4072_v46, %v4071_v1  ;;  %v3962_v63 = vpop.f32.mrb[218].mxu1  ;;  %v4074_v55 = vpop.f32.mrb[250].mxu0 }
 0x36c   :  { %v4829_v27 = vpop.eup %4828  ;;  %v3963_v22 = vpop.f32.mrb[219].mxu1 }
 0x36d   :  { %v4075_v16 = vpop.f32.mrb[251].mxu0  ;;  %v4831_v33 = vpop.eup %4830  ;;  %v2829_v21 = vadd.f32 %v3961_v38, %v7263_v52  ;;  %v3964_v25 = vadd.f32 %v3963_v22, %v3962_v63 }
 0x36e   :  { %v4076_v44 = vadd.f32 %v4075_v16, %v4074_v55  ;;  %v3104_v15 = vpack.c.bf16 %v4831_v33, %v4829_v27 }
 0x36f   :  { %v2990_v43 = vadd.f32 %v4073_v37, %v2829_v21  ;;  %v2832_v57 = vadd.f32 %v3964_v25, %v7266_v62 }
 0x370   :  { %4203 = vmatprep.mubr.msk.bf16.mxu1 %vm700_vm8, %v3104_v15 }
 0x371   :  { %v2993_v14 = vadd.f32 %v4076_v44, %v2832_v57  ;;  %v3965_v30 = vpop.f32.mrb[220].mxu1  ;;  %v4077_v50 = vpop.f32.mrb[252].mxu0  ;;  %4836 = vtanh.f32 %v2990_v43 }
 0x372   :  { %v3966_v35 = vpop.f32.mrb[221].mxu1  ;;  %v4078_v48 = vpop.f32.mrb[253].mxu0 }
 0x373   :  { %4838 = vtanh.f32 %v2993_v14  ;;  %v3967_v7 = vadd.f32 %v3966_v35, %v3965_v30  ;;  %v4079_v3 = vadd.f32 %v4078_v48, %v4077_v50  ;;  %v3968_v53 = vpop.f32.mrb[222].mxu1  ;;  %v4080_v12 = vpop.f32.mrb[254].mxu0 }
 0x374   :  { %v4833_v52 = vpop.eup %4832  ;;  %v3969_v39 = vpop.f32.mrb[223].mxu1 }
 0x375   :  { %v4081_v59 = vpop.f32.mrb[255].mxu0  ;;  %v4835_v36 = vpop.eup %4834  ;;  %v2837_v31 = vadd.f32 %v3967_v7, %v7269_v58  ;;  %v3970_v62 = vadd.f32 %v3969_v39, %v3968_v53 }
 0x376   :  { %v4082_v5 = vadd.f32 %v4081_v59, %v4080_v12  ;;  %v3105_v32 = vpack.c.bf16 %v4835_v36, %v4833_v52 }
 0x377   :  { %v2998_v45 = vadd.f32 %v4079_v3, %v2837_v31  ;;  %v2840_v8 = vadd.f32 %v3970_v62, %v7272_v49 }
 0x378   :  { %4204 = vmatmul.mubr.msk.bf16.gmra.mrb[8].mxu1 %vm700_vm8, %v3105_v32 }
 0x379   :  { %v3001_v10 = vadd.f32 %v4082_v5, %v2840_v8  ;;  %v3971_v4 = vpop.f32.mrb[224].mxu1  ;;  %v4083_v51 = vpop.f32.mrb[0].mxu0  ;;  %4840 = vtanh.f32 %v2998_v45 }
 0x37a   :  { %v3972_v29 = vpop.f32.mrb[225].mxu1  ;;  %v4084_v47 = vpop.f32.mrb[1].mxu0 }
 0x37b   :  { %4842 = vtanh.f32 %v3001_v10  ;;  %v3973_v54 = vadd.f32 %v3972_v29, %v3971_v4  ;;  %v4085_v13 = vadd.f32 %v4084_v47, %v4083_v51  ;;  %v3974_v28 = vpop.f32.mrb[226].mxu1  ;;  %v4086_v18 = vpop.f32.mrb[2].mxu0 }
 0x37c   :  { %v4837_v58 = vpop.eup %4836  ;;  %v3975_v41 = vpop.f32.mrb[227].mxu1 }
 0x37d   :  { %v4087_v1 = vpop.f32.mrb[3].mxu0  ;;  %v4839_v9 = vpop.eup %4838  ;;  %v2845_v46 = vadd.f32 %v3973_v54, %v7275_v60  ;;  %v3976_v49 = vadd.f32 %v3975_v41, %v3974_v28 }
 0x37e   :  { %v4088_v38 = vadd.f32 %v4087_v1, %v4086_v18  ;;  %v3106_v37 = vpack.c.bf16 %v4839_v9, %v4837_v58 }
 0x37f   :  { %v3006_v63 = vadd.f32 %v4085_v13, %v2845_v46  ;;  %v2848_v55 = vadd.f32 %v3976_v49, %v7278_v40 }
 0x380   :  { %4207 = vmatprep.mubr.msk.bf16.mxu1 %vm700_vm8, %v3106_v37 }
 0x381   :  { %v3009_v27 = vadd.f32 %v4088_v38, %v2848_v55  ;;  %v3977_v22 = vpop.f32.mrb[228].mxu1  ;;  %v4089_v16 = vpop.f32.mrb[4].mxu0  ;;  %4844 = vtanh.f32 %v3006_v63 }
 0x382   :  { %v3978_v33 = vpop.f32.mrb[229].mxu1  ;;  %v4090_v21 = vpop.f32.mrb[5].mxu0 }
 0x383   :  { %4846 = vtanh.f32 %v3009_v27  ;;  %v3979_v25 = vadd.f32 %v3978_v33, %v3977_v22  ;;  %v4091_v44 = vadd.f32 %v4090_v21, %v4089_v16  ;;  %v3980_v15 = vpop.f32.mrb[230].mxu1  ;;  %v4092_v43 = vpop.f32.mrb[6].mxu0 }
 0x384   :  { %v4841_v60 = vpop.eup %4840  ;;  %v3981_v57 = vpop.f32.mrb[231].mxu1 }
 0x385   :  { %v4093_v14 = vpop.f32.mrb[7].mxu0  ;;  %v4843_v30 = vpop.eup %4842  ;;  %v2853_v50 = vadd.f32 %v3979_v25, %v7281_v42  ;;  %v3982_v40 = vadd.f32 %v3981_v57, %v3980_v15 }
 0x386   :  { %v4094_v35 = vadd.f32 %v4093_v14, %v4092_v43  ;;  %v3107_v48 = vpack.c.bf16 %v4843_v30, %v4841_v60 }
 0x387   :  { %v3014_v7 = vadd.f32 %v4091_v44, %v2853_v50  ;;  %v2856_v3 = vadd.f32 %v3982_v40, %v7284_v2 }
 0x388   :  { %4208 = vmatmul.mubr.msk.bf16.gmra.mrb[12].mxu1 %vm700_vm8, %v3107_v48 }
 0x389   :  { %v3017_v53 = vadd.f32 %v4094_v35, %v2856_v3  ;;  %v3983_v12 = vpop.f32.mrb[232].mxu1  ;;  %v4095_v52 = vpop.f32.mrb[8].mxu0  ;;  %4848 = vtanh.f32 %v3014_v7 }
 0x38a   :  { %v3984_v39 = vpop.f32.mrb[233].mxu1  ;;  %v4096_v59 = vpop.f32.mrb[9].mxu0 }
 0x38b   :  { %4850 = vtanh.f32 %v3017_v53  ;;  %v3985_v36 = vadd.f32 %v3984_v39, %v3983_v12  ;;  %v4097_v31 = vadd.f32 %v4096_v59, %v4095_v52  ;;  %v3986_v62 = vpop.f32.mrb[234].mxu1  ;;  %v4098_v5 = vpop.f32.mrb[10].mxu0 }
 0x38c   :  { %v4845_v42 = vpop.eup %4844  ;;  %v3987_v32 = vpop.f32.mrb[235].mxu1 }
 0x38d   :  { %v4099_v45 = vpop.f32.mrb[11].mxu0  ;;  %v4847_v8 = vpop.eup %4846  ;;  %v2861_v10 = vadd.f32 %v3985_v36, %v7287_v56  ;;  %v3988_v2 = vadd.f32 %v3987_v32, %v3986_v62 }
 0x38e   :  { %v4100_v4 = vadd.f32 %v4099_v45, %v4098_v5  ;;  %v3108_v51 = vpack.c.bf16 %v4847_v8, %v4845_v42 }
 0x38f   :  { %v3022_v29 = vadd.f32 %v4097_v31, %v2861_v10  ;;  %v2864_v47 = vadd.f32 %v3988_v2, %v7290_v61 }
 0x390   :  { %4211 = vmatprep.mubr.msk.bf16.mxu1 %vm700_vm8, %v3108_v51 }
 0x391   :  { %v3025_v54 = vadd.f32 %v4100_v4, %v2864_v47  ;;  %v3989_v13 = vpop.f32.mrb[236].mxu1  ;;  %v4101_v28 = vpop.f32.mrb[12].mxu0  ;;  %4852 = vtanh.f32 %v3022_v29 }
 0x392   :  { %v3990_v18 = vpop.f32.mrb[237].mxu1  ;;  %v4102_v58 = vpop.f32.mrb[13].mxu0 }
 0x393   :  { %4854 = vtanh.f32 %v3025_v54  ;;  %v3991_v41 = vadd.f32 %v3990_v18, %v3989_v13  ;;  %v4103_v1 = vadd.f32 %v4102_v58, %v4101_v28  ;;  %v3992_v9 = vpop.f32.mrb[238].mxu1  ;;  %v4104_v46 = vpop.f32.mrb[14].mxu0 }
 0x394   :  { %v4849_v56 = vpop.eup %4848  ;;  %v3993_v49 = vpop.f32.mrb[239].mxu1 }
 0x395   :  { %v4105_v38 = vpop.f32.mrb[15].mxu0  ;;  %v4851_v37 = vpop.eup %4850  ;;  %v2869_v63 = vadd.f32 %v3991_v41, %v7293_v34  ;;  %v3994_v61 = vadd.f32 %v3993_v49, %v3992_v9 }
 0x396   :  { %v4106_v55 = vadd.f32 %v4105_v38, %v4104_v46  ;;  %v3109_v27 = vpack.c.bf16 %v4851_v37, %v4849_v56 }
 0x397   :  { %v3030_v22 = vadd.f32 %v4103_v1, %v2869_v63  ;;  %v2872_v16 = vadd.f32 %v3994_v61, %v7296_v0 }
 0x398   :  { %4212 = vmatmul.mubr.msk.bf16.gmra.mrb[16].mxu1 %vm700_vm8, %v3109_v27 }
 0x399   :  { %v3033_v33 = vadd.f32 %v4106_v55, %v2872_v16  ;;  %v3995_v21 = vpop.f32.mrb[240].mxu1  ;;  %v4107_v25 = vpop.f32.mrb[16].mxu0  ;;  %4856 = vtanh.f32 %v3030_v22 }
 0x39a   :  { %v3996_v44 = vpop.f32.mrb[241].mxu1  ;;  %v4108_v15 = vpop.f32.mrb[17].mxu0 }
 0x39b   :  { %4858 = vtanh.f32 %v3033_v33  ;;  %v3997_v43 = vadd.f32 %v3996_v44, %v3995_v21  ;;  %v4109_v60 = vadd.f32 %v4108_v15, %v4107_v25  ;;  %v3998_v57 = vpop.f32.mrb[242].mxu1  ;;  %v4110_v14 = vpop.f32.mrb[18].mxu0 }
 0x39c   :  { %v4853_v34 = vpop.eup %4852  ;;  %v3999_v30 = vpop.f32.mrb[243].mxu1 }
 0x39d   :  { %v4111_v50 = vpop.f32.mrb[19].mxu0  ;;  %v4855_v40 = vpop.eup %4854  ;;  %v2877_v35 = vadd.f32 %v3997_v43, %v7299_v24  ;;  %v4000_v0 = vadd.f32 %v3999_v30, %v3998_v57 }
 0x39e   :  { %v4112_v48 = vadd.f32 %v4111_v50, %v4110_v14  ;;  %v3110_v7 = vpack.c.bf16 %v4855_v40, %v4853_v34 }
 0x39f   :  { %v3038_v3 = vadd.f32 %v4109_v60, %v2877_v35  ;;  %v2880_v53 = vadd.f32 %v4000_v0, %v7302_v6 }
 0x3a0   :  { %4215 = vmatprep.mubr.msk.bf16.mxu1 %vm700_vm8, %v3110_v7 }
 0x3a1   :  { %v3041_v12 = vadd.f32 %v4112_v48, %v2880_v53  ;;  %v4001_v52 = vpop.f32.mrb[244].mxu1  ;;  %v4113_v39 = vpop.f32.mrb[20].mxu0  ;;  %4860 = vtanh.f32 %v3038_v3 }
 0x3a2   :  { %v4002_v59 = vpop.f32.mrb[245].mxu1  ;;  %v4114_v36 = vpop.f32.mrb[21].mxu0 }
 0x3a3   :  { %4862 = vtanh.f32 %v3041_v12  ;;  %v4003_v31 = vadd.f32 %v4002_v59, %v4001_v52  ;;  %v4115_v62 = vadd.f32 %v4114_v36, %v4113_v39  ;;  %v4004_v5 = vpop.f32.mrb[246].mxu1  ;;  %v4116_v42 = vpop.f32.mrb[22].mxu0 }
 0x3a4   :  { %v4857_v24 = vpop.eup %4856  ;;  %v4005_v32 = vpop.f32.mrb[247].mxu1 }
 0x3a5   :  { %v4117_v45 = vpop.f32.mrb[23].mxu0  ;;  %v4859_v8 = vpop.eup %4858  ;;  %v2885_v10 = vadd.f32 %v4003_v31, %v7305_v26  ;;  %v4006_v6 = vadd.f32 %v4005_v32, %v4004_v5 }
 0x3a6   :  { %v4118_v2 = vadd.f32 %v4117_v45, %v4116_v42  ;;  %v3111_v4 = vpack.c.bf16 %v4859_v8, %v4857_v24 }
 0x3a7   :  { %v3046_v51 = vadd.f32 %v4115_v62, %v2885_v10  ;;  %v2888_v29 = vadd.f32 %v4006_v6, %v7308_v19 }
 0x3a8   :  { %4216 = vmatmul.mubr.msk.bf16.gmra.mrb[20].mxu1 %vm700_vm8, %v3111_v4 }
 0x3a9   :  { %v3049_v47 = vadd.f32 %v4118_v2, %v2888_v29  ;;  %v4007_v54 = vpop.f32.mrb[248].mxu1  ;;  %v4119_v13 = vpop.f32.mrb[24].mxu0  ;;  %4864 = vtanh.f32 %v3046_v51 }
 0x3aa   :  { %v4008_v28 = vpop.f32.mrb[249].mxu1  ;;  %v4120_v18 = vpop.f32.mrb[25].mxu0 }
 0x3ab   :  { %4866 = vtanh.f32 %v3049_v47  ;;  %v4009_v58 = vadd.f32 %v4008_v28, %v4007_v54  ;;  %v4121_v41 = vadd.f32 %v4120_v18, %v4119_v13  ;;  %v4010_v1 = vpop.f32.mrb[250].mxu1  ;;  %v4122_v9 = vpop.f32.mrb[26].mxu0 }
 0x3ac   :  { %v4861_v26 = vpop.eup %4860  ;;  %v4011_v46 = vpop.f32.mrb[251].mxu1 }
 0x3ad   :  { %v4123_v56 = vpop.f32.mrb[27].mxu0  ;;  %v4863_v49 = vpop.eup %4862  ;;  %v2893_v38 = vadd.f32 %v4009_v58, %v7311_v20  ;;  %v4012_v19 = vadd.f32 %v4011_v46, %v4010_v1 }
 0x3ae   :  { %v4124_v37 = vadd.f32 %v4123_v56, %v4122_v9  ;;  %v3112_v63 = vpack.c.bf16 %v4863_v49, %v4861_v26 }
 0x3af   :  { %v3054_v61 = vadd.f32 %v4121_v41, %v2893_v38  ;;  %v2896_v55 = vadd.f32 %v4012_v19, %v7314_v11 }
 0x3b0   :  { %4219 = vmatprep.mubr.msk.bf16.mxu1 %vm700_vm8, %v3112_v63 }
 0x3b1   :  { %v3057_v27 = vadd.f32 %v4124_v37, %v2896_v55  ;;  %v4013_v22 = vpop.f32.mrb[252].mxu1  ;;  %v4125_v16 = vpop.f32.mrb[28].mxu0  ;;  %4868 = vtanh.f32 %v3054_v61 }
 0x3b2   :  { %v4014_v33 = vpop.f32.mrb[253].mxu1  ;;  %v4126_v21 = vpop.f32.mrb[29].mxu0 }
 0x3b3   :  { %4870 = vtanh.f32 %v3057_v27  ;;  %v4015_v25 = vadd.f32 %v4014_v33, %v4013_v22  ;;  %v4127_v44 = vadd.f32 %v4126_v21, %v4125_v16  ;;  %v4016_v15 = vpop.f32.mrb[254].mxu1  ;;  %v4128_v43 = vpop.f32.mrb[30].mxu0 }
 0x3b4   :  { %v4865_v20 = vpop.eup %4864  ;;  %v4017_v60 = vpop.f32.mrb[255].mxu1 }
 0x3b5   :  { %v4129_v57 = vpop.f32.mrb[31].mxu0  ;;  %v4867_v14 = vpop.eup %4866  ;;  %v2901_v34 = vadd.f32 %v4015_v25, %v7317_v23  ;;  %v4018_v11 = vadd.f32 %v4017_v60, %v4016_v15  ;;  %v7373_v23 = vld [vmem:[%s7543_s8] ss:$0 sm:$0xff] }
 0x3b6   :  { %v4130_v30 = vadd.f32 %v4129_v57, %v4128_v43  ;;  %v3113_v50 = vpack.c.bf16 %v4867_v14, %v4865_v20 }
 0x3b7   :  { %v3062_v40 = vadd.f32 %v4127_v44, %v2901_v34  ;;  %v2904_v35 = vadd.f32 %v4018_v11, %v7320_v17 }
 0x3b8   :  { %4220 = vmatmul.mubr.msk.bf16.gmra.mrb[24].mxu1 %vm700_vm8, %v3113_v50 }
 0x3b9   :  { %v3065_v0 = vadd.f32 %v4130_v30, %v2904_v35  ;;  %4872 = vtanh.f32 %v3062_v40 }
 0x3bb   :  { %4874 = vtanh.f32 %v3065_v0  ;;  %v4869_v48 = vpop.eup %4868 }
 0x3bd   :  { %v4871_v7 = vpop.eup %4870 }
 0x3be   :  { %v3114_v3 = vpack.c.bf16 %v4871_v7, %v4869_v48 }
 0x3c0   :  { %4223 = vmatprep.mubr.msk.bf16.mxu1 %vm700_vm8, %v3114_v3 }
 0x3c3   :  { %v4873_v53 = vpop.eup %4872 }
 0x3c5   :  { %v4875_v12 = vpop.eup %4874 }
 0x3c6   :  { %v3115_v52 = vpack.c.bf16 %v4875_v12, %v4873_v53 }
 0x3c8   :  { %4224 = vmatmul.mubr.msk.bf16.gmra.mrb[28].mxu1 %vm700_vm8, %v3115_v52 }
 0x42b   :  { %v4197_v17 = vpop.f32.mrb[0].mxu1 }
 0x42c   :  { %v3246_v39 = vadd.f32 %v4197_v17, %v7373_v23  ;;  %v3237_v59 = vpop.f32.mrb[1].mxu1 }
 0x42d   :  { %v3238_v36 = vadd.f32 %v7373_v23, %v3237_v59  ;;  %v4198_v31 = vpop.f32.mrb[2].mxu1 }
 0x42e   :  { %4876 = vtanh.f32 %v3246_v39  ;;  %v3249_v62 = vadd.f32 %v4198_v31, %v7373_v23  ;;  %v3240_v5 = vpop.f32.mrb[3].mxu1 }
 0x42f   :  { %4878 = vtanh.f32 %v3238_v36  ;;  %v3241_v42 = vadd.f32 %v7373_v23, %v3240_v5 }
 0x430   :  { %4880 = vtanh.f32 %v3249_v62 }
 0x431   :  { %4882 = vtanh.f32 %v3241_v42 }
 0x438   :  { %v4877_v24 = vpop.eup %4876 }
 0x439   :  { %v4879_v32 = vpop.eup %4878  ;;  %3398 = vst.msk [vmem:[%s7544_s9 + $0x10] sm:$0xff] %vm700_vm8, %v4877_v24 }
 0x43a   :  { %v4881_v45 = vpop.eup %4880  ;;  %3396 = vst.msk [vmem:[%s7544_s9] sm:$0xff] %vm700_vm8, %v4879_v32 }
 0x43b   :  { %v4883_v8 = vpop.eup %4882  ;;  %3399 = vst.msk [vmem:[%s7544_s9 + $0x18] sm:$0xff] %vm700_vm8, %v4881_v45  ;;  %v4201_v10 = vpop.f32.mrb[4].mxu1 }
 0x43c   :  { %3397 = vst.msk [vmem:[%s7544_s9 + $0x8] sm:$0xff] %vm700_vm8, %v4883_v8  ;;  %v3262_v6 = vadd.f32 %v4201_v10, %v7373_v23  ;;  %v3253_v2 = vpop.f32.mrb[5].mxu1 }
 0x43d   :  { %v3254_v4 = vadd.f32 %v7373_v23, %v3253_v2  ;;  %v4202_v51 = vpop.f32.mrb[6].mxu1 }
 0x43e   :  { %4884 = vtanh.f32 %v3262_v6  ;;  %v3265_v29 = vadd.f32 %v4202_v51, %v7373_v23  ;;  %v3256_v47 = vpop.f32.mrb[7].mxu1 }
 0x43f   :  { %4886 = vtanh.f32 %v3254_v4  ;;  %v3257_v54 = vadd.f32 %v7373_v23, %v3256_v47 }
 0x440   :  { %4888 = vtanh.f32 %v3265_v29 }
 0x441   :  { %4890 = vtanh.f32 %v3257_v54 }
 0x448   :  { %v4885_v13 = vpop.eup %4884 }
 0x449   :  { %v4887_v28 = vpop.eup %4886  ;;  %3402 = vst.msk [vmem:[%s7544_s9 + $0x30] sm:$0xff] %vm700_vm8, %v4885_v13 }
 0x44a   :  { %v4889_v18 = vpop.eup %4888  ;;  %3400 = vst.msk [vmem:[%s7544_s9 + $0x20] sm:$0xff] %vm700_vm8, %v4887_v28 }
 0x44b   :  { %v4891_v58 = vpop.eup %4890  ;;  %3403 = vst.msk [vmem:[%s7544_s9 + $0x38] sm:$0xff] %vm700_vm8, %v4889_v18  ;;  %v4205_v41 = vpop.f32.mrb[8].mxu1 }
 0x44c   :  { %3401 = vst.msk [vmem:[%s7544_s9 + $0x28] sm:$0xff] %vm700_vm8, %v4891_v58  ;;  %v3278_v1 = vadd.f32 %v4205_v41, %v7373_v23  ;;  %v3269_v9 = vpop.f32.mrb[9].mxu1 }
 0x44d   :  { %v3270_v26 = vadd.f32 %v7373_v23, %v3269_v9  ;;  %v4206_v46 = vpop.f32.mrb[10].mxu1 }
 0x44e   :  { %4892 = vtanh.f32 %v3278_v1  ;;  %v3281_v56 = vadd.f32 %v4206_v46, %v7373_v23  ;;  %v3272_v49 = vpop.f32.mrb[11].mxu1 }
 0x44f   :  { %4894 = vtanh.f32 %v3270_v26  ;;  %v3273_v38 = vadd.f32 %v7373_v23, %v3272_v49 }
 0x450   :  { %4896 = vtanh.f32 %v3281_v56 }
 0x451   :  { %4898 = vtanh.f32 %v3273_v38 }
 0x458   :  { %v4893_v19 = vpop.eup %4892 }
 0x459   :  { %v4895_v37 = vpop.eup %4894  ;;  %3406 = vst.msk [vmem:[%s7544_s9 + $0x50] sm:$0xff] %vm700_vm8, %v4893_v19 }
 0x45a   :  { %v4897_v63 = vpop.eup %4896  ;;  %3404 = vst.msk [vmem:[%s7544_s9 + $0x40] sm:$0xff] %vm700_vm8, %v4895_v37 }
 0x45b   :  { %v4899_v61 = vpop.eup %4898  ;;  %3407 = vst.msk [vmem:[%s7544_s9 + $0x58] sm:$0xff] %vm700_vm8, %v4897_v63  ;;  %v4209_v55 = vpop.f32.mrb[12].mxu1 }
 0x45c   :  { %3405 = vst.msk [vmem:[%s7544_s9 + $0x48] sm:$0xff] %vm700_vm8, %v4899_v61  ;;  %v3294_v27 = vadd.f32 %v4209_v55, %v7373_v23  ;;  %v3285_v22 = vpop.f32.mrb[13].mxu1 }
 0x45d   :  { %v3286_v16 = vadd.f32 %v7373_v23, %v3285_v22  ;;  %v4210_v33 = vpop.f32.mrb[14].mxu1 }
 0x45e   :  { %4900 = vtanh.f32 %v3294_v27  ;;  %v3297_v21 = vadd.f32 %v4210_v33, %v7373_v23  ;;  %v3288_v25 = vpop.f32.mrb[15].mxu1 }
 0x45f   :  { %4902 = vtanh.f32 %v3286_v16  ;;  %v3289_v44 = vadd.f32 %v7373_v23, %v3288_v25 }
 0x460   :  { %4904 = vtanh.f32 %v3297_v21 }
 0x461   :  { %4906 = vtanh.f32 %v3289_v44 }
 0x468   :  { %v4901_v15 = vpop.eup %4900 }
 0x469   :  { %v4903_v43 = vpop.eup %4902  ;;  %3410 = vst.msk [vmem:[%s7544_s9 + $0x70] sm:$0xff] %vm700_vm8, %v4901_v15 }
 0x46a   :  { %v4905_v20 = vpop.eup %4904  ;;  %3408 = vst.msk [vmem:[%s7544_s9 + $0x60] sm:$0xff] %vm700_vm8, %v4903_v43 }
 0x46b   :  { %v4907_v60 = vpop.eup %4906  ;;  %3411 = vst.msk [vmem:[%s7544_s9 + $0x78] sm:$0xff] %vm700_vm8, %v4905_v20  ;;  %v4213_v57 = vpop.f32.mrb[16].mxu1 }
 0x46c   :  { %3409 = vst.msk [vmem:[%s7544_s9 + $0x68] sm:$0xff] %vm700_vm8, %v4907_v60  ;;  %v3310_v14 = vadd.f32 %v4213_v57, %v7373_v23  ;;  %v3301_v34 = vpop.f32.mrb[17].mxu1 }
 0x46d   :  { %v3302_v11 = vadd.f32 %v7373_v23, %v3301_v34  ;;  %v4214_v30 = vpop.f32.mrb[18].mxu1 }
 0x46e   :  { %4908 = vtanh.f32 %v3310_v14  ;;  %v3313_v50 = vadd.f32 %v4214_v30, %v7373_v23  ;;  %v3304_v40 = vpop.f32.mrb[19].mxu1 }
 0x46f   :  { %4910 = vtanh.f32 %v3302_v11  ;;  %v3305_v35 = vadd.f32 %v7373_v23, %v3304_v40 }
 0x470   :  { %4912 = vtanh.f32 %v3313_v50 }
 0x471   :  { %4914 = vtanh.f32 %v3305_v35 }
 0x478   :  { %v4909_v0 = vpop.eup %4908 }
 0x479   :  { %v4911_v48 = vpop.eup %4910  ;;  %3414 = vst.msk [vmem:[%s7544_s9 + $0x90] sm:$0xff] %vm700_vm8, %v4909_v0 }
 0x47a   :  { %v4913_v7 = vpop.eup %4912  ;;  %3412 = vst.msk [vmem:[%s7544_s9 + $0x80] sm:$0xff] %vm700_vm8, %v4911_v48 }
 0x47b   :  { %v4915_v3 = vpop.eup %4914  ;;  %3415 = vst.msk [vmem:[%s7544_s9 + $0x98] sm:$0xff] %vm700_vm8, %v4913_v7  ;;  %v4217_v53 = vpop.f32.mrb[20].mxu1 }
 0x47c   :  { %3413 = vst.msk [vmem:[%s7544_s9 + $0x88] sm:$0xff] %vm700_vm8, %v4915_v3  ;;  %v3326_v12 = vadd.f32 %v4217_v53, %v7373_v23  ;;  %v3317_v52 = vpop.f32.mrb[21].mxu1 }
 0x47d   :  { %v3318_v17 = vadd.f32 %v7373_v23, %v3317_v52  ;;  %v4218_v39 = vpop.f32.mrb[22].mxu1 }
 0x47e   :  { %4916 = vtanh.f32 %v3326_v12  ;;  %v3329_v59 = vadd.f32 %v4218_v39, %v7373_v23  ;;  %v3320_v36 = vpop.f32.mrb[23].mxu1 }
 0x47f   :  { %4918 = vtanh.f32 %v3318_v17  ;;  %v3321_v31 = vadd.f32 %v7373_v23, %v3320_v36 }
 0x480   :  { %4920 = vtanh.f32 %v3329_v59 }
 0x481   :  { %4922 = vtanh.f32 %v3321_v31 }
 0x488   :  { %v4917_v62 = vpop.eup %4916 }
 0x489   :  { %v4919_v5 = vpop.eup %4918  ;;  %3418 = vst.msk [vmem:[%s7544_s9 + $0xb0] sm:$0xff] %vm700_vm8, %v4917_v62 }
 0x48a   :  { %v4921_v42 = vpop.eup %4920  ;;  %3416 = vst.msk [vmem:[%s7544_s9 + $0xa0] sm:$0xff] %vm700_vm8, %v4919_v5 }
 0x48b   :  { %v4923_v24 = vpop.eup %4922  ;;  %3419 = vst.msk [vmem:[%s7544_s9 + $0xb8] sm:$0xff] %vm700_vm8, %v4921_v42  ;;  %v4221_v32 = vpop.f32.mrb[24].mxu1 }
 0x48c   :  { %3417 = vst.msk [vmem:[%s7544_s9 + $0xa8] sm:$0xff] %vm700_vm8, %v4923_v24  ;;  %v3342_v45 = vadd.f32 %v4221_v32, %v7373_v23  ;;  %v3333_v8 = vpop.f32.mrb[25].mxu1 }
 0x48d   :  { %v3334_v10 = vadd.f32 %v7373_v23, %v3333_v8  ;;  %v4222_v6 = vpop.f32.mrb[26].mxu1 }
 0x48e   :  { %4924 = vtanh.f32 %v3342_v45  ;;  %v3345_v2 = vadd.f32 %v4222_v6, %v7373_v23  ;;  %v3336_v4 = vpop.f32.mrb[27].mxu1 }
 0x48f   :  { %4926 = vtanh.f32 %v3334_v10  ;;  %v3337_v51 = vadd.f32 %v7373_v23, %v3336_v4 }
 0x490   :  { %4928 = vtanh.f32 %v3345_v2 }
 0x491   :  { %4930 = vtanh.f32 %v3337_v51 }
 0x498   :  { %v4925_v29 = vpop.eup %4924 }
 0x499   :  { %v4927_v47 = vpop.eup %4926  ;;  %3422 = vst.msk [vmem:[%s7544_s9 + $0xd0] sm:$0xff] %vm700_vm8, %v4925_v29 }
 0x49a   :  { %v4929_v54 = vpop.eup %4928  ;;  %3420 = vst.msk [vmem:[%s7544_s9 + $0xc0] sm:$0xff] %vm700_vm8, %v4927_v47 }
 0x49b   :  { %v4931_v13 = vpop.eup %4930  ;;  %3423 = vst.msk [vmem:[%s7544_s9 + $0xd8] sm:$0xff] %vm700_vm8, %v4929_v54  ;;  %v4225_v28 = vpop.f32.mrb[28].mxu1 }
 0x49c   :  { %3421 = vst.msk [vmem:[%s7544_s9 + $0xc8] sm:$0xff] %vm700_vm8, %v4931_v13  ;;  %v3358_v18 = vadd.f32 %v4225_v28, %v7373_v23  ;;  %v3349_v58 = vpop.f32.mrb[29].mxu1 }
 0x49d   :  { %v3350_v41 = vadd.f32 %v7373_v23, %v3349_v58  ;;  %v4226_v1 = vpop.f32.mrb[30].mxu1 }
 0x49e   :  { %4932 = vtanh.f32 %v3358_v18  ;;  %v3361_v9 = vadd.f32 %v4226_v1, %v7373_v23  ;;  %v3352_v26 = vpop.f32.mrb[31].mxu1 }
 0x49f   :  { %4934 = vtanh.f32 %v3350_v41  ;;  %v3353_v46 = vadd.f32 %v7373_v23, %v3352_v26 }
 0x4a0   :  { %4936 = vtanh.f32 %v3361_v9 }
 0x4a1   :  { %4938 = vtanh.f32 %v3353_v46 }
 0x4a8   :  { %v4933_v56 = vpop.eup %4932 }
 0x4a9   :  { %v4935_v49 = vpop.eup %4934  ;;  %3426 = vst.msk [vmem:[%s7544_s9 + $0xf0] sm:$0xff] %vm700_vm8, %v4933_v56 }
 0x4aa   :  { %v4937_v38 = vpop.eup %4936  ;;  %3424 = vst.msk [vmem:[%s7544_s9 + $0xe0] sm:$0xff] %vm700_vm8, %v4935_v49 }
 0x4ab   :  { %v4939_v19 = vpop.eup %4938  ;;  %3427 = vst.msk [vmem:[%s7544_s9 + $0xf8] sm:$0xff] %vm700_vm8, %v4937_v38 }
 0x4ac   :  { %3425 = vst.msk [vmem:[%s7544_s9 + $0xe8] sm:$0xff] %vm700_vm8, %v4939_v19 }

</bundles_post_ra>
